<compile_context>
chip_gen: v5e
topology: v5e:2x2
jax: 0.10.0
libtpu: 0.0.40
codegen_flags: <defaults>
</compile_context>

<pallas_src>
import functools
import math

import jax
import jax.numpy as jnp
from jax.experimental import pallas as pl
from jax.experimental.pallas import tpu as pltpu


# ----------------------------- in-kernel helpers ------------------------------

def _layernorm(x, gamma, beta, eps=1e-5):
    mu = jnp.mean(x, axis=-1, keepdims=True)
    xc = x - mu
    var = jnp.mean(xc * xc, axis=-1, keepdims=True)
    return xc * jax.lax.rsqrt(var + eps) * gamma + beta


def _gelu_exact(x):
    # torch.nn.GELU default (erf based)
    return 0.5 * x * (1.0 + jax.lax.erf(x * (1.0 / math.sqrt(2.0))))


def _softmax_last(x):
    m = jnp.max(x, axis=-1, keepdims=True)
    e = jnp.exp(x - m)
    # divide -> EUP reciprocal (VALU slot freed; sum >= 1 so approx is safe)
    return e * pl.reciprocal(jnp.sum(e, axis=-1, keepdims=True), approx=True)


# ------------------------------- fused block kernel ---------------------------

def encoder_block_kernel(K, H, B_blk, N_out, C_in, C_out, hidden,
                         x_ref,                      # (B_blk, Npad, C_in)  f32
                         w3_ref,                     # (K*C_in, C_in)       bf16
                         w1_ref,                     # (C_in, C_out)        bf16
                         wqkv_ref,                   # (C_out, 3*H*C_out)   bf16
                         wproj_ref,                  # (H*C_out, C_out)     bf16
                         bproj_ref,                  # (1, C_out)           f32
                         wm1_ref, bm1_ref,           # (C_out, hidden) bf16, (1, hidden) f32
                         wc_ref, bc_ref,             # (3*hidden, hidden) bf16, (1, hidden) f32
                         wm2_ref, bm2_ref,           # (hidden, C_out) bf16, (1, C_out) f32
                         g1_ref, b1_ref, g2_ref, b2_ref,   # (1, C_out) f32 each
                         out_ref):                   # (B_blk, N_out, C_out) f32
    f32 = jnp.float32
    cdt = w1_ref.dtype          # bf16 matmul-operand dtype, f32 accumulation
    M = B_blk * N_out

    # ---- merge3x3 (Conv1d, bias=False): single im2col matmul -----------------
    xb = x_ref[...].astype(cdt)                               # (B_blk, Npad, C_in)
    if K > 1:
        xcol = jnp.concatenate([xb[:, k:k + N_out, :] for k in range(K)], axis=-1)
    else:
        xcol = xb
    xcol = xcol.reshape(M, K * C_in)
    h = jnp.dot(xcol, w3_ref[...], preferred_element_type=f32)        # (M, C_in)

    # ---- merge1x1 (Conv1d k=1, bias=False) -----------------------------------
    x = jnp.dot(h.astype(cdt), w1_ref[...], preferred_element_type=f32)   # (M, C_out)

    # ---- SelfAttention (each head uses the FULL dim C_out, as in the ref) ----
    # One fused QKV matmul; per-head (tiny) batched score/softmax/value matmuls;
    # one fused output projection over concatenated heads.
    scale = (C_out // H) ** (-0.5)
    qkv = jnp.dot(x.astype(cdt), wqkv_ref[...], preferred_element_type=f32)
    qkv = qkv.reshape(B_blk, N_out, 3 * H * C_out)
    heads = []
    for hh in range(H):
        q = qkv[:, :, (0 * H + hh) * C_out:(0 * H + hh + 1) * C_out].astype(cdt)
        k_ = qkv[:, :, (1 * H + hh) * C_out:(1 * H + hh + 1) * C_out].astype(cdt)
        v = qkv[:, :, (2 * H + hh) * C_out:(2 * H + hh + 1) * C_out].astype(cdt)
        s = jnp.einsum('bqd,bkd->bqk', q, k_,
                       preferred_element_type=f32) * scale            # (B, N, N)
        p = _softmax_last(s).astype(cdt)
        heads.append(jnp.einsum('bqk,bkd->bqd', p, v,
                                preferred_element_type=f32))           # (B, N, C_out)
    o = heads[0] if H == 1 else jnp.concatenate(heads, axis=-1)        # (B, N, H*C_out)
    o = o.reshape(M, H * C_out)
    y = jnp.dot(o.astype(cdt), wproj_ref[...],
                preferred_element_type=f32) + bproj_ref[...]

    x = _layernorm(y + x, g1_ref[...], b1_ref[...])                    # (M, C_out) f32

    # ---- MixFFN: mlp1 -> Conv1d(k=3, pad=1) as im2col -> GELU -> mlp2 --------
    h1 = jnp.dot(x.astype(cdt), wm1_ref[...],
                 preferred_element_type=f32) + bm1_ref[...]            # (M, hidden)
    h1_3 = h1.reshape(B_blk, N_out, hidden)
    zrow = jnp.zeros((B_blk, 1, hidden), f32)
    prev = jnp.concatenate([zrow, h1_3[:, :N_out - 1, :]], axis=1)     # h1[n-1], 0 at n=0
    nxt = jnp.concatenate([h1_3[:, 1:, :], zrow], axis=1)              # h1[n+1], 0 at n=N-1
    hcol = jnp.concatenate([prev, h1_3, nxt], axis=-1).reshape(M, 3 * hidden)
    conv = jnp.dot(hcol.astype(cdt), wc_ref[...],
                   preferred_element_type=f32) + bc_ref[...]
    h3 = jnp.dot(_gelu_exact(conv).astype(cdt), wm2_ref[...],
                 preferred_element_type=f32) + bm2_ref[...]

    out = _layernorm(h3 + x, g2_ref[...], b2_ref[...])
    out_ref[...] = out.reshape(B_blk, N_out, C_out)


# ------------------------------- wrapper ---------------------------------------

def _pick_block_b(B):
    """Largest batch block whose grid-step count is even (keeps both v7x TCs busy);
    fall back to one big step if B has no such divisor."""
    for d in range(B, 0, -1):
        if B % d == 0 and (B // d) % 2 == 0:
            return d
    return B


def encoder_block(x, bp, *, K, stride, H, C_in, C_out, hidden, block_b=None):
    """x: (B, N, C_in) float32 -> (B, N_out, C_out) float32."""
    B = x.shape[0]
    if stride > 1:
        # kernel_size==1 for strided blocks: stride-s conv == subsample then 1-tap conv
        x = x[:, ::stride, :]
    pad = K // 2
    if pad > 0:
        x = jnp.pad(x, ((0, 0), (pad, pad), (0, 0)))
    Npad = x.shape[1]
    N_out = Npad - (K - 1)

    if block_b is None:
        block_b = _pick_block_b(B)
    assert B % block_b == 0
    grid = (B // block_b,)

    kernel = functools.partial(encoder_block_kernel, K, H, block_b, N_out,
                               C_in, C_out, hidden)

    def full(shape):
        zeros = (0,) * len(shape)
        return pl.BlockSpec(shape, lambda b, z=zeros: z)

    in_specs = [
        pl.BlockSpec((block_b, Npad, C_in), lambda b: (b, 0, 0)),
        full(bp["w3"].shape),
        full(bp["w1"].shape),
        full(bp["wqkv"].shape),
        full(bp["wproj"].shape),
        full(bp["bproj"].shape),
        full(bp["wm1"].shape), full(bp["bm1"].shape),
        full(bp["wc"].shape), full(bp["bc"].shape),
        full(bp["wm2"].shape), full(bp["bm2"].shape),
        full(bp["g1"].shape), full(bp["b1"].shape),
        full(bp["g2"].shape), full(bp["b2"].shape),
    ]

    out = pl.pallas_call(
        kernel,
        out_shape=jax.ShapeDtypeStruct((B, N_out, C_out), jnp.float32),
        grid=grid,
        in_specs=in_specs,
        out_specs=pl.BlockSpec((block_b, N_out, C_out), lambda b: (b, 0, 0)),
        compiler_params=pltpu.CompilerParams(dimension_semantics=("parallel",)),
    )(x,
      bp["w3"], bp["w1"], bp["wqkv"], bp["wproj"], bp["bproj"],
      bp["wm1"], bp["bm1"], bp["wc"], bp["bc"], bp["wm2"], bp["bm2"],
      bp["g1"], bp["b1"], bp["g2"], bp["b2"])
    return out


# ------------------------------- config & params -------------------------------

def encoder_config(depth=2, embed_dim=128, kernel_size=3, expansion=1,
                   reduction=4, head=1):
    small = embed_dim // reduction
    dim_ins = [small * 2 ** i for i in range(depth - 1)]
    dim_ins.insert(0, embed_dim)
    dim_outs = [small * 2 ** i for i in range(depth)]
    heads = [head * (i + 1) for i in range(depth)]
    kernels = [kernel_size - (2 if i > 0 else 0) for i in range(depth)]
    strides = [2 for _ in range(depth - 1)]
    strides.insert(0, 1)
    blocks = []
    for ci, co, h, k, s in zip(dim_ins, dim_outs, heads, kernels, strides):
        blocks.append(dict(K=k, stride=s, H=h, C_in=ci, C_out=co,
                           hidden=co * expansion))
    return dict(embed_dim=embed_dim, blocks=blocks)


def init_params(key, cfg, vocab_size):
    """Weights are stored pre-fused in the kernel layout (NOT PyTorch's):
         w3    (K*C_in, C_in)      <- Conv1d weight (C_out,C_in,K) permuted (2,1,0) + merged
         w1    (C_in,  C_out)      <- Conv1d k=1 weight transposed
         wqkv  (C_out, 3*H*C_out)  <- Linear weight (3*H*C_out, C_out) transposed
         wproj (H*C_out, C_out)    <- Linear weight (C_out, H*C_out) transposed
         wc    (3*hid, hid)        <- Conv1d weight (hid,hid,3) permuted + merged
       Matmul weights are bfloat16 (f32 MXU accumulation); biases / LayerNorm are f32.
    """
    bf16 = jnp.bfloat16

    def nrm(k, shape, scale=0.05, dtype=bf16):
        return (scale * jax.random.normal(k, shape, jnp.float32)).astype(dtype)

    key, ek = jax.random.split(key)
    embed = 0.1 * jax.random.normal(ek, (vocab_size, cfg["embed_dim"]), jnp.float32)
    embed = embed.at[0].set(0.0)   # padding_idx=0

    blocks = []
    for blk in cfg["blocks"]:
        K, H = blk["K"], blk["H"]
        ci, co, hid = blk["C_in"], blk["C_out"], blk["hidden"]
        key, *ks = jax.random.split(key, 9)
        blocks.append(dict(
            w3=nrm(ks[0], (K * ci, ci)),
            w1=nrm(ks[1], (ci, co)),
            wqkv=nrm(ks[2], (co, 3 * H * co)),
            wproj=nrm(ks[3], (H * co, co)),
            bproj=jnp.zeros((1, co), jnp.float32),
            wm1=nrm(ks[4], (co, hid)),
            bm1=nrm(ks[5], (1, hid), 0.01, jnp.float32),
            wc=nrm(ks[6], (3 * hid, hid)),
            bc=jnp.zeros((1, hid), jnp.float32),
            wm2=nrm(ks[7], (hid, co)),
            bm2=jnp.zeros((1, co), jnp.float32),
            g1=jnp.ones((1, co), jnp.float32),
            b1=jnp.zeros((1, co), jnp.float32),
            g2=jnp.ones((1, co), jnp.float32),
            b2=jnp.zeros((1, co), jnp.float32),
        ))
    return dict(embed=embed, blocks=blocks)


def encoder_forward(phoneme, params, cfg):
    # embedding gather (glue)
    x = jnp.take(params["embed"], phoneme, axis=0)   # (B, N, embed_dim)
    features = []
    for blk_cfg, bp in zip(cfg["blocks"], params["blocks"]):
        x = encoder_block(x, bp, **blk_cfg)
        features.append(x)
    decoder_mask = None   # mask=None path only
    return features, decoder_mask


# ------------------------------------ main --------------------------------------

if __name__ == "__main__":
    cfg = encoder_config(depth=2, embed_dim=128, kernel_size=3,
                         expansion=1, reduction=4, head=1)
    VOCAB = 41   # len(symbols) + 1 ; `symbols` is external, pick 40 symbols
    B, N = 4, 16

    key = jax.random.PRNGKey(0)
    key, pk = jax.random.split(key)
    phoneme = jax.random.randint(pk, (B, N), 1, VOCAB, dtype=jnp.int32)

    params = init_params(key, cfg, VOCAB)

    fwd = jax.jit(functools.partial(encoder_forward, cfg=cfg))
    features, decoder_mask = fwd(phoneme, params)
    features = jax.block_until_ready(features)

    assert features[0].shape == (B, N, 32)
    assert features[1].shape == (B, N // 2, 64)
    assert all(bool(jnp.all(jnp.isfinite(f))) for f in features)
    print("KERNEL_OK")
</pallas_src>

<mosaic_0001>
module attributes {stable_mosaic.version = 11 : i64} {
  func.func @encoder_block_kernel(%arg0: i32, %arg1: memref<2x18x128xf32, #tpu.memory_space<vmem>>, %arg2: memref<384x128xbf16, #tpu.memory_space<vmem>>, %arg3: memref<128x32xbf16, #tpu.memory_space<vmem>>, %arg4: memref<32x96xbf16, #tpu.memory_space<vmem>>, %arg5: memref<32x32xbf16, #tpu.memory_space<vmem>>, %arg6: memref<1x32xf32, #tpu.memory_space<vmem>>, %arg7: memref<32x32xbf16, #tpu.memory_space<vmem>>, %arg8: memref<1x32xf32, #tpu.memory_space<vmem>>, %arg9: memref<96x32xbf16, #tpu.memory_space<vmem>>, %arg10: memref<1x32xf32, #tpu.memory_space<vmem>>, %arg11: memref<32x32xbf16, #tpu.memory_space<vmem>>, %arg12: memref<1x32xf32, #tpu.memory_space<vmem>>, %arg13: memref<1x32xf32, #tpu.memory_space<vmem>>, %arg14: memref<1x32xf32, #tpu.memory_space<vmem>>, %arg15: memref<1x32xf32, #tpu.memory_space<vmem>>, %arg16: memref<1x32xf32, #tpu.memory_space<vmem>>, %arg17: memref<2x16x32xf32, #tpu.memory_space<vmem>>) attributes {dimension_semantics = [#tpu.dimension_semantics<parallel>], iteration_bounds = array<i64: 2>, scalar_prefetch = 0 : i64, scratch_operands = 0 : i64, tpu.core_type = #tpu.core_type<tc>, window_params = [{transform_indices = @transform_0, window_bounds = array<i64: 2, 18, 128>}, {pipeline_mode = #tpu.pipeline_mode<synchronous>, transform_indices = @transform_1, window_bounds = array<i64: 384, 128>}, {pipeline_mode = #tpu.pipeline_mode<synchronous>, transform_indices = @transform_2, window_bounds = array<i64: 128, 32>}, {pipeline_mode = #tpu.pipeline_mode<synchronous>, transform_indices = @transform_3, window_bounds = array<i64: 32, 96>}, {pipeline_mode = #tpu.pipeline_mode<synchronous>, transform_indices = @transform_4, window_bounds = array<i64: 32, 32>}, {pipeline_mode = #tpu.pipeline_mode<synchronous>, transform_indices = @transform_5, window_bounds = array<i64: 1, 32>}, {pipeline_mode = #tpu.pipeline_mode<synchronous>, transform_indices = @transform_6, window_bounds = array<i64: 32, 32>}, {pipeline_mode = #tpu.pipeline_mode<synchronous>, transform_indices = @transform_7, window_bounds = array<i64: 1, 32>}, {pipeline_mode = #tpu.pipeline_mode<synchronous>, transform_indices = @transform_8, window_bounds = array<i64: 96, 32>}, {pipeline_mode = #tpu.pipeline_mode<synchronous>, transform_indices = @transform_9, window_bounds = array<i64: 1, 32>}, {pipeline_mode = #tpu.pipeline_mode<synchronous>, transform_indices = @transform_10, window_bounds = array<i64: 32, 32>}, {pipeline_mode = #tpu.pipeline_mode<synchronous>, transform_indices = @transform_11, window_bounds = array<i64: 1, 32>}, {pipeline_mode = #tpu.pipeline_mode<synchronous>, transform_indices = @transform_12, window_bounds = array<i64: 1, 32>}, {pipeline_mode = #tpu.pipeline_mode<synchronous>, transform_indices = @transform_13, window_bounds = array<i64: 1, 32>}, {pipeline_mode = #tpu.pipeline_mode<synchronous>, transform_indices = @transform_14, window_bounds = array<i64: 1, 32>}, {pipeline_mode = #tpu.pipeline_mode<synchronous>, transform_indices = @transform_15, window_bounds = array<i64: 1, 32>}, {transform_indices = @transform_16, window_bounds = array<i64: 2, 16, 32>}]} {
    %c0 = arith.constant 0 : index
    %c0_0 = arith.constant 0 : index
    %c0_1 = arith.constant 0 : index
    %0 = vector.load %arg1[%c0, %c0_0, %c0_1] : memref<2x18x128xf32, #tpu.memory_space<vmem>>, vector<2x18x128xf32>
    %1 = arith.truncf %0 : vector<2x18x128xf32> to vector<2x18x128xbf16>
    %2 = vector.extract_strided_slice %1 {offsets = [0, 0, 0], sizes = [2, 16, 128], strides = [1, 1, 1]} : vector<2x18x128xbf16> to vector<2x16x128xbf16>
    %3 = vector.extract_strided_slice %1 {offsets = [0, 1, 0], sizes = [2, 16, 128], strides = [1, 1, 1]} : vector<2x18x128xbf16> to vector<2x16x128xbf16>
    %4 = vector.extract_strided_slice %1 {offsets = [0, 2, 0], sizes = [2, 16, 128], strides = [1, 1, 1]} : vector<2x18x128xbf16> to vector<2x16x128xbf16>
    %5 = tpu.concatenate %2, %3, %4 in 2 : vector<2x16x128xbf16>, vector<2x16x128xbf16>, vector<2x16x128xbf16> -> vector<2x16x384xbf16>
    %6 = vector.shape_cast %5 : vector<2x16x384xbf16> to vector<32x384xbf16>
    %c0_2 = arith.constant 0 : index
    %c0_3 = arith.constant 0 : index
    %7 = vector.load %arg2[%c0_2, %c0_3] : memref<384x128xbf16, #tpu.memory_space<vmem>>, vector<384x128xbf16>
    %cst = arith.constant dense<0.000000e+00> : vector<32x128xf32>
    %8 = tpu.matmul %6, %7, %cst {dimension_numbers = #tpu.dot_dimension_numbers<[1], [0], [0], [1], [0, 0, 1, 1], [], []>} : vector<32x384xbf16>, vector<384x128xbf16>, vector<32x128xf32> -> vector<32x128xf32>
    %9 = arith.truncf %8 : vector<32x128xf32> to vector<32x128xbf16>
    %c0_4 = arith.constant 0 : index
    %c0_5 = arith.constant 0 : index
    %10 = vector.load %arg3[%c0_4, %c0_5] : memref<128x32xbf16, #tpu.memory_space<vmem>>, vector<128x32xbf16>
    %cst_6 = arith.constant dense<0.000000e+00> : vector<32x32xf32>
    %11 = tpu.matmul %9, %10, %cst_6 {dimension_numbers = #tpu.dot_dimension_numbers<[1], [0], [0], [1], [0, 0, 1, 1], [], []>} : vector<32x128xbf16>, vector<128x32xbf16>, vector<32x32xf32> -> vector<32x32xf32>
    %12 = arith.truncf %11 : vector<32x32xf32> to vector<32x32xbf16>
    %c0_7 = arith.constant 0 : index
    %c0_8 = arith.constant 0 : index
    %13 = vector.load %arg4[%c0_7, %c0_8] : memref<32x96xbf16, #tpu.memory_space<vmem>>, vector<32x96xbf16>
    %cst_9 = arith.constant dense<0.000000e+00> : vector<32x96xf32>
    %14 = tpu.matmul %12, %13, %cst_9 {dimension_numbers = #tpu.dot_dimension_numbers<[1], [0], [0], [1], [0, 0, 1, 1], [], []>} : vector<32x32xbf16>, vector<32x96xbf16>, vector<32x96xf32> -> vector<32x96xf32>
    %15 = vector.shape_cast %14 : vector<32x96xf32> to vector<2x16x96xf32>
    %16 = vector.extract_strided_slice %15 {offsets = [0, 0, 0], sizes = [2, 16, 32], strides = [1, 1, 1]} : vector<2x16x96xf32> to vector<2x16x32xf32>
    %17 = arith.truncf %16 : vector<2x16x32xf32> to vector<2x16x32xbf16>
    %18 = vector.extract_strided_slice %15 {offsets = [0, 0, 32], sizes = [2, 16, 32], strides = [1, 1, 1]} : vector<2x16x96xf32> to vector<2x16x32xf32>
    %19 = arith.truncf %18 : vector<2x16x32xf32> to vector<2x16x32xbf16>
    %20 = vector.extract_strided_slice %15 {offsets = [0, 0, 64], sizes = [2, 16, 32], strides = [1, 1, 1]} : vector<2x16x96xf32> to vector<2x16x32xf32>
    %21 = arith.truncf %20 : vector<2x16x32xf32> to vector<2x16x32xbf16>
    "tpu.trace_start"() <{level = 10 : i32, message = "bqd,bkd->bqk"}> : () -> ()
    %cst_10 = arith.constant dense<0.000000e+00> : vector<2x16x16xf32>
    %22 = tpu.matmul %17, %19, %cst_10 {dimension_numbers = #tpu.dot_dimension_numbers<[2], [2], [1], [1], [0, 0, 0, 1, 1, 1], [0], [0]>} : vector<2x16x32xbf16>, vector<2x16x32xbf16>, vector<2x16x16xf32> -> vector<2x16x16xf32>
    "tpu.trace_stop"() : () -> ()
    %cst_11 = arith.constant 0.176776692 : f32
    %23 = vector.broadcast %cst_11 : f32 to vector<2x16x16xf32>
    %24 = arith.mulf %22, %23 : vector<2x16x16xf32>
    %cst_12 = arith.constant dense<0xFF800000> : vector<2x16xf32>
    %25 = vector.multi_reduction <maximumf>, %24, %cst_12 [2] : vector<2x16x16xf32> to vector<2x16xf32>
    %26 = vector.shape_cast %25 : vector<2x16xf32> to vector<2x16x1xf32>
    %27 = vector.broadcast %26 : vector<2x16x1xf32> to vector<2x16x16xf32>
    %28 = arith.subf %24, %27 : vector<2x16x16xf32>
    %29 = math.exp %28 : vector<2x16x16xf32>
    %cst_13 = arith.constant dense<0.000000e+00> : vector<2x16xf32>
    %30 = vector.multi_reduction <add>, %29, %cst_13 [2] : vector<2x16x16xf32> to vector<2x16xf32>
    %31 = vector.shape_cast %30 : vector<2x16xf32> to vector<2x16x1xf32>
    %32 = tpu.reciprocal %31 {approx = true} : vector<2x16x1xf32> -> vector<2x16x1xf32>
    %33 = vector.broadcast %32 : vector<2x16x1xf32> to vector<2x16x16xf32>
    %34 = arith.mulf %29, %33 : vector<2x16x16xf32>
    %35 = arith.truncf %34 : vector<2x16x16xf32> to vector<2x16x16xbf16>
    "tpu.trace_start"() <{level = 10 : i32, message = "bqk,bkd->bqd"}> : () -> ()
    %cst_14 = arith.constant dense<0.000000e+00> : vector<2x16x32xf32>
    %36 = tpu.matmul %35, %21, %cst_14 {dimension_numbers = #tpu.dot_dimension_numbers<[2], [1], [1], [2], [0, 0, 0, 1, 1, 2], [0], [0]>} : vector<2x16x16xbf16>, vector<2x16x32xbf16>, vector<2x16x32xf32> -> vector<2x16x32xf32>
    "tpu.trace_stop"() : () -> ()
    %37 = vector.shape_cast %36 : vector<2x16x32xf32> to vector<32x32xf32>
    %38 = arith.truncf %37 : vector<32x32xf32> to vector<32x32xbf16>
    %c0_15 = arith.constant 0 : index
    %c0_16 = arith.constant 0 : index
    %39 = vector.load %arg5[%c0_15, %c0_16] : memref<32x32xbf16, #tpu.memory_space<vmem>>, vector<32x32xbf16>
    %cst_17 = arith.constant dense<0.000000e+00> : vector<32x32xf32>
    %40 = tpu.matmul %38, %39, %cst_17 {dimension_numbers = #tpu.dot_dimension_numbers<[1], [0], [0], [1], [0, 0, 1, 1], [], []>} : vector<32x32xbf16>, vector<32x32xbf16>, vector<32x32xf32> -> vector<32x32xf32>
    %c0_18 = arith.constant 0 : index
    %c0_19 = arith.constant 0 : index
    %41 = vector.load %arg6[%c0_18, %c0_19] : memref<1x32xf32, #tpu.memory_space<vmem>>, vector<1x32xf32>
    %42 = vector.broadcast %41 : vector<1x32xf32> to vector<32x32xf32>
    %43 = arith.addf %40, %42 : vector<32x32xf32>
    %44 = arith.addf %43, %11 : vector<32x32xf32>
    %c0_20 = arith.constant 0 : index
    %c0_21 = arith.constant 0 : index
    %45 = vector.load %arg13[%c0_20, %c0_21] : memref<1x32xf32, #tpu.memory_space<vmem>>, vector<1x32xf32>
    %c0_22 = arith.constant 0 : index
    %c0_23 = arith.constant 0 : index
    %46 = vector.load %arg14[%c0_22, %c0_23] : memref<1x32xf32, #tpu.memory_space<vmem>>, vector<1x32xf32>
    %cst_24 = arith.constant dense<0.000000e+00> : vector<32xf32>
    %47 = vector.multi_reduction <add>, %44, %cst_24 [1] : vector<32x32xf32> to vector<32xf32>
    %48 = vector.shape_cast %47 : vector<32xf32> to vector<32x1xf32>
    %cst_25 = arith.constant 3.200000e+01 : f32
    %49 = vector.broadcast %cst_25 : f32 to vector<32x1xf32>
    %50 = arith.divf %48, %49 : vector<32x1xf32>
    %51 = vector.broadcast %50 : vector<32x1xf32> to vector<32x32xf32>
    %52 = arith.subf %44, %51 : vector<32x32xf32>
    %53 = arith.mulf %52, %52 : vector<32x32xf32>
    %cst_26 = arith.constant dense<0.000000e+00> : vector<32xf32>
    %54 = vector.multi_reduction <add>, %53, %cst_26 [1] : vector<32x32xf32> to vector<32xf32>
    %55 = vector.shape_cast %54 : vector<32xf32> to vector<32x1xf32>
    %cst_27 = arith.constant 3.200000e+01 : f32
    %56 = vector.broadcast %cst_27 : f32 to vector<32x1xf32>
    %57 = arith.divf %55, %56 : vector<32x1xf32>
    %cst_28 = arith.constant 9.99999974E-6 : f32
    %58 = vector.broadcast %cst_28 : f32 to vector<32x1xf32>
    %59 = arith.addf %57, %58 : vector<32x1xf32>
    %60 = math.rsqrt %59 : vector<32x1xf32>
    %61 = vector.broadcast %60 : vector<32x1xf32> to vector<32x32xf32>
    %62 = arith.mulf %52, %61 : vector<32x32xf32>
    %63 = vector.broadcast %45 : vector<1x32xf32> to vector<32x32xf32>
    %64 = arith.mulf %62, %63 : vector<32x32xf32>
    %65 = vector.broadcast %46 : vector<1x32xf32> to vector<32x32xf32>
    %66 = arith.addf %64, %65 : vector<32x32xf32>
    %67 = arith.truncf %66 : vector<32x32xf32> to vector<32x32xbf16>
    %c0_29 = arith.constant 0 : index
    %c0_30 = arith.constant 0 : index
    %68 = vector.load %arg7[%c0_29, %c0_30] : memref<32x32xbf16, #tpu.memory_space<vmem>>, vector<32x32xbf16>
    %cst_31 = arith.constant dense<0.000000e+00> : vector<32x32xf32>
    %69 = tpu.matmul %67, %68, %cst_31 {dimension_numbers = #tpu.dot_dimension_numbers<[1], [0], [0], [1], [0, 0, 1, 1], [], []>} : vector<32x32xbf16>, vector<32x32xbf16>, vector<32x32xf32> -> vector<32x32xf32>
    %c0_32 = arith.constant 0 : index
    %c0_33 = arith.constant 0 : index
    %70 = vector.load %arg8[%c0_32, %c0_33] : memref<1x32xf32, #tpu.memory_space<vmem>>, vector<1x32xf32>
    %71 = vector.broadcast %70 : vector<1x32xf32> to vector<32x32xf32>
    %72 = arith.addf %69, %71 : vector<32x32xf32>
    %73 = vector.shape_cast %72 : vector<32x32xf32> to vector<2x16x32xf32>
    %cst_34 = arith.constant 0.000000e+00 : f32
    %74 = vector.broadcast %cst_34 : f32 to vector<2x1x32xf32>
    %75 = vector.extract_strided_slice %73 {offsets = [0, 0, 0], sizes = [2, 15, 32], strides = [1, 1, 1]} : vector<2x16x32xf32> to vector<2x15x32xf32>
    %76 = tpu.concatenate %74, %75 in 1 : vector<2x1x32xf32>, vector<2x15x32xf32> -> vector<2x16x32xf32>
    %77 = vector.extract_strided_slice %73 {offsets = [0, 1, 0], sizes = [2, 15, 32], strides = [1, 1, 1]} : vector<2x16x32xf32> to vector<2x15x32xf32>
    %78 = tpu.concatenate %77, %74 in 1 : vector<2x15x32xf32>, vector<2x1x32xf32> -> vector<2x16x32xf32>
    %79 = tpu.concatenate %76, %73, %78 in 2 : vector<2x16x32xf32>, vector<2x16x32xf32>, vector<2x16x32xf32> -> vector<2x16x96xf32>
    %80 = vector.shape_cast %79 : vector<2x16x96xf32> to vector<32x96xf32>
    %81 = arith.truncf %80 : vector<32x96xf32> to vector<32x96xbf16>
    %c0_35 = arith.constant 0 : index
    %c0_36 = arith.constant 0 : index
    %82 = vector.load %arg9[%c0_35, %c0_36] : memref<96x32xbf16, #tpu.memory_space<vmem>>, vector<96x32xbf16>
    %cst_37 = arith.constant dense<0.000000e+00> : vector<32x32xf32>
    %83 = tpu.matmul %81, %82, %cst_37 {dimension_numbers = #tpu.dot_dimension_numbers<[1], [0], [0], [1], [0, 0, 1, 1], [], []>} : vector<32x96xbf16>, vector<96x32xbf16>, vector<32x32xf32> -> vector<32x32xf32>
    %c0_38 = arith.constant 0 : index
    %c0_39 = arith.constant 0 : index
    %84 = vector.load %arg10[%c0_38, %c0_39] : memref<1x32xf32, #tpu.memory_space<vmem>>, vector<1x32xf32>
    %85 = vector.broadcast %84 : vector<1x32xf32> to vector<32x32xf32>
    %86 = arith.addf %83, %85 : vector<32x32xf32>
    %cst_40 = arith.constant 5.000000e-01 : f32
    %87 = vector.broadcast %cst_40 : f32 to vector<32x32xf32>
    %88 = arith.mulf %87, %86 : vector<32x32xf32>
    %cst_41 = arith.constant 0.707106769 : f32
    %89 = vector.broadcast %cst_41 : f32 to vector<32x32xf32>
    %90 = arith.mulf %86, %89 : vector<32x32xf32>
    %91 = math.erf %90 : vector<32x32xf32>
    %cst_42 = arith.constant 1.000000e+00 : f32
    %92 = vector.broadcast %cst_42 : f32 to vector<32x32xf32>
    %93 = arith.addf %92, %91 : vector<32x32xf32>
    %94 = arith.mulf %88, %93 : vector<32x32xf32>
    %95 = arith.truncf %94 : vector<32x32xf32> to vector<32x32xbf16>
    %c0_43 = arith.constant 0 : index
    %c0_44 = arith.constant 0 : index
    %96 = vector.load %arg11[%c0_43, %c0_44] : memref<32x32xbf16, #tpu.memory_space<vmem>>, vector<32x32xbf16>
    %cst_45 = arith.constant dense<0.000000e+00> : vector<32x32xf32>
    %97 = tpu.matmul %95, %96, %cst_45 {dimension_numbers = #tpu.dot_dimension_numbers<[1], [0], [0], [1], [0, 0, 1, 1], [], []>} : vector<32x32xbf16>, vector<32x32xbf16>, vector<32x32xf32> -> vector<32x32xf32>
    %c0_46 = arith.constant 0 : index
    %c0_47 = arith.constant 0 : index
    %98 = vector.load %arg12[%c0_46, %c0_47] : memref<1x32xf32, #tpu.memory_space<vmem>>, vector<1x32xf32>
    %99 = vector.broadcast %98 : vector<1x32xf32> to vector<32x32xf32>
    %100 = arith.addf %97, %99 : vector<32x32xf32>
    %101 = arith.addf %100, %66 : vector<32x32xf32>
    %c0_48 = arith.constant 0 : index
    %c0_49 = arith.constant 0 : index
    %102 = vector.load %arg15[%c0_48, %c0_49] : memref<1x32xf32, #tpu.memory_space<vmem>>, vector<1x32xf32>
    %c0_50 = arith.constant 0 : index
    %c0_51 = arith.constant 0 : index
    %103 = vector.load %arg16[%c0_50, %c0_51] : memref<1x32xf32, #tpu.memory_space<vmem>>, vector<1x32xf32>
    %cst_52 = arith.constant dense<0.000000e+00> : vector<32xf32>
    %104 = vector.multi_reduction <add>, %101, %cst_52 [1] : vector<32x32xf32> to vector<32xf32>
    %105 = vector.shape_cast %104 : vector<32xf32> to vector<32x1xf32>
    %cst_53 = arith.constant 3.200000e+01 : f32
    %106 = vector.broadcast %cst_53 : f32 to vector<32x1xf32>
    %107 = arith.divf %105, %106 : vector<32x1xf32>
    %108 = vector.broadcast %107 : vector<32x1xf32> to vector<32x32xf32>
    %109 = arith.subf %101, %108 : vector<32x32xf32>
    %110 = arith.mulf %109, %109 : vector<32x32xf32>
    %cst_54 = arith.constant dense<0.000000e+00> : vector<32xf32>
    %111 = vector.multi_reduction <add>, %110, %cst_54 [1] : vector<32x32xf32> to vector<32xf32>
    %112 = vector.shape_cast %111 : vector<32xf32> to vector<32x1xf32>
    %cst_55 = arith.constant 3.200000e+01 : f32
    %113 = vector.broadcast %cst_55 : f32 to vector<32x1xf32>
    %114 = arith.divf %112, %113 : vector<32x1xf32>
    %cst_56 = arith.constant 9.99999974E-6 : f32
    %115 = vector.broadcast %cst_56 : f32 to vector<32x1xf32>
    %116 = arith.addf %114, %115 : vector<32x1xf32>
    %117 = math.rsqrt %116 : vector<32x1xf32>
    %118 = vector.broadcast %117 : vector<32x1xf32> to vector<32x32xf32>
    %119 = arith.mulf %109, %118 : vector<32x32xf32>
    %120 = vector.broadcast %102 : vector<1x32xf32> to vector<32x32xf32>
    %121 = arith.mulf %119, %120 : vector<32x32xf32>
    %122 = vector.broadcast %103 : vector<1x32xf32> to vector<32x32xf32>
    %123 = arith.addf %121, %122 : vector<32x32xf32>
    %124 = vector.shape_cast %123 : vector<32x32xf32> to vector<2x16x32xf32>
    %c0_57 = arith.constant 0 : index
    %c0_58 = arith.constant 0 : index
    %c0_59 = arith.constant 0 : index
    %125 = vector.load %arg17[%c0_57, %c0_58, %c0_59] : memref<2x16x32xf32, #tpu.memory_space<vmem>>, vector<2x16x32xf32>
    tpu.vector_store %arg17[%c0_57, %c0_58, %c0_59], %124 {strides = array<i32>} : memref<2x16x32xf32, #tpu.memory_space<vmem>>, vector<2x16x32xf32>,
    return
  }
  func.func @transform_0(%arg0: i32) -> (i32, i32, i32) {
    %c0_i32 = arith.constant 0 : i32
    %c0_i32_0 = arith.constant 0 : i32
    %c0_i32_1 = arith.constant 0 : i32
    return %arg0, %c0_i32, %c0_i32_0 : i32, i32, i32
  }
  func.func @transform_1(%arg0: i32) -> (i32, i32) {
    %c0_i32 = arith.constant 0 : i32
    %c0_i32_0 = arith.constant 0 : i32
    %c0_i32_1 = arith.constant 0 : i32
    return %c0_i32, %c0_i32_0 : i32, i32
  }
  func.func @transform_2(%arg0: i32) -> (i32, i32) {
    %c0_i32 = arith.constant 0 : i32
    %c0_i32_0 = arith.constant 0 : i32
    %c0_i32_1 = arith.constant 0 : i32
    return %c0_i32, %c0_i32_0 : i32, i32
  }
  func.func @transform_3(%arg0: i32) -> (i32, i32) {
    %c0_i32 = arith.constant 0 : i32
    %c0_i32_0 = arith.constant 0 : i32
    %c0_i32_1 = arith.constant 0 : i32
    return %c0_i32, %c0_i32_0 : i32, i32
  }
  func.func @transform_4(%arg0: i32) -> (i32, i32) {
    %c0_i32 = arith.constant 0 : i32
    %c0_i32_0 = arith.constant 0 : i32
    %c0_i32_1 = arith.constant 0 : i32
    return %c0_i32, %c0_i32_0 : i32, i32
  }
  func.func @transform_5(%arg0: i32) -> (i32, i32) {
    %c0_i32 = arith.constant 0 : i32
    %c0_i32_0 = arith.constant 0 : i32
    %c0_i32_1 = arith.constant 0 : i32
    return %c0_i32, %c0_i32_0 : i32, i32
  }
  func.func @transform_6(%arg0: i32) -> (i32, i32) {
    %c0_i32 = arith.constant 0 : i32
    %c0_i32_0 = arith.constant 0 : i32
    %c0_i32_1 = arith.constant 0 : i32
    return %c0_i32, %c0_i32_0 : i32, i32
  }
  func.func @transform_7(%arg0: i32) -> (i32, i32) {
    %c0_i32 = arith.constant 0 : i32
    %c0_i32_0 = arith.constant 0 : i32
    %c0_i32_1 = arith.constant 0 : i32
    return %c0_i32, %c0_i32_0 : i32, i32
  }
  func.func @transform_8(%arg0: i32) -> (i32, i32) {
    %c0_i32 = arith.constant 0 : i32
    %c0_i32_0 = arith.constant 0 : i32
    %c0_i32_1 = arith.constant 0 : i32
    return %c0_i32, %c0_i32_0 : i32, i32
  }
  func.func @transform_9(%arg0: i32) -> (i32, i32) {
    %c0_i32 = arith.constant 0 : i32
    %c0_i32_0 = arith.constant 0 : i32
    %c0_i32_1 = arith.constant 0 : i32
    return %c0_i32, %c0_i32_0 : i32, i32
  }
  func.func @transform_10(%arg0: i32) -> (i32, i32) {
    %c0_i32 = arith.constant 0 : i32
    %c0_i32_0 = arith.constant 0 : i32
    %c0_i32_1 = arith.constant 0 : i32
    return %c0_i32, %c0_i32_0 : i32, i32
  }
  func.func @transform_11(%arg0: i32) -> (i32, i32) {
    %c0_i32 = arith.constant 0 : i32
    %c0_i32_0 = arith.constant 0 : i32
    %c0_i32_1 = arith.constant 0 : i32
    return %c0_i32, %c0_i32_0 : i32, i32
  }
  func.func @transform_12(%arg0: i32) -> (i32, i32) {
    %c0_i32 = arith.constant 0 : i32
    %c0_i32_0 = arith.constant 0 : i32
    %c0_i32_1 = arith.constant 0 : i32
    return %c0_i32, %c0_i32_0 : i32, i32
  }
  func.func @transform_13(%arg0: i32) -> (i32, i32) {
    %c0_i32 = arith.constant 0 : i32
    %c0_i32_0 = arith.constant 0 : i32
    %c0_i32_1 = arith.constant 0 : i32
    return %c0_i32, %c0_i32_0 : i32, i32
  }
  func.func @transform_14(%arg0: i32) -> (i32, i32) {
    %c0_i32 = arith.constant 0 : i32
    %c0_i32_0 = arith.constant 0 : i32
    %c0_i32_1 = arith.constant 0 : i32
    return %c0_i32, %c0_i32_0 : i32, i32
  }
  func.func @transform_15(%arg0: i32) -> (i32, i32) {
    %c0_i32 = arith.constant 0 : i32
    %c0_i32_0 = arith.constant 0 : i32
    %c0_i32_1 = arith.constant 0 : i32
    return %c0_i32, %c0_i32_0 : i32, i32
  }
  func.func @transform_16(%arg0: i32) -> (i32, i32, i32) {
    %c0_i32 = arith.constant 0 : i32
    %c0_i32_0 = arith.constant 0 : i32
    %c0_i32_1 = arith.constant 0 : i32
    return %arg0, %c0_i32, %c0_i32_0 : i32, i32, i32
  }
}

module attributes {stable_mosaic.version = 11 : i64} {
  func.func @encoder_block_kernel(%arg0: i32, %arg1: memref<2x8x32xf32, #tpu.memory_space<vmem>>, %arg2: memref<32x32xbf16, #tpu.memory_space<vmem>>, %arg3: memref<32x64xbf16, #tpu.memory_space<vmem>>, %arg4: memref<64x384xbf16, #tpu.memory_space<vmem>>, %arg5: memref<128x64xbf16, #tpu.memory_space<vmem>>, %arg6: memref<1x64xf32, #tpu.memory_space<vmem>>, %arg7: memref<64x64xbf16, #tpu.memory_space<vmem>>, %arg8: memref<1x64xf32, #tpu.memory_space<vmem>>, %arg9: memref<192x64xbf16, #tpu.memory_space<vmem>>, %arg10: memref<1x64xf32, #tpu.memory_space<vmem>>, %arg11: memref<64x64xbf16, #tpu.memory_space<vmem>>, %arg12: memref<1x64xf32, #tpu.memory_space<vmem>>, %arg13: memref<1x64xf32, #tpu.memory_space<vmem>>, %arg14: memref<1x64xf32, #tpu.memory_space<vmem>>, %arg15: memref<1x64xf32, #tpu.memory_space<vmem>>, %arg16: memref<1x64xf32, #tpu.memory_space<vmem>>, %arg17: memref<2x8x64xf32, #tpu.memory_space<vmem>>) attributes {dimension_semantics = [#tpu.dimension_semantics<parallel>], iteration_bounds = array<i64: 2>, scalar_prefetch = 0 : i64, scratch_operands = 0 : i64, tpu.core_type = #tpu.core_type<tc>, window_params = [{transform_indices = @transform_0, window_bounds = array<i64: 2, 8, 32>}, {pipeline_mode = #tpu.pipeline_mode<synchronous>, transform_indices = @transform_1, window_bounds = array<i64: 32, 32>}, {pipeline_mode = #tpu.pipeline_mode<synchronous>, transform_indices = @transform_2, window_bounds = array<i64: 32, 64>}, {pipeline_mode = #tpu.pipeline_mode<synchronous>, transform_indices = @transform_3, window_bounds = array<i64: 64, 384>}, {pipeline_mode = #tpu.pipeline_mode<synchronous>, transform_indices = @transform_4, window_bounds = array<i64: 128, 64>}, {pipeline_mode = #tpu.pipeline_mode<synchronous>, transform_indices = @transform_5, window_bounds = array<i64: 1, 64>}, {pipeline_mode = #tpu.pipeline_mode<synchronous>, transform_indices = @transform_6, window_bounds = array<i64: 64, 64>}, {pipeline_mode = #tpu.pipeline_mode<synchronous>, transform_indices = @transform_7, window_bounds = array<i64: 1, 64>}, {pipeline_mode = #tpu.pipeline_mode<synchronous>, transform_indices = @transform_8, window_bounds = array<i64: 192, 64>}, {pipeline_mode = #tpu.pipeline_mode<synchronous>, transform_indices = @transform_9, window_bounds = array<i64: 1, 64>}, {pipeline_mode = #tpu.pipeline_mode<synchronous>, transform_indices = @transform_10, window_bounds = array<i64: 64, 64>}, {pipeline_mode = #tpu.pipeline_mode<synchronous>, transform_indices = @transform_11, window_bounds = array<i64: 1, 64>}, {pipeline_mode = #tpu.pipeline_mode<synchronous>, transform_indices = @transform_12, window_bounds = array<i64: 1, 64>}, {pipeline_mode = #tpu.pipeline_mode<synchronous>, transform_indices = @transform_13, window_bounds = array<i64: 1, 64>}, {pipeline_mode = #tpu.pipeline_mode<synchronous>, transform_indices = @transform_14, window_bounds = array<i64: 1, 64>}, {pipeline_mode = #tpu.pipeline_mode<synchronous>, transform_indices = @transform_15, window_bounds = array<i64: 1, 64>}, {transform_indices = @transform_16, window_bounds = array<i64: 2, 8, 64>}]} {
    %c0 = arith.constant 0 : index
    %c0_0 = arith.constant 0 : index
    %c0_1 = arith.constant 0 : index
    %0 = vector.load %arg1[%c0, %c0_0, %c0_1] : memref<2x8x32xf32, #tpu.memory_space<vmem>>, vector<2x8x32xf32>
    %1 = arith.truncf %0 : vector<2x8x32xf32> to vector<2x8x32xbf16>
    %2 = vector.shape_cast %1 : vector<2x8x32xbf16> to vector<16x32xbf16>
    %c0_2 = arith.constant 0 : index
    %c0_3 = arith.constant 0 : index
    %3 = vector.load %arg2[%c0_2, %c0_3] : memref<32x32xbf16, #tpu.memory_space<vmem>>, vector<32x32xbf16>
    %cst = arith.constant dense<0.000000e+00> : vector<16x32xf32>
    %4 = tpu.matmul %2, %3, %cst {dimension_numbers = #tpu.dot_dimension_numbers<[1], [0], [0], [1], [0, 0, 1, 1], [], []>} : vector<16x32xbf16>, vector<32x32xbf16>, vector<16x32xf32> -> vector<16x32xf32>
    %5 = arith.truncf %4 : vector<16x32xf32> to vector<16x32xbf16>
    %c0_4 = arith.constant 0 : index
    %c0_5 = arith.constant 0 : index
    %6 = vector.load %arg3[%c0_4, %c0_5] : memref<32x64xbf16, #tpu.memory_space<vmem>>, vector<32x64xbf16>
    %cst_6 = arith.constant dense<0.000000e+00> : vector<16x64xf32>
    %7 = tpu.matmul %5, %6, %cst_6 {dimension_numbers = #tpu.dot_dimension_numbers<[1], [0], [0], [1], [0, 0, 1, 1], [], []>} : vector<16x32xbf16>, vector<32x64xbf16>, vector<16x64xf32> -> vector<16x64xf32>
    %8 = arith.truncf %7 : vector<16x64xf32> to vector<16x64xbf16>
    %c0_7 = arith.constant 0 : index
    %c0_8 = arith.constant 0 : index
    %9 = vector.load %arg4[%c0_7, %c0_8] : memref<64x384xbf16, #tpu.memory_space<vmem>>, vector<64x384xbf16>
    %cst_9 = arith.constant dense<0.000000e+00> : vector<16x384xf32>
    %10 = tpu.matmul %8, %9, %cst_9 {dimension_numbers = #tpu.dot_dimension_numbers<[1], [0], [0], [1], [0, 0, 1, 1], [], []>} : vector<16x64xbf16>, vector<64x384xbf16>, vector<16x384xf32> -> vector<16x384xf32>
    %11 = vector.shape_cast %10 : vector<16x384xf32> to vector<2x8x384xf32>
    %12 = vector.extract_strided_slice %11 {offsets = [0, 0, 0], sizes = [2, 8, 64], strides = [1, 1, 1]} : vector<2x8x384xf32> to vector<2x8x64xf32>
    %13 = arith.truncf %12 : vector<2x8x64xf32> to vector<2x8x64xbf16>
    %14 = vector.extract_strided_slice %11 {offsets = [0, 0, 128], sizes = [2, 8, 64], strides = [1, 1, 1]} : vector<2x8x384xf32> to vector<2x8x64xf32>
    %15 = arith.truncf %14 : vector<2x8x64xf32> to vector<2x8x64xbf16>
    %16 = vector.extract_strided_slice %11 {offsets = [0, 0, 256], sizes = [2, 8, 64], strides = [1, 1, 1]} : vector<2x8x384xf32> to vector<2x8x64xf32>
    %17 = arith.truncf %16 : vector<2x8x64xf32> to vector<2x8x64xbf16>
    "tpu.trace_start"() <{level = 10 : i32, message = "bqd,bkd->bqk"}> : () -> ()
    %cst_10 = arith.constant dense<0.000000e+00> : vector<2x8x8xf32>
    %18 = tpu.matmul %13, %15, %cst_10 {dimension_numbers = #tpu.dot_dimension_numbers<[2], [2], [1], [1], [0, 0, 0, 1, 1, 1], [0], [0]>} : vector<2x8x64xbf16>, vector<2x8x64xbf16>, vector<2x8x8xf32> -> vector<2x8x8xf32>
    "tpu.trace_stop"() : () -> ()
    %cst_11 = arith.constant 0.176776692 : f32
    %19 = vector.broadcast %cst_11 : f32 to vector<2x8x8xf32>
    %20 = arith.mulf %18, %19 : vector<2x8x8xf32>
    %cst_12 = arith.constant dense<0xFF800000> : vector<2x8xf32>
    %21 = vector.multi_reduction <maximumf>, %20, %cst_12 [2] : vector<2x8x8xf32> to vector<2x8xf32>
    %22 = vector.shape_cast %21 : vector<2x8xf32> to vector<2x8x1xf32>
    %23 = vector.broadcast %22 : vector<2x8x1xf32> to vector<2x8x8xf32>
    %24 = arith.subf %20, %23 : vector<2x8x8xf32>
    %25 = math.exp %24 : vector<2x8x8xf32>
    %cst_13 = arith.constant dense<0.000000e+00> : vector<2x8xf32>
    %26 = vector.multi_reduction <add>, %25, %cst_13 [2] : vector<2x8x8xf32> to vector<2x8xf32>
    %27 = vector.shape_cast %26 : vector<2x8xf32> to vector<2x8x1xf32>
    %28 = tpu.reciprocal %27 {approx = true} : vector<2x8x1xf32> -> vector<2x8x1xf32>
    %29 = vector.broadcast %28 : vector<2x8x1xf32> to vector<2x8x8xf32>
    %30 = arith.mulf %25, %29 : vector<2x8x8xf32>
    %31 = arith.truncf %30 : vector<2x8x8xf32> to vector<2x8x8xbf16>
    "tpu.trace_start"() <{level = 10 : i32, message = "bqk,bkd->bqd"}> : () -> ()
    %cst_14 = arith.constant dense<0.000000e+00> : vector<2x8x64xf32>
    %32 = tpu.matmul %31, %17, %cst_14 {dimension_numbers = #tpu.dot_dimension_numbers<[2], [1], [1], [2], [0, 0, 0, 1, 1, 2], [0], [0]>} : vector<2x8x8xbf16>, vector<2x8x64xbf16>, vector<2x8x64xf32> -> vector<2x8x64xf32>
    "tpu.trace_stop"() : () -> ()
    %33 = vector.extract_strided_slice %11 {offsets = [0, 0, 64], sizes = [2, 8, 64], strides = [1, 1, 1]} : vector<2x8x384xf32> to vector<2x8x64xf32>
    %34 = arith.truncf %33 : vector<2x8x64xf32> to vector<2x8x64xbf16>
    %35 = vector.extract_strided_slice %11 {offsets = [0, 0, 192], sizes = [2, 8, 64], strides = [1, 1, 1]} : vector<2x8x384xf32> to vector<2x8x64xf32>
    %36 = arith.truncf %35 : vector<2x8x64xf32> to vector<2x8x64xbf16>
    %37 = vector.extract_strided_slice %11 {offsets = [0, 0, 320], sizes = [2, 8, 64], strides = [1, 1, 1]} : vector<2x8x384xf32> to vector<2x8x64xf32>
    %38 = arith.truncf %37 : vector<2x8x64xf32> to vector<2x8x64xbf16>
    "tpu.trace_start"() <{level = 10 : i32, message = "bqd,bkd->bqk"}> : () -> ()
    %cst_15 = arith.constant dense<0.000000e+00> : vector<2x8x8xf32>
    %39 = tpu.matmul %34, %36, %cst_15 {dimension_numbers = #tpu.dot_dimension_numbers<[2], [2], [1], [1], [0, 0, 0, 1, 1, 1], [0], [0]>} : vector<2x8x64xbf16>, vector<2x8x64xbf16>, vector<2x8x8xf32> -> vector<2x8x8xf32>
    "tpu.trace_stop"() : () -> ()
    %cst_16 = arith.constant 0.176776692 : f32
    %40 = vector.broadcast %cst_16 : f32 to vector<2x8x8xf32>
    %41 = arith.mulf %39, %40 : vector<2x8x8xf32>
    %cst_17 = arith.constant dense<0xFF800000> : vector<2x8xf32>
    %42 = vector.multi_reduction <maximumf>, %41, %cst_17 [2] : vector<2x8x8xf32> to vector<2x8xf32>
    %43 = vector.shape_cast %42 : vector<2x8xf32> to vector<2x8x1xf32>
    %44 = vector.broadcast %43 : vector<2x8x1xf32> to vector<2x8x8xf32>
    %45 = arith.subf %41, %44 : vector<2x8x8xf32>
    %46 = math.exp %45 : vector<2x8x8xf32>
    %cst_18 = arith.constant dense<0.000000e+00> : vector<2x8xf32>
    %47 = vector.multi_reduction <add>, %46, %cst_18 [2] : vector<2x8x8xf32> to vector<2x8xf32>
    %48 = vector.shape_cast %47 : vector<2x8xf32> to vector<2x8x1xf32>
    %49 = tpu.reciprocal %48 {approx = true} : vector<2x8x1xf32> -> vector<2x8x1xf32>
    %50 = vector.broadcast %49 : vector<2x8x1xf32> to vector<2x8x8xf32>
    %51 = arith.mulf %46, %50 : vector<2x8x8xf32>
    %52 = arith.truncf %51 : vector<2x8x8xf32> to vector<2x8x8xbf16>
    "tpu.trace_start"() <{level = 10 : i32, message = "bqk,bkd->bqd"}> : () -> ()
    %cst_19 = arith.constant dense<0.000000e+00> : vector<2x8x64xf32>
    %53 = tpu.matmul %52, %38, %cst_19 {dimension_numbers = #tpu.dot_dimension_numbers<[2], [1], [1], [2], [0, 0, 0, 1, 1, 2], [0], [0]>} : vector<2x8x8xbf16>, vector<2x8x64xbf16>, vector<2x8x64xf32> -> vector<2x8x64xf32>
    "tpu.trace_stop"() : () -> ()
    %54 = tpu.concatenate %32, %53 in 2 : vector<2x8x64xf32>, vector<2x8x64xf32> -> vector<2x8x128xf32>
    %55 = vector.shape_cast %54 : vector<2x8x128xf32> to vector<16x128xf32>
    %56 = arith.truncf %55 : vector<16x128xf32> to vector<16x128xbf16>
    %c0_20 = arith.constant 0 : index
    %c0_21 = arith.constant 0 : index
    %57 = vector.load %arg5[%c0_20, %c0_21] : memref<128x64xbf16, #tpu.memory_space<vmem>>, vector<128x64xbf16>
    %cst_22 = arith.constant dense<0.000000e+00> : vector<16x64xf32>
    %58 = tpu.matmul %56, %57, %cst_22 {dimension_numbers = #tpu.dot_dimension_numbers<[1], [0], [0], [1], [0, 0, 1, 1], [], []>} : vector<16x128xbf16>, vector<128x64xbf16>, vector<16x64xf32> -> vector<16x64xf32>
    %c0_23 = arith.constant 0 : index
    %c0_24 = arith.constant 0 : index
    %59 = vector.load %arg6[%c0_23, %c0_24] : memref<1x64xf32, #tpu.memory_space<vmem>>, vector<1x64xf32>
    %60 = vector.broadcast %59 : vector<1x64xf32> to vector<16x64xf32>
    %61 = arith.addf %58, %60 : vector<16x64xf32>
    %62 = arith.addf %61, %7 : vector<16x64xf32>
    %c0_25 = arith.constant 0 : index
    %c0_26 = arith.constant 0 : index
    %63 = vector.load %arg13[%c0_25, %c0_26] : memref<1x64xf32, #tpu.memory_space<vmem>>, vector<1x64xf32>
    %c0_27 = arith.constant 0 : index
    %c0_28 = arith.constant 0 : index
    %64 = vector.load %arg14[%c0_27, %c0_28] : memref<1x64xf32, #tpu.memory_space<vmem>>, vector<1x64xf32>
    %cst_29 = arith.constant dense<0.000000e+00> : vector<16xf32>
    %65 = vector.multi_reduction <add>, %62, %cst_29 [1] : vector<16x64xf32> to vector<16xf32>
    %66 = vector.shape_cast %65 : vector<16xf32> to vector<16x1xf32>
    %cst_30 = arith.constant 6.400000e+01 : f32
    %67 = vector.broadcast %cst_30 : f32 to vector<16x1xf32>
    %68 = arith.divf %66, %67 : vector<16x1xf32>
    %69 = vector.broadcast %68 : vector<16x1xf32> to vector<16x64xf32>
    %70 = arith.subf %62, %69 : vector<16x64xf32>
    %71 = arith.mulf %70, %70 : vector<16x64xf32>
    %cst_31 = arith.constant dense<0.000000e+00> : vector<16xf32>
    %72 = vector.multi_reduction <add>, %71, %cst_31 [1] : vector<16x64xf32> to vector<16xf32>
    %73 = vector.shape_cast %72 : vector<16xf32> to vector<16x1xf32>
    %cst_32 = arith.constant 6.400000e+01 : f32
    %74 = vector.broadcast %cst_32 : f32 to vector<16x1xf32>
    %75 = arith.divf %73, %74 : vector<16x1xf32>
    %cst_33 = arith.constant 9.99999974E-6 : f32
    %76 = vector.broadcast %cst_33 : f32 to vector<16x1xf32>
    %77 = arith.addf %75, %76 : vector<16x1xf32>
    %78 = math.rsqrt %77 : vector<16x1xf32>
    %79 = vector.broadcast %78 : vector<16x1xf32> to vector<16x64xf32>
    %80 = arith.mulf %70, %79 : vector<16x64xf32>
    %81 = vector.broadcast %63 : vector<1x64xf32> to vector<16x64xf32>
    %82 = arith.mulf %80, %81 : vector<16x64xf32>
    %83 = vector.broadcast %64 : vector<1x64xf32> to vector<16x64xf32>
    %84 = arith.addf %82, %83 : vector<16x64xf32>
    %85 = arith.truncf %84 : vector<16x64xf32> to vector<16x64xbf16>
    %c0_34 = arith.constant 0 : index
    %c0_35 = arith.constant 0 : index
    %86 = vector.load %arg7[%c0_34, %c0_35] : memref<64x64xbf16, #tpu.memory_space<vmem>>, vector<64x64xbf16>
    %cst_36 = arith.constant dense<0.000000e+00> : vector<16x64xf32>
    %87 = tpu.matmul %85, %86, %cst_36 {dimension_numbers = #tpu.dot_dimension_numbers<[1], [0], [0], [1], [0, 0, 1, 1], [], []>} : vector<16x64xbf16>, vector<64x64xbf16>, vector<16x64xf32> -> vector<16x64xf32>
    %c0_37 = arith.constant 0 : index
    %c0_38 = arith.constant 0 : index
    %88 = vector.load %arg8[%c0_37, %c0_38] : memref<1x64xf32, #tpu.memory_space<vmem>>, vector<1x64xf32>
    %89 = vector.broadcast %88 : vector<1x64xf32> to vector<16x64xf32>
    %90 = arith.addf %87, %89 : vector<16x64xf32>
    %91 = vector.shape_cast %90 : vector<16x64xf32> to vector<2x8x64xf32>
    %cst_39 = arith.constant 0.000000e+00 : f32
    %92 = vector.broadcast %cst_39 : f32 to vector<2x1x64xf32>
    %93 = vector.extract_strided_slice %91 {offsets = [0, 0, 0], sizes = [2, 7, 64], strides = [1, 1, 1]} : vector<2x8x64xf32> to vector<2x7x64xf32>
    %94 = tpu.concatenate %92, %93 in 1 : vector<2x1x64xf32>, vector<2x7x64xf32> -> vector<2x8x64xf32>
    %95 = vector.extract_strided_slice %91 {offsets = [0, 1, 0], sizes = [2, 7, 64], strides = [1, 1, 1]} : vector<2x8x64xf32> to vector<2x7x64xf32>
    %96 = tpu.concatenate %95, %92 in 1 : vector<2x7x64xf32>, vector<2x1x64xf32> -> vector<2x8x64xf32>
    %97 = tpu.concatenate %94, %91, %96 in 2 : vector<2x8x64xf32>, vector<2x8x64xf32>, vector<2x8x64xf32> -> vector<2x8x192xf32>
    %98 = vector.shape_cast %97 : vector<2x8x192xf32> to vector<16x192xf32>
    %99 = arith.truncf %98 : vector<16x192xf32> to vector<16x192xbf16>
    %c0_40 = arith.constant 0 : index
    %c0_41 = arith.constant 0 : index
    %100 = vector.load %arg9[%c0_40, %c0_41] : memref<192x64xbf16, #tpu.memory_space<vmem>>, vector<192x64xbf16>
    %cst_42 = arith.constant dense<0.000000e+00> : vector<16x64xf32>
    %101 = tpu.matmul %99, %100, %cst_42 {dimension_numbers = #tpu.dot_dimension_numbers<[1], [0], [0], [1], [0, 0, 1, 1], [], []>} : vector<16x192xbf16>, vector<192x64xbf16>, vector<16x64xf32> -> vector<16x64xf32>
    %c0_43 = arith.constant 0 : index
    %c0_44 = arith.constant 0 : index
    %102 = vector.load %arg10[%c0_43, %c0_44] : memref<1x64xf32, #tpu.memory_space<vmem>>, vector<1x64xf32>
    %103 = vector.broadcast %102 : vector<1x64xf32> to vector<16x64xf32>
    %104 = arith.addf %101, %103 : vector<16x64xf32>
    %cst_45 = arith.constant 5.000000e-01 : f32
    %105 = vector.broadcast %cst_45 : f32 to vector<16x64xf32>
    %106 = arith.mulf %105, %104 : vector<16x64xf32>
    %cst_46 = arith.constant 0.707106769 : f32
    %107 = vector.broadcast %cst_46 : f32 to vector<16x64xf32>
    %108 = arith.mulf %104, %107 : vector<16x64xf32>
    %109 = math.erf %108 : vector<16x64xf32>
    %cst_47 = arith.constant 1.000000e+00 : f32
    %110 = vector.broadcast %cst_47 : f32 to vector<16x64xf32>
    %111 = arith.addf %110, %109 : vector<16x64xf32>
    %112 = arith.mulf %106, %111 : vector<16x64xf32>
    %113 = arith.truncf %112 : vector<16x64xf32> to vector<16x64xbf16>
    %c0_48 = arith.constant 0 : index
    %c0_49 = arith.constant 0 : index
    %114 = vector.load %arg11[%c0_48, %c0_49] : memref<64x64xbf16, #tpu.memory_space<vmem>>, vector<64x64xbf16>
    %cst_50 = arith.constant dense<0.000000e+00> : vector<16x64xf32>
    %115 = tpu.matmul %113, %114, %cst_50 {dimension_numbers = #tpu.dot_dimension_numbers<[1], [0], [0], [1], [0, 0, 1, 1], [], []>} : vector<16x64xbf16>, vector<64x64xbf16>, vector<16x64xf32> -> vector<16x64xf32>
    %c0_51 = arith.constant 0 : index
    %c0_52 = arith.constant 0 : index
    %116 = vector.load %arg12[%c0_51, %c0_52] : memref<1x64xf32, #tpu.memory_space<vmem>>, vector<1x64xf32>
    %117 = vector.broadcast %116 : vector<1x64xf32> to vector<16x64xf32>
    %118 = arith.addf %115, %117 : vector<16x64xf32>
    %119 = arith.addf %118, %84 : vector<16x64xf32>
    %c0_53 = arith.constant 0 : index
    %c0_54 = arith.constant 0 : index
    %120 = vector.load %arg15[%c0_53, %c0_54] : memref<1x64xf32, #tpu.memory_space<vmem>>, vector<1x64xf32>
    %c0_55 = arith.constant 0 : index
    %c0_56 = arith.constant 0 : index
    %121 = vector.load %arg16[%c0_55, %c0_56] : memref<1x64xf32, #tpu.memory_space<vmem>>, vector<1x64xf32>
    %cst_57 = arith.constant dense<0.000000e+00> : vector<16xf32>
    %122 = vector.multi_reduction <add>, %119, %cst_57 [1] : vector<16x64xf32> to vector<16xf32>
    %123 = vector.shape_cast %122 : vector<16xf32> to vector<16x1xf32>
    %cst_58 = arith.constant 6.400000e+01 : f32
    %124 = vector.broadcast %cst_58 : f32 to vector<16x1xf32>
    %125 = arith.divf %123, %124 : vector<16x1xf32>
    %126 = vector.broadcast %125 : vector<16x1xf32> to vector<16x64xf32>
    %127 = arith.subf %119, %126 : vector<16x64xf32>
    %128 = arith.mulf %127, %127 : vector<16x64xf32>
    %cst_59 = arith.constant dense<0.000000e+00> : vector<16xf32>
    %129 = vector.multi_reduction <add>, %128, %cst_59 [1] : vector<16x64xf32> to vector<16xf32>
    %130 = vector.shape_cast %129 : vector<16xf32> to vector<16x1xf32>
    %cst_60 = arith.constant 6.400000e+01 : f32
    %131 = vector.broadcast %cst_60 : f32 to vector<16x1xf32>
    %132 = arith.divf %130, %131 : vector<16x1xf32>
    %cst_61 = arith.constant 9.99999974E-6 : f32
    %133 = vector.broadcast %cst_61 : f32 to vector<16x1xf32>
    %134 = arith.addf %132, %133 : vector<16x1xf32>
    %135 = math.rsqrt %134 : vector<16x1xf32>
    %136 = vector.broadcast %135 : vector<16x1xf32> to vector<16x64xf32>
    %137 = arith.mulf %127, %136 : vector<16x64xf32>
    %138 = vector.broadcast %120 : vector<1x64xf32> to vector<16x64xf32>
    %139 = arith.mulf %137, %138 : vector<16x64xf32>
    %140 = vector.broadcast %121 : vector<1x64xf32> to vector<16x64xf32>
    %141 = arith.addf %139, %140 : vector<16x64xf32>
    %142 = vector.shape_cast %141 : vector<16x64xf32> to vector<2x8x64xf32>
    %c0_62 = arith.constant 0 : index
    %c0_63 = arith.constant 0 : index
    %c0_64 = arith.constant 0 : index
    %143 = vector.load %arg17[%c0_62, %c0_63, %c0_64] : memref<2x8x64xf32, #tpu.memory_space<vmem>>, vector<2x8x64xf32>
    tpu.vector_store %arg17[%c0_62, %c0_63, %c0_64], %142 {strides = array<i32>} : memref<2x8x64xf32, #tpu.memory_space<vmem>>, vector<2x8x64xf32>,
    return
  }
  func.func @transform_0(%arg0: i32) -> (i32, i32, i32) {
    %c0_i32 = arith.constant 0 : i32
    %c0_i32_0 = arith.constant 0 : i32
    %c0_i32_1 = arith.constant 0 : i32
    return %arg0, %c0_i32, %c0_i32_0 : i32, i32, i32
  }
  func.func @transform_1(%arg0: i32) -> (i32, i32) {
    %c0_i32 = arith.constant 0 : i32
    %c0_i32_0 = arith.constant 0 : i32
    %c0_i32_1 = arith.constant 0 : i32
    return %c0_i32, %c0_i32_0 : i32, i32
  }
  func.func @transform_2(%arg0: i32) -> (i32, i32) {
    %c0_i32 = arith.constant 0 : i32
    %c0_i32_0 = arith.constant 0 : i32
    %c0_i32_1 = arith.constant 0 : i32
    return %c0_i32, %c0_i32_0 : i32, i32
  }
  func.func @transform_3(%arg0: i32) -> (i32, i32) {
    %c0_i32 = arith.constant 0 : i32
    %c0_i32_0 = arith.constant 0 : i32
    %c0_i32_1 = arith.constant 0 : i32
    return %c0_i32, %c0_i32_0 : i32, i32
  }
  func.func @transform_4(%arg0: i32) -> (i32, i32) {
    %c0_i32 = arith.constant 0 : i32
    %c0_i32_0 = arith.constant 0 : i32
    %c0_i32_1 = arith.constant 0 : i32
    return %c0_i32, %c0_i32_0 : i32, i32
  }
  func.func @transform_5(%arg0: i32) -> (i32, i32) {
    %c0_i32 = arith.constant 0 : i32
    %c0_i32_0 = arith.constant 0 : i32
    %c0_i32_1 = arith.constant 0 : i32
    return %c0_i32, %c0_i32_0 : i32, i32
  }
  func.func @transform_6(%arg0: i32) -> (i32, i32) {
    %c0_i32 = arith.constant 0 : i32
    %c0_i32_0 = arith.constant 0 : i32
    %c0_i32_1 = arith.constant 0 : i32
    return %c0_i32, %c0_i32_0 : i32, i32
  }
  func.func @transform_7(%arg0: i32) -> (i32, i32) {
    %c0_i32 = arith.constant 0 : i32
    %c0_i32_0 = arith.constant 0 : i32
    %c0_i32_1 = arith.constant 0 : i32
    return %c0_i32, %c0_i32_0 : i32, i32
  }
  func.func @transform_8(%arg0: i32) -> (i32, i32) {
    %c0_i32 = arith.constant 0 : i32
    %c0_i32_0 = arith.constant 0 : i32
    %c0_i32_1 = arith.constant 0 : i32
    return %c0_i32, %c0_i32_0 : i32, i32
  }
  func.func @transform_9(%arg0: i32) -> (i32, i32) {
    %c0_i32 = arith.constant 0 : i32
    %c0_i32_0 = arith.constant 0 : i32
    %c0_i32_1 = arith.constant 0 : i32
    return %c0_i32, %c0_i32_0 : i32, i32
  }
  func.func @transform_10(%arg0: i32) -> (i32, i32) {
    %c0_i32 = arith.constant 0 : i32
    %c0_i32_0 = arith.constant 0 : i32
    %c0_i32_1 = arith.constant 0 : i32
    return %c0_i32, %c0_i32_0 : i32, i32
  }
  func.func @transform_11(%arg0: i32) -> (i32, i32) {
    %c0_i32 = arith.constant 0 : i32
    %c0_i32_0 = arith.constant 0 : i32
    %c0_i32_1 = arith.constant 0 : i32
    return %c0_i32, %c0_i32_0 : i32, i32
  }
  func.func @transform_12(%arg0: i32) -> (i32, i32) {
    %c0_i32 = arith.constant 0 : i32
    %c0_i32_0 = arith.constant 0 : i32
    %c0_i32_1 = arith.constant 0 : i32
    return %c0_i32, %c0_i32_0 : i32, i32
  }
  func.func @transform_13(%arg0: i32) -> (i32, i32) {
    %c0_i32 = arith.constant 0 : i32
    %c0_i32_0 = arith.constant 0 : i32
    %c0_i32_1 = arith.constant 0 : i32
    return %c0_i32, %c0_i32_0 : i32, i32
  }
  func.func @transform_14(%arg0: i32) -> (i32, i32) {
    %c0_i32 = arith.constant 0 : i32
    %c0_i32_0 = arith.constant 0 : i32
    %c0_i32_1 = arith.constant 0 : i32
    return %c0_i32, %c0_i32_0 : i32, i32
  }
  func.func @transform_15(%arg0: i32) -> (i32, i32) {
    %c0_i32 = arith.constant 0 : i32
    %c0_i32_0 = arith.constant 0 : i32
    %c0_i32_1 = arith.constant 0 : i32
    return %c0_i32, %c0_i32_0 : i32, i32
  }
  func.func @transform_16(%arg0: i32) -> (i32, i32, i32) {
    %c0_i32 = arith.constant 0 : i32
    %c0_i32_0 = arith.constant 0 : i32
    %c0_i32_1 = arith.constant 0 : i32
    return %arg0, %c0_i32, %c0_i32_0 : i32, i32, i32
  }
}

</mosaic_0001>

<bundles_post_ra>
// kernel: encoder_forward.3
= control target key start
LH: loop header
LB: loop body
LE: loop exit
PB: predicated region body
PF: predicated region fallthrough
CT: control target
= control target key end

     0   :  { %s2496_s0 = inlined_call_operand.vmem [shape: f32[4,8,32], index: 0, kind: input, shape index: {}]   ;;  %s2497_s1 = inlined_call_operand.vmem [shape: bf16[32,32], index: 1, kind: input, shape index: {}]   ;;  %s2498_s2 = inlined_call_operand.vmem [shape: bf16[32,64], index: 2, kind: input, shape index: {}]   ;;  %s2499_s3 = inlined_call_operand.vmem [shape: bf16[64,384], index: 3, kind: input, shape index: {}]   ;;  %s2500_s4 = inlined_call_operand.vmem [shape: bf16[128,64], index: 4, kind: input, shape index: {}]   ;;  %s2501_s5 = inlined_call_operand.vmem [shape: f32[1,64], index: 5, kind: input, shape index: {}]   ;;  %s2502_s6 = inlined_call_operand.vmem [shape: bf16[64,64], index: 6, kind: input, shape index: {}]   ;;  %s2503_s7 = inlined_call_operand.vmem [shape: f32[1,64], index: 7, kind: input, shape index: {}]   ;;  %s2504_s8 = inlined_call_operand.vmem [shape: bf16[192,64], index: 8, kind: input, shape index: {}]   ;;  %s2505_s9 = inlined_call_operand.vmem [shape: f32[1,64], index: 9, kind: input, shape index: {}]   ;;  %s2506_s10 = inlined_call_operand.vmem [shape: bf16[64,64], index: 10, kind: input, shape index: {}]   ;;  %s2507_s11 = inlined_call_operand.vmem [shape: f32[1,64], index: 11, kind: input, shape index: {}]   ;;  %s2508_s12 = inlined_call_operand.vmem [shape: f32[1,64], index: 12, kind: input, shape index: {}]   ;;  %s2509_s13 = inlined_call_operand.vmem [shape: f32[1,64], index: 13, kind: input, shape index: {}]   ;;  %s2510_s14 = inlined_call_operand.vmem [shape: f32[1,64], index: 14, kind: input, shape index: {}]   ;;  %s2511_s15 = inlined_call_operand.vmem [shape: f32[1,64], index: 15, kind: input, shape index: {}]   ;;  %s2512_s16 = inlined_call_operand.hbm [shape: f32[4,8,64], index: 16, kind: output, shape index: {}]  }
   0x1   :  { %2517 = sst [smem:[#allocation9_spill]] %s2496_s0 }
   0x2   :  { %2518 = sst [smem:[#allocation10_spill]] %s2497_s1 }
   0x3   :  { %2519 = sst [smem:[#allocation11_spill]] %s2498_s2 }
   0x4   :  { %21 = vsyncpa [#allocation3], 0 }
   0x5   :  { %23 = vsyncpa [#allocation3 + $0x1], 0  ;;  %s2114_s21 = smov 0   ;;  %s2116_s22 = smov 0  }
   0x6   :  { %s2118_s23 = smov 0   ;;  %s2120_s24 = smov 0  }
   0x7 LB: > { %2520 = sst [smem:[#allocation5_spill]] %s2019_s23  ;;  %s2135_s25 = sadd.s32 4294967295, %s2023_s24   ;;  %s2023_s24 = sphi %s2120_s24, %s2530_s24   ;;  %s2019_s23 = sphi %s2118_s23, %s2532_s23   ;;  %s2015_s22 = sphi %s2116_s22, %s2534_s22   ;;  %s2011_s21 = sphi %s2114_s21, %s2533_s21  }
   0x8   : > { %s1619_s26 = sadd.s32 4294967294, %s2023_s24   ;;  %s2139_s27 = sadd.s32 1, %s2023_s24  }
   0x9   : > { %2521 = sst [smem:[#allocation6_spill]] %s2139_s27  ;;  %s377_s28 = sadd.s32 1, %s2019_s23 }
   0xa   : > { %s374_s29 = ssub.s32 %s2023_s24, %s2139_s27  ;;  %p387_p0 = scmp.ne.s32.totalorder %s2019_s23, %s2015_s22 }
   0xb   : > { %p375_p1 = scmp.eq.s32.totalorder %s374_s29, 0  ;;  %p388_p2 = scmp.eq.s32.totalorder %s2135_s25, 1 }
   0xc   : > { %p393_p3 = scmp.ne.s32.totalorder %s2015_s22, %s2011_s21  ;;  %p394_p4 = scmp.eq.s32.totalorder %s1619_s26, 1 }
   0xd   : > { %s2150_s30 = scalar_select %p375_p1, %s2019_s23, %s377_s28  }
   0xe   : > { %p2152_p5 = por %p388_p2, %p387_p0  ;;  %p2156_p6 = por %p394_p4, %p393_p3 }
   0xf   : > { %2522 = sst [smem:[#allocation7_spill]] %s2150_s30  ;;  %p1622_p7 = scmp.ge.s32.totalorder %s2023_s24, 1 }
  0x10   : > { %s2524_s17 = scalar_select %p2156_p6, 1, 0 }
  0x11   : > { %p466_p8 = scmp.lt.s32.totalorder %s2023_s24, 3 }
  0x12   : > { %2525 = sst [smem:[#allocation8_spill]] %s2524_s17 }
  0x13   : > { %p467_p9 = pnand %p1622_p7, %p466_p8 }
  0x14   : > { %s2526_s1 = sld [smem:[#allocation10_spill]] (!%p467_p9)  ;;  %s1624_s20 = sshll.u32 (!%p467_p9), %s2135_s25, 1 }
  0x15   : > { %470 = sbr.rel (%p467_p9) target bundleno = 2507 (0x9cb), region = 84  ;;  %p517_p10 = scmp.lt.s32.totalorder (!%p467_p9), %s1624_s20, 3 }
  0x16   : > { %s2527_s27 = sld [smem:[#allocation9_spill]] (!%p467_p9)  ;;  %s2025_s28 = smov (!%p467_p9), 64  }
  0x17   : > { %s2528_s2 = sld [smem:[#allocation11_spill]] (!%p467_p9)  ;;  %s513_s23 = sand.u32 (!%p467_p9), 1, %s2015_s22  }
  0x18   : > { %s1869_s18 = sshll.u32 (!%p467_p9), %s2135_s25, 4  ;;  %s1542_s25 = scalar_lea.sflag (!%p467_p9), [#allocation3], %s513_s23 }
  0x19   : > { %s1553_s26 = scalar_lea.hbm (!%p467_p9), %s2512_s16, %s1869_s18  ;;  %s1981_s19 = scalar_lea.hbm (!%p467_p9), %s2512_s16, 32 }
  0x1a   : > { %v1826_v0 = vld [vmem:[%s2526_s1 + $0x8] sm:$0xff]  ;;  %v1825_v1 = vld [vmem:[%s2526_s1] sm:$0xff]  ;;  %s2536_s20 = smov (!%p517_p10, %s1624_s20), 3  ;;  %vm549_vm0 = vcmask 261120   ;;  %v1839_v12 = vld [vmem:[%s2499_s3 + $0x50] sm:$0xf0] }
  0x1b   : > { %559 = vmatpush.bf16.msra.mxu0 %v1826_v0  ;;  %s1625_s29 = sshll.u32 %s2536_s20, 3  ;;  %v1682_v11 = vld [vmem:[%s2499_s3 + $0x48] sm:$0xf]  ;;  %v1838_v13 = vld [vmem:[%s2499_s3 + $0x4c] sm:$0xf]  ;;  %vm682_vm1 = vcmask 523264  }
  0x1c   : > { %s520_s17 = scalar_lea.vmem %s2527_s27, %s1625_s29  ;;  %v1683_v14 = vor.u32 %v1839_v12, %v1682_v11  ;;  %v1684_v15 = vld [vmem:[%s2499_s3 + $0x54] sm:$0xf0]  ;;  %v1690_v16 = vld [vmem:[%s2499_s3 + $0x50] sm:$0xf]  ;;  %v1840_v17 = vld [vmem:[%s2499_s3 + $0x58] sm:$0xf0] }
  0x1d   : > { %v524_v2 = vld [vmem:[%s520_s17] sm:$0xff]  ;;  %v525_v3 = vld [vmem:[%s520_s17 + $0x8] sm:$0xff]  ;;  %v1687_v18 = vor.u32 %v1838_v13, %v1684_v15  ;;  %v1691_v19 = vor.u32 %v1840_v17, %v1690_v16  ;;  %v1670_v23 = vld [vmem:[%s2499_s3 + $0x30] sm:$0xf]  ;;  %vm802_vm2 = vcmask 1043456   ;;  %vm774_vm3 = vcmask 64512  }
  0x1e   : > { %v526_v4 = vpack.c.bf16 %v524_v2, %v524_v2  ;;  %v527_v5 = vpack.c.bf16 %v525_v3, %v525_v3  ;;  %v1828_v9 = vld [vmem:[%s2528_s2 + $0x8] sm:$0xff]  ;;  %v1827_v10 = vld [vmem:[%s2528_s2] sm:$0xff]  ;;  %690 = vmatpush.bf16.msra.mxu2 %v1683_v14  ;;  %v1836_v24 = vld [vmem:[%s2499_s3 + $0x38] sm:$0xf0]  ;;  %vm1195_vm11 = vcmask 1046528   ;;  %vm1188_vm12 = vcmask 1040384  }
  0x1f   : > { %560 = vmatpush.bf16.msra.mxu0 %v1825_v1  ;;  %593 = vmatpush.bf16.msra.mxu1 %v1828_v9  ;;  %v1835_v25 = vld [vmem:[%s2499_s3 + $0x34] sm:$0xf]  ;;  %v1671_v26 = vor.u32 %v1836_v24, %v1670_v23  ;;  %v1672_v27 = vld [vmem:[%s2499_s3 + $0x3c] sm:$0xf0]  ;;  %v1678_v28 = vld [vmem:[%s2499_s3 + $0x38] sm:$0xf] }
  0x20   : > { %v534_v6 = vunpack.c.l.b16 %v526_v4  ;;  %v535_v7 = vunpack.c.l.b16 %v527_v5  ;;  %704 = vmatpush.bf16.msra.mxu3 %v1687_v18  ;;  %v1837_v29 = vld [vmem:[%s2499_s3 + $0x40] sm:$0xf0]  ;;  %v1675_v30 = vor.u32 %v1835_v25, %v1672_v27  ;;  %v1658_v32 = vld [vmem:[%s2499_s3 + $0x18] sm:$0xf]  ;;  %v1832_v34 = vld [vmem:[%s2499_s3 + $0x1c] sm:$0xf] }
  0x21   : > { %v1679_v31 = vor.u32 %v1837_v29, %v1678_v28  ;;  %v1833_v33 = vld [vmem:[%s2499_s3 + $0x20] sm:$0xf0]  ;;  %v1660_v36 = vld [vmem:[%s2499_s3 + $0x24] sm:$0xf0]  ;;  %v1666_v37 = vld [vmem:[%s2499_s3 + $0x20] sm:$0xf] }
  0x22   : > { %v536_v8 = vpack.c.b16 %v535_v7, %v534_v6  ;;  %691 = vmatpush.bf16.msra.mxu2 %v1671_v26  ;;  %v1659_v35 = vor.u32 %v1833_v33, %v1658_v32  ;;  %v1834_v38 = vld [vmem:[%s2499_s3 + $0x28] sm:$0xf0]  ;;  %v1663_v39 = vor.u32 %v1832_v34, %v1660_v36  ;;  %v1646_v41 = vld [vmem:[%s2499_s3] sm:$0xf]  ;;  %v1829_v43 = vld [vmem:[%s2499_s3 + $0x4] sm:$0xf] }
  0x23   : > { %594 = vmatpush.bf16.msra.mxu1 %v1827_v10  ;;  %718 = vmatpush.bf16.msrb.mxu0 %v1691_v19  ;;  %v1667_v40 = vor.u32 %v1834_v38, %v1666_v37  ;;  %v1830_v42 = vld [vmem:[%s2499_s3 + $0x8] sm:$0xf0]  ;;  %v1648_v45 = vld [vmem:[%s2499_s3 + $0xc] sm:$0xf0]  ;;  %v1654_v46 = vld [vmem:[%s2499_s3 + $0x8] sm:$0xf] }
  0x24   : > { %1634 = vmatmul.msk.bf16.vlgmr.msra.gmra.mxu0 %vm549_vm0, %v536_v8  ;;  %705 = vmatpush.bf16.msra.mxu3 %v1675_v30  ;;  %v1647_v44 = vor.u32 %v1830_v42, %v1646_v41  ;;  %v1831_v47 = vld [vmem:[%s2499_s3 + $0x10] sm:$0xf0]  ;;  %v1651_v48 = vor.u32 %v1829_v43, %v1648_v45  ;;  %s1623_s29 = sshll.u32 %s513_s23, 4  ;;  %s1556_s30 = sshll.u32 %s1553_s26, 4  ;;  %s1557_s30 = int_to_ptr.hbm [resolvable:$true] %s1556_s30 }
  0x25   : > { %v1655_v49 = vor.u32 %v1831_v47, %v1654_v46  ;;  %s1975_s17 = sshra.s32 %s1557_s30, 4  ;;  %s1976_s17 = int_to_ptr.hbm [resolvable:$true] %s1975_s17 }
  0x26   : > { %692 = vmatpush.bf16.msra.mxu2 %v1659_v35  ;;  %s1977_s1 = scalar_lea.hbm %s1976_s17, 16  ;;  %p1982_p0 = scmp.lt.s32.totalorder %s1976_s17, %s2512_s16 }
  0x27   : > { %719 = vmatpush.bf16.msrb.mxu0 %v1679_v31  ;;  %p1978_p11 = scmp.ne.s32.totalorder %s1976_s17, %s1977_s1  ;;  %p1983_p1 = scmp.lt.s32.totalorder %s1981_s19, %s1977_s1 }
  0x28   : > { %706 = vmatpush.bf16.msra.mxu3 %v1663_v39 }
  0x29   : > { %p1979_p12 = pnand %p1978_p11, %p2152_p5  ;;  %p1984_p2 = por %p1983_p1, %p1982_p0 }
  0x2a   : > { %693 = vmatpush.bf16.msra.mxu2 %v1647_v44 }
  0x2b   : > { %720 = vmatpush.bf16.msrb.mxu0 %v1667_v40  ;;  %p1980_p13 = pneg %p1979_p12 }
  0x2c   : > { %707 = vmatpush.bf16.msra.mxu3 %v1651_v48 }
  0x2d   : > { %p1985_p3 = pnand %p1984_p2, %p1980_p13 }
  0x2f   : > { %721 = vmatpush.bf16.msrb.mxu0 %v1655_v49 }
  0xa1   : > { %v562_v20 = vpop.f32.mrf.mxu0 }
  0xa9   : > { %v564_v21 = vpop.f32.mrf.mxu0 }
  0xaa   : > { %v567_v22 = vpack.c.bf16 %v564_v21, %v562_v20 }
  0xac   : > { %1643 = vmatmul.msk.bf16.vlgmr.msra.gmra.mxu1 %vm549_vm0, %v567_v22 }
 0x129   : > { %v2252_v50 = vpop.f32.mrf.mxu1 }
 0x131   : > { %v2254_v51 = vpop.f32.mrf.mxu1 }
 0x132   : > { %v601_v52 = vpack.c.bf16 %v2254_v51, %v2252_v50 }
 0x134   : > { %1692 = vmatmul.msk.bf16.vlgmr.msra.gmra.mxu2 %vm682_vm1, %v601_v52  ;;  %1693 = vmatmul.msk.bf16.vlgmr.msra.gmra.mxu3 %vm682_vm1, %v601_v52 }
 0x135   : > { %1694 = vmatmul.msk.bf16.vlgmr.msrb.gmra.mxu0 %vm682_vm1, %v601_v52 }
 0x1b2   : > { %v723_v53 = vpop.f32.mrf.mxu0 }
 0x1b3   : > { %v2261_v54 = vpack.c.bf16 %v723_v53, %v723_v53 }
 0x1b5   : > { %v804_v55 = vsel %vm802_vm2, %v2261_v54, 0 }
 0x1b6   : > { %813 = vmatpush.bf16.msrb.mxu3 %v804_v55 }
 0x1b7   : > { %v695_v56 = vpop.f32.mrf.mxu2  ;;  %v709_v57 = vpop.f32.mrf.mxu3 }
 0x1b8   : > { %v728_v58 = vpack.c.bf16 %v695_v56, %v695_v56  ;;  %v730_v59 = vpack.c.bf16 %v709_v57, %v709_v57 }
 0x1ba   : > { %v725_v60 = vpop.f32.mrf.mxu0  ;;  %v738_v61 = vsel %vm682_vm1, %v730_v59, 0  ;;  %v844_v62 = vunpack.c.l.b16 %v730_v59  ;;  %v839_v63 = vunpack.c.l.b16 %v728_v58 }
 0x1bb   : > { %v2266_v0 = vpack.c.bf16 %v725_v60, %v725_v60  ;;  %747 = vmatpush.bf16.xpose.msrb.mxu1 %v738_v61 }
 0x1bc   : > { %v845_v1 = vpack.c.b16 %v844_v62, %v844_v62  ;;  %v840_v2 = vpack.c.b16 %v839_v63, %v839_v63 }
 0x1bd   : > { %v823_v3 = vsel %vm802_vm2, %v2266_v0, 0  ;;  %v947_v42 = vunpack.c.l.b16 %v2266_v0 }
 0x1be   : > { %832 = vmatpush.bf16.msra.mxu0 %v823_v3  ;;  %846 = vrot.lane.b32.xlu0 %v845_v1, %s2025_s28 }
 0x1bf   : > { %841 = vrot.lane.b32.xlu1 %v840_v2, %s2025_s28  ;;  %v697_v4 = vpop.f32.mrf.mxu2  ;;  %v711_v5 = vpop.f32.mrf.mxu3  ;;  %v948_v43 = vpack.c.b16 %v947_v42, %v947_v42 }
 0x1c0   : > { %v729_v6 = vpack.c.bf16 %v697_v4, %v697_v4  ;;  %v731_v7 = vpack.c.bf16 %v711_v5, %v711_v5 }
 0x1c2   : > { %v868_v8 = vunpack.c.l.b16 %v729_v6  ;;  %v873_v9 = vunpack.c.l.b16 %v731_v7  ;;  %1695 = vmatmul.msk.bf16.vlgmr.msrb.gmra.mxu1 %vm682_vm1, %v728_v58  ;;  %v757_v10 = vsel %vm682_vm1, %v731_v7, 0 }
 0x1c3   : > { %766 = vmatpush.bf16.xpose.msrb.mxu2 %v757_v10 }
 0x1c4   : > { %v869_v11 = vpack.c.b16 %v868_v8, %v868_v8  ;;  %v874_v12 = vpack.c.b16 %v873_v9, %v873_v9 }
 0x1c6   : > { %875 = vrot.lane.b32.xlu0 %v874_v12, %s2025_s28 }
 0x1c7   : > { %870 = vrot.lane.b32.xlu1 %v869_v11, %s2025_s28 }
 0x1ca   : > { %1696 = vmatmul.msk.bf16.vlgmr.msrb.gmra.mxu2 %vm682_vm1, %v729_v6  ;;  %v923_v6 = vunpack.c.l.b16 %v2261_v54 }
 0x1cc   : > { %v924_v7 = vpack.c.b16 %v923_v6, %v923_v6 }
 0x230   : > { %v847_v13 = vpop.permute.xlu0 %846 }
 0x231   : > { %v852_v14 = vsel %vm682_vm1, %v847_v13, 0  ;;  %v842_v15 = vpop.permute.xlu1 %841 }
 0x232   : > { %861 = vmatpush.bf16.xpose.msra.mxu1 %v852_v14 }
 0x238   : > { %v876_v16 = vpop.permute.xlu0 %875 }
 0x239   : > { %v881_v17 = vsel %vm682_vm1, %v876_v16, 0  ;;  %1699 = vmatmul.msk.bf16.vlgmr.msra.gmra.mxu1 %vm682_vm1, %v842_v15  ;;  %v871_v19 = vpop.permute.xlu1 %870 }
 0x23a   : > { %890 = vmatpush.bf16.xpose.msra.mxu2 %v881_v17 }
 0x23f   : > { %v749_v18 = vpop.f32.mrf.mxu1 }
 0x240   : > { %v772_v20 = vmul.f32 0.17677669, %v749_v18 }
 0x241   : > { %1700 = vmatmul.msk.bf16.vlgmr.msra.gmra.mxu2 %vm682_vm1, %v871_v19 }
 0x242   : > { %v775_v21 = vsel %vm774_vm3, %v772_v20, -inf }
 0x243   : > { %776 = vmax.xlane.f32.xlu2 %v775_v21  ;;  %v1848_v21 = vld [vmem:[%s2500_s4 + $0x38] sm:$0xff] }
 0x244   : > { %1049 = vmatpush.bf16.msrb.mxu1 %v1848_v21 }
 0x247   : > { %v751_v22 = vpop.f32.mrf.mxu1 }
 0x248   : > { %v1847_v22 = vld [vmem:[%s2500_s4 + $0x30] sm:$0xff] }
 0x249   : > { %1050 = vmatpush.bf16.msrb.mxu1 %v1847_v22 }
 0x24d   : > { %v768_v23 = vpop.f32.mrf.mxu2 }
 0x24e   : > { %v773_v24 = vmul.f32 0.17677669, %v768_v23  ;;  %v1846_v23 = vld [vmem:[%s2500_s4 + $0x28] sm:$0xff] }
 0x24f   : > { %1051 = vmatpush.bf16.msrb.mxu1 %v1846_v23 }
 0x250   : > { %v778_v25 = vsel %vm774_vm3, %v773_v24, -inf }
 0x251   : > { %779 = vmax.xlane.f32.xlu2 %v778_v25  ;;  %v1844_v25 = vld [vmem:[%s2500_s4 + $0x18] sm:$0xff] }
 0x255   : > { %v770_v26 = vpop.f32.mrf.mxu2 }
 0x2b6   : > { %v777_v27 = vpop.xlane.xlu2 %776  ;;  %v863_v28 = vpop.f32.mrf.mxu1 }
 0x2b7   : > { %v781_v29 = vsub.f32 %v772_v20, %v777_v27  ;;  %v896_v30 = vmul.f32 0.17677669, %v863_v28  ;;  %v1843_v27 = vld [vmem:[%s2500_s4 + $0x10] sm:$0xff]  ;;  %v1842_v28 = vld [vmem:[%s2500_s4 + $0x8] sm:$0xff] }
 0x2b9   : > { %v783_v31 = vmul.f32 1.442695, %v781_v29  ;;  %v898_v32 = vsel %vm774_vm3, %v896_v30, -inf }
 0x2ba   : > { %899 = vmax.xlane.f32.xlu0 %v898_v32 }
 0x2bb   : > { %1931 = vpow2.f32 %v783_v31 }
 0x2be   : > { %v865_v33 = vpop.f32.mrf.mxu1 }
 0x2bf   : > { %v1841_v33 = vld [vmem:[%s2500_s4] sm:$0xff] }
 0x2c1   : > { %v1932_v34 = vpop.eup %1931 }
 0x2c2   : > { %v787_v35 = vsel %vm774_vm3, %v1932_v34, 0.0 }
 0x2c3   : > { %788 = vadd.xlane.f32.xlu2 %v787_v35 }
 0x2c4   : > { %v780_v36 = vpop.xlane.xlu2 %779  ;;  %v892_v37 = vpop.f32.mrf.mxu2 }
 0x2c5   : > { %v782_v38 = vsub.f32 %v773_v24, %v780_v36  ;;  %v897_v39 = vmul.f32 0.17677669, %v892_v37  ;;  %v1845_v24 = vld [vmem:[%s2500_s4 + $0x20] sm:$0xff] }
 0x2c6   : > { %1052 = vmatpush.bf16.msrb.mxu1 %v1845_v24  ;;  %v1924_v24 = vld [vmem:[%s2508_s12] ss:$0 sm:$0xff] }
 0x2c7   : > { %v785_v40 = vmul.f32 1.442695, %v782_v38  ;;  %v901_v41 = vsel %vm774_vm3, %v897_v39, -inf }
 0x2c8   : > { %902 = vmax.xlane.f32.xlu1 %v901_v41 }
 0x2c9   : > { %1933 = vpow2.f32 %v785_v40  ;;  %v1923_v40 = vld [vmem:[%s2501_s5] ss:$0 sm:$0xff] }
 0x2ca   : > { %1053 = vmatpush.bf16.msrb.mxu1 %v1844_v25 }
 0x2cc   : > { %v894_v44 = vpop.f32.mrf.mxu2 }
 0x2ce   : > { %949 = vrot.lane.b32.xlu0 %v948_v43, %s2025_s28  ;;  %1054 = vmatpush.bf16.msrb.mxu1 %v1843_v27 }
 0x2cf   : > { %v1934_v45 = vpop.eup %1933 }
 0x2d0   : > { %v790_v46 = vsel %vm774_vm3, %v1934_v45, 0.0 }
 0x2d1   : > { %791 = vadd.xlane.f32.xlu2 %v790_v46 }
 0x2d2   : > { %1055 = vmatpush.bf16.msrb.mxu1 %v1842_v28  ;;  %v1925_v28 = vld [vmem:[%s2509_s13] ss:$0 sm:$0xff] }
 0x2d6   : > { %1056 = vmatpush.bf16.msrb.mxu1 %v1841_v33 }
 0x32d   : > { %v900_v47 = vpop.xlane.xlu0 %899 }
 0x32e   : > { %v904_v48 = vsub.f32 %v896_v30, %v900_v47 }
 0x330   : > { %v906_v49 = vmul.f32 1.442695, %v904_v48 }
 0x332   : > { %1935 = vpow2.f32 %v906_v49  ;;  %v2026_v49 = vmov 64.0  }
 0x336   : > { %v789_v52 = vpop.xlane.xlu2 %788 }
 0x337   : > { %1937 = vrcp.f32 %v789_v52 }
 0x338   : > { %v1936_v53 = vpop.eup %1935 }
 0x339   : > { %v910_v55 = vsel %vm774_vm3, %v1936_v53, 0.0 }
 0x33a   : > { %911 = vadd.xlane.f32.xlu2 %v910_v55 }
 0x33b   : > { %v903_v56 = vpop.xlane.xlu1 %902 }
 0x33c   : > { %v905_v57 = vsub.f32 %v897_v39, %v903_v56 }
 0x33d   : > { %v1938_v58 = vpop.eup %1937 }
 0x33e   : > { %v795_v59 = vmul.f32 %v1938_v58, %v1932_v34  ;;  %v908_v60 = vmul.f32 1.442695, %v905_v57 }
 0x340   : > { %1939 = vpow2.f32 %v908_v60  ;;  %v950_v61 = vpop.permute.xlu0 %949  ;;  %v797_v62 = vpack.c.bf16 %v795_v59, %v795_v59 }
 0x341   : > { %v955_v63 = vsel %vm802_vm2, %v950_v61, 0 }
 0x342   : > { %1697 = vmatmul.msk.bf16.vlgmr.msrb.gmra.mxu3 %vm774_vm3, %v797_v62  ;;  %964 = vmatpush.bf16.msrb.mxu0 %v955_v63 }
 0x344   : > { %v792_v0 = vpop.xlane.xlu2 %791 }
 0x345   : > { %1941 = vrcp.f32 %v792_v0 }
 0x346   : > { %v1940_v1 = vpop.eup %1939 }
 0x347   : > { %v913_v2 = vsel %vm774_vm3, %v1940_v1, 0.0 }
 0x348   : > { %914 = vadd.xlane.f32.xlu2 %v913_v2 }
 0x34b   : > { %v1942_v3 = vpop.eup %1941 }
 0x34c   : > { %v796_v4 = vmul.f32 %v1942_v3, %v1934_v45  ;;  %v1852_v3 = vld [vmem:[%s2502_s6 + $0x18] sm:$0xff] }
 0x34d   : > { %1172 = vmatpush.bf16.msrb.mxu2 %v1852_v3 }
 0x34e   : > { %v798_v5 = vpack.c.bf16 %v796_v4, %v796_v4  ;;  %v1851_v4 = vld [vmem:[%s2502_s6 + $0x10] sm:$0xff] }
 0x350   : > { %1698 = vmatmul.msk.bf16.vlgmr.msra.gmra.mxu0 %vm774_vm3, %v798_v5  ;;  %v1850_v5 = vld [vmem:[%s2502_s6 + $0x8] sm:$0xff] }
 0x351   : > { %1173 = vmatpush.bf16.msrb.mxu2 %v1851_v4 }
 0x355   : > { %1174 = vmatpush.bf16.msrb.mxu2 %v1850_v5 }
 0x360   : > { %925 = vrot.lane.b32.xlu2 %v924_v7, %s2025_s28 }
 0x3ad   : > { %v912_v8 = vpop.xlane.xlu2 %911 }
 0x3ae   : > { %1943 = vrcp.f32 %v912_v8 }
 0x3b4   : > { %v1944_v10 = vpop.eup %1943 }
 0x3b5   : > { %v918_v12 = vmul.f32 %v1944_v10, %v1936_v53 }
 0x3b7   : > { %v920_v18 = vpack.c.bf16 %v918_v12, %v918_v12 }
 0x3bb   : > { %v915_v9 = vpop.xlane.xlu2 %914 }
 0x3bc   : > { %1945 = vrcp.f32 %v915_v9  ;;  %v1849_v9 = vld [vmem:[%s2502_s6] sm:$0xff] }
 0x3bd   : > { %1947 = vrcp.f32 %v2026_v49  ;;  %1175 = vmatpush.bf16.msrb.mxu2 %v1849_v9 }
 0x3c2   : > { %v1946_v11 = vpop.eup %1945 }
 0x3c3   : > { %v919_v13 = vmul.f32 %v1946_v11, %v1940_v1  ;;  %v926_v14 = vpop.permute.xlu2 %925  ;;  %v1948_v52 = vpop.eup %1947 }
 0x3c4   : > { %v931_v15 = vsel %vm802_vm2, %v926_v14, 0  ;;  %v1074_v53 = vmul.f32 64.0, %v1948_v52  ;;  %vm1078_vm4 = vweird.f32 %v1948_v52 }
 0x3c5   : > { %v921_v16 = vpack.c.bf16 %v919_v13, %v919_v13  ;;  %v815_v17 = vpop.f32.mrf.mxu3  ;;  %940 = vmatpush.bf16.msra.mxu3 %v931_v15 }
 0x3c6   : > { %v1075_v55 = vsub.f32 1.0, %v1074_v53 }
 0x3c7   : > { %1702 = vmatmul.msk.bf16.vlgmr.msrb.gmra.mxu0 %vm774_vm3, %v921_v16 }
 0x3c8   : > { %1701 = vmatmul.msk.bf16.vlgmr.msra.gmra.mxu3 %vm774_vm3, %v920_v18  ;;  %v1076_v56 = vmul.f32 %v1948_v52, %v1075_v55 }
 0x3ca   : > { %v1077_v57 = vadd.f32 %v1948_v52, %v1076_v56 }
 0x3cc   : > { %v2333_v58 = vsel %vm1078_vm4, %v1948_v52, %v1077_v57 }
 0x3cd   : > { %v817_v54 = vpop.f32.mrf.mxu3  ;;  %v834_v19 = vpop.f32.mrf.mxu0 }
 0x3d5   : > { %v836_v20 = vpop.f32.mrf.mxu0 }
 0x444   : > { %v966_v26 = vpop.f32.mrf.mxu0 }
 0x44b   : > { %v942_v29 = vpop.f32.mrf.mxu3 }
 0x44c   : > { %v1913_v30 = vpack.i.bf16 %v966_v26, %v942_v29  ;;  %v968_v31 = vpop.f32.mrf.mxu0 }
 0x44e   : > { %1914 = vrot.lane.b32.xlu1 %v1913_v30, %s2025_s28 }
 0x453   : > { %v944_v32 = vpop.f32.mrf.mxu3 }
 0x4c0   : > { %v1915_v34 = vpop.permute.xlu1 %1914 }
 0x4c1   : > { %v1917_v35 = vunpack.i.h.bf16 %v1915_v34  ;;  %v1916_v36 = vunpack.i.l.bf16 %v1915_v34 }
 0x4c3   : > { %v979_v37 = vsel %vm682_vm1, %v834_v19, %v1917_v35  ;;  %v978_v38 = vsel %vm682_vm1, %v815_v17, %v1916_v36  ;;  %v1864_v35 = vld [vmem:[%s2504_s8 + $0x58] sm:$0xff]  ;;  %v1863_v36 = vld [vmem:[%s2504_s8 + $0x50] sm:$0xff] }
 0x4c4   : > { %v980_v39 = vpack.c.bf16 %v979_v37, %v978_v38  ;;  %1329 = vmatpush.bf16.msra.mxu0 %v1864_v35  ;;  %v1862_v37 = vld [vmem:[%s2504_s8 + $0x48] sm:$0xff]  ;;  %v1861_v38 = vld [vmem:[%s2504_s8 + $0x40] sm:$0xff] }
 0x4c6   : > { %1057 = vmatmul.bf16.vlgmr.msrb.gmra.mxu1 %v980_v39  ;;  %v1860_v39 = vld [vmem:[%s2504_s8 + $0x38] sm:$0xff] }
 0x4c7   : > { %1311 = vmatpush.bf16.msrb.mxu3 %v1860_v39 }
 0x4c8   : > { %1330 = vmatpush.bf16.msra.mxu0 %v1863_v36 }
 0x4cc   : > { %1331 = vmatpush.bf16.msra.mxu0 %v1862_v37 }
 0x4d0   : > { %1332 = vmatpush.bf16.msra.mxu0 %v1861_v38  ;;  %v1867_v38 = vld [vmem:[%s2506_s10 + $0x10] sm:$0xff] }
 0x543   : > { %v1058_v41 = vpop.f32.mrf.mxu1 }
 0x544   : > { %v1059_v42 = vadd.f32 %v1923_v40, %v1058_v41  ;;  %v1858_v41 = vld [vmem:[%s2504_s8 + $0x28] sm:$0xff] }
 0x546   : > { %v1063_v43 = vadd.f32 %v1059_v42, %v2252_v50  ;;  %v1857_v42 = vld [vmem:[%s2504_s8 + $0x20] sm:$0xff] }
 0x548   : > { %v1067_v44 = vsel %vm682_vm1, %v1063_v43, 0.0 }
 0x549   : > { %1068 = vadd.xlane.f32.xlu2 %v1067_v44 }
 0x54b   : > { %v1060_v45 = vpop.f32.mrf.mxu1 }
 0x54c   : > { %v1061_v46 = vadd.f32 %v1923_v40, %v1060_v45  ;;  %v1859_v40 = vld [vmem:[%s2504_s8 + $0x30] sm:$0xff]  ;;  %v1926_v45 = vld [vmem:[%s2503_s7] ss:$0 sm:$0xff] }
 0x54d   : > { %1312 = vmatpush.bf16.msrb.mxu3 %v1859_v40 }
 0x54e   : > { %v1064_v47 = vadd.f32 %v1061_v46, %v2254_v51  ;;  %v1855_v46 = vld [vmem:[%s2504_s8 + $0x10] sm:$0xff] }
 0x550   : > { %v1070_v48 = vsel %vm682_vm1, %v1064_v47, 0.0 }
 0x551   : > { %1071 = vadd.xlane.f32.xlu0 %v1070_v48  ;;  %1313 = vmatpush.bf16.msrb.mxu3 %v1858_v41  ;;  %v1854_v48 = vld [vmem:[%s2504_s8 + $0x8] sm:$0xff] }
 0x555   : > { %1314 = vmatpush.bf16.msrb.mxu3 %v1857_v42 }
 0x5bc   : > { %v1069_v50 = vpop.xlane.xlu2 %1068 }
 0x5bd   : > { %v1080_v59 = vmul.f32 %v2333_v58, %v1069_v50 }
 0x5bf   : > { %v1082_v60 = vsub.f32 %v1063_v43, %v1080_v59  ;;  %v1856_v43 = vld [vmem:[%s2504_s8 + $0x18] sm:$0xff] }
 0x5c0   : > { %1315 = vmatpush.bf16.msrb.mxu3 %v1856_v43 }
 0x5c1   : > { %v1084_v61 = vmul.f32 %v1082_v60, %v1082_v60 }
 0x5c3   : > { %v1086_v51 = vsel %vm682_vm1, %v1084_v61, 0.0 }
 0x5c4   : > { %v1072_v62 = vpop.xlane.xlu0 %1071  ;;  %1087 = vadd.xlane.f32.xlu1 %v1086_v51  ;;  %1316 = vmatpush.bf16.msrb.mxu3 %v1855_v46  ;;  %v1866_v46 = vld [vmem:[%s2506_s10 + $0x8] sm:$0xff] }
 0x5c5   : > { %v1081_v63 = vmul.f32 %v2333_v58, %v1072_v62 }
 0x5c7   : > { %v1083_v0 = vsub.f32 %v1064_v47, %v1081_v63 }
 0x5c8   : > { %1317 = vmatpush.bf16.msrb.mxu3 %v1854_v48 }
 0x5c9   : > { %v1085_v1 = vmul.f32 %v1083_v0, %v1083_v0 }
 0x5cb   : > { %v1089_v2 = vsel %vm682_vm1, %v1085_v1, 0.0 }
 0x5cc   : > { %1090 = vadd.xlane.f32.xlu2 %v1089_v2 }
 0x637   : > { %v1088_v6 = vpop.xlane.xlu1 %1087 }
 0x638   : > { %v1092_v7 = vmul.f32 %v1088_v6, %v2333_v58  ;;  %v1927_v6 = vld [vmem:[%s2505_s9] ss:$0 sm:$0xff] }
 0x63a   : > { %v1094_v8 = vadd.f32 1e-05, %v1092_v7 }
 0x63c   : > { %1949 = vrsqrt.f32 %v1094_v8  ;;  %vm1102_vm6 = vweird.f32 %v1094_v8 }
 0x63f   : > { %v1091_v10 = vpop.xlane.xlu2 %1090 }
 0x640   : > { %v1093_v11 = vmul.f32 %v1091_v10, %v2333_v58 }
 0x642   : > { %v1950_v12 = vpop.eup %1949  ;;  %v1095_v13 = vadd.f32 1e-05, %v1093_v11 }
 0x643   : > { %v1097_v14 = vmul.f32 %v1950_v12, %v1094_v8  ;;  %vm1103_vm5 = vweird.f32 %v1950_v12 }
 0x644   : > { %1951 = vrsqrt.f32 %v1095_v13  ;;  %vm1104_vm7 = vmor %vm1102_vm6, %vm1103_vm5  ;;  %vm1112_vm9 = vweird.f32 %v1095_v13 }
 0x645   : > { %v1098_v15 = vmul.f32 %v1950_v12, %v1097_v14 }
 0x647   : > { %v1099_v16 = vmul.f32 0.5, %v1098_v15 }
 0x649   : > { %v1100_v17 = vsub.f32 1.5, %v1099_v16 }
 0x64a   : > { %v1952_v18 = vpop.eup %1951 }
 0x64b   : > { %v1101_v54 = vmul.f32 %v1950_v12, %v1100_v17  ;;  %v1107_v19 = vmul.f32 %v1952_v18, %v1095_v13  ;;  %vm1113_vm8 = vweird.f32 %v1952_v18 }
 0x64c   : > { %vm1114_vm10 = vmor %vm1112_vm9, %vm1113_vm8 }
 0x64d   : > { %v1108_v20 = vmul.f32 %v1952_v18, %v1107_v19  ;;  %v1105_v21 = vsel %vm1104_vm7, %v1950_v12, %v1101_v54 }
 0x64e   : > { %v1116_v25 = vmul.f32 %v1105_v21, %v1082_v60  ;;  %v1853_v60 = vld [vmem:[%s2504_s8] sm:$0xff] }
 0x64f   : > { %v1109_v22 = vmul.f32 0.5, %v1108_v20  ;;  %1318 = vmatpush.bf16.msrb.mxu3 %v1853_v60 }
 0x650   : > { %v1121_v29 = vmul.f32 %v1924_v24, %v1116_v25 }
 0x651   : > { %v1110_v23 = vsub.f32 1.5, %v1109_v22 }
 0x652   : > { %v2359_v32 = vadd.f32 %v1925_v28, %v1121_v29 }
 0x653   : > { %v1111_v26 = vmul.f32 %v1952_v18, %v1110_v23 }
 0x655   : > { %v1115_v27 = vsel %vm1114_vm10, %v1952_v18, %v1111_v26 }
 0x656   : > { %v1117_v30 = vmul.f32 %v1115_v27, %v1083_v0 }
 0x658   : > { %v1122_v31 = vmul.f32 %v1924_v24, %v1117_v30 }
 0x65a   : > { %v2361_v33 = vadd.f32 %v1925_v28, %v1122_v31  ;;  %v1868_v28 = vld [vmem:[%s2506_s10 + $0x18] sm:$0xff] }
 0x65b   : > { %1471 = vmatpush.bf16.msra.mxu2 %v1868_v28 }
 0x65c   : > { %v1128_v34 = vpack.c.bf16 %v2361_v33, %v2359_v32 }
 0x65e   : > { %1751 = vmatmul.msk.bf16.vlgmr.msrb.gmra.mxu2 %vm682_vm1, %v1128_v34 }
 0x65f   : > { %1472 = vmatpush.bf16.msra.mxu2 %v1867_v38 }
 0x663   : > { %1473 = vmatpush.bf16.msra.mxu2 %v1866_v46 }
 0x6e1   : > { %v1177_v44 = vpop.f32.mrf.mxu2 }
 0x6e2   : > { %v1178_v47 = vadd.f32 %v1926_v45, %v1177_v44 }
 0x6e4   : > { %v1191_v52 = vrot.slane %v1178_v47, 1  ;;  %v1184_v61 = vrot.slane %v1178_v47, 7 }
 0x6e6   : > { %v1196_v57 = vsel %vm1195_vm11, %v1191_v52, 0.0  ;;  %v1189_v1 = vsel %vm1188_vm12, 0.0, %v1184_v61 }
 0x6e9   : > { %v1179_v49 = vpop.f32.mrf.mxu2 }
 0x6ea   : > { %v1180_v53 = vadd.f32 %v1926_v45, %v1179_v49 }
 0x6ec   : > { %v1192_v55 = vrot.slane %v1180_v53, 1  ;;  %v1918_v56 = vpack.i.bf16 %v1180_v53, %v1178_v47  ;;  %v1185_v51 = vrot.slane %v1180_v53, 7 }
 0x6ee   : > { %v1197_v50 = vsel %vm1195_vm11, %v1192_v55, 0.0  ;;  %1919 = vrot.lane.b32.xlu0 %v1918_v56, %s2025_s28  ;;  %v1190_v2 = vsel %vm1188_vm12, 0.0, %v1185_v51  ;;  %v1865_v55 = vld [vmem:[%s2506_s10] sm:$0xff]  ;;  %s515_s28 = scalar_lea.vmem [#allocation2], %s1623_s29 }
 0x6ef   : > { %v1207_v59 = vpack.c.bf16 %v1197_v50, %v1196_v57  ;;  %1474 = vmatpush.bf16.msra.mxu2 %v1865_v55  ;;  %s1554_s27 = sshll.u32 %s515_s28, 4  ;;  %s1555_s27 = int_to_ptr.vmem [resolvable:$true] %s1554_s27 }
 0x6f1   : > { %1800 = vmatmul.msk.bf16.vlgmr.msra.gmra.mxu0 %vm682_vm1, %v1207_v59 }
 0x760   : > { %v1920_v62 = vpop.permute.xlu0 %1919 }
 0x761   : > { %v1922_v63 = vunpack.i.h.bf16 %v1920_v62  ;;  %v1921_v0 = vunpack.i.l.bf16 %v1920_v62 }
 0x763   : > { %v1205_v3 = vsel %vm682_vm1, %v1190_v2, %v1922_v63  ;;  %v1204_v4 = vsel %vm682_vm1, %v1189_v1, %v1921_v0 }
 0x764   : > { %v1206_v5 = vpack.c.bf16 %v1205_v3, %v1204_v4 }
 0x766   : > { %1319 = vmatmul.bf16.vlgmr.msrb.gmra.mxu3 %v1206_v5 }
 0x76e   : > { %v1334_v7 = vpop.f32.mrf.mxu0 }
 0x776   : > { %v1336_v16 = vpop.f32.mrf.mxu0 }
 0x7e9   : > { %v1320_v8 = vpop.f32.mrf.mxu3 }
 0x7ea   : > { %v1321_v9 = vadd.f32 %v1927_v6, %v1320_v8 }
 0x7ec   : > { %v2412_v10 = vadd.f32 %v1334_v7, %v1321_v9 }
 0x7ee   : > { %v2415_v11 = vmul.f32 0.70710677, %v2412_v10 }
 0x7f0   : > { %v1343_v12 = vmul.f32 %v2415_v11, %v2415_v11 }
 0x7f1   : > { %v1322_v13 = vpop.f32.mrf.mxu3 }
 0x7f2   : > { %v1344_v14 = vmin.f32 %v1343_v12, 16.0  ;;  %v1323_v15 = vadd.f32 %v1927_v6, %v1322_v13 }
 0x7f4   : > { %v1345_v17 = vmul.f32 2.1237322e-06, %v1344_v14  ;;  %v1356_v18 = vmul.f32 3.8918573e-05, %v1344_v14  ;;  %v2419_v54 = vadd.f32 %v1336_v16, %v1323_v15 }
 0x7f6   : > { %v1346_v19 = vadd.f32 0.00028619796, %v1345_v17  ;;  %v1357_v20 = vadd.f32 0.001143296, %v1356_v18  ;;  %v2422_v21 = vmul.f32 0.70710677, %v2419_v54 }
 0x7f8   : > { %v1358_v22 = vmul.f32 %v1357_v20, %v1344_v14  ;;  %v1383_v23 = vmul.f32 %v2422_v21, %v2422_v21  ;;  %v1347_v24 = vmul.f32 %v1346_v19, %v1344_v14 }
 0x7fa   : > { %v1359_v25 = vadd.f32 0.014752088, %v1358_v22  ;;  %v1384_v26 = vmin.f32 %v1383_v23, 16.0  ;;  %v1348_v31 = vadd.f32 0.0036580483, %v1347_v24 }
 0x7fc   : > { %v1360_v27 = vmul.f32 %v1359_v25, %v1344_v14  ;;  %v1385_v29 = vmul.f32 2.1237322e-06, %v1384_v26  ;;  %v1396_v30 = vmul.f32 3.8918573e-05, %v1384_v26  ;;  %v1349_v41 = vmul.f32 %v1348_v31, %v1344_v14 }
 0x7fe   : > { %v1361_v34 = vadd.f32 0.112945676, %v1360_v27  ;;  %v1386_v35 = vadd.f32 0.00028619796, %v1385_v29  ;;  %v1397_v36 = vadd.f32 0.001143296, %v1396_v30 }
 0x7ff   : > { %v1350_v48 = vadd.f32 0.05243302, %v1349_v41 }
 0x800   : > { %v1362_v37 = vmul.f32 %v1361_v34, %v1344_v14  ;;  %v1387_v39 = vmul.f32 %v1386_v35, %v1384_v26  ;;  %v1398_v40 = vmul.f32 %v1397_v36, %v1384_v26  ;;  %v1339_v35 = vmul.f32 0.5, %v2412_v10 }
 0x801   : > { %v1351_v57 = vmul.f32 %v1350_v48, %v1344_v14  ;;  %v1340_v36 = vmul.f32 0.5, %v2419_v54 }
 0x802   : > { %v1363_v42 = vadd.f32 0.4994258, %v1362_v37  ;;  %v1388_v43 = vadd.f32 0.0036580483, %v1387_v39  ;;  %v1399_v44 = vadd.f32 0.014752088, %v1398_v40 }
 0x803   : > { %v1352_v51 = vadd.f32 0.18741608, %v1351_v57 }
 0x804   : > { %v1364_v45 = vmul.f32 %v1363_v42, %v1344_v14  ;;  %v1400_v47 = vmul.f32 %v1399_v44, %v1384_v26  ;;  %v1389_v52 = vmul.f32 %v1388_v43, %v1384_v26 }
 0x805   : > { %v1353_v2 = vmul.f32 %v1352_v51, %v1344_v14 }
 0x806   : > { %v1365_v49 = vadd.f32 1.0, %v1364_v45  ;;  %v1401_v53 = vadd.f32 0.112945676, %v1400_v47  ;;  %v1390_v50 = vadd.f32 0.05243302, %v1389_v52 }
 0x807   : > { %v1354_v8 = vadd.f32 1.1283791, %v1353_v2 }
 0x808   : > { %1953 = vrcp.f32 %v1365_v49  ;;  %v1402_v56 = vmul.f32 %v1401_v53, %v1384_v26  ;;  %v1391_v63 = vmul.f32 %v1390_v50, %v1384_v26  ;;  %v1377_v4 = vand.u32 2147483648, %v1365_v49 }
 0x809   : > { %v1375_v6 = vand.u32 2147483647, %v1365_v49  ;;  %vm1371_vm14 = vweird.f32 %v1365_v49  ;;  %v1355_v18 = vmul.f32 %v1354_v8, %v2415_v11 }
 0x80a   : > { %v1403_v59 = vadd.f32 0.4994258, %v1402_v56  ;;  %v1392_v5 = vadd.f32 0.18741608, %v1391_v63  ;;  %v1378_v13 = vor.u32 1.1754944e-38, %v1377_v4 }
 0x80b   : > { %vm1376_vm0 = vcmp.eq.f32.partialorder %v1375_v6, 8.507059e+37 }
 0x80c   : > { %v1404_v60 = vmul.f32 %v1403_v59, %v1384_v26  ;;  %v1393_v15 = vmul.f32 %v1392_v5, %v1384_v26 }
 0x80e   : > { %v1954_v61 = vpop.eup %1953  ;;  %v1405_v0 = vadd.f32 1.0, %v1404_v60  ;;  %v1394_v14 = vadd.f32 1.1283791, %v1393_v15 }
 0x80f   : > { %v1367_v62 = vmul.f32 %v1954_v61, %v1365_v49  ;;  %vm1372_vm13 = vweird.f32 %v1954_v61 }
 0x810   : > { %1955 = vrcp.f32 %v1405_v0  ;;  %vm1373_vm15 = vmor %vm1371_vm14, %vm1372_vm13  ;;  %v1417_v20 = vand.u32 2147483648, %v1405_v0  ;;  %v1415_v24 = vand.u32 2147483647, %v1405_v0  ;;  %vm1411_vm3 = vweird.f32 %v1405_v0 }
 0x811   : > { %v1368_v1 = vsub.f32 1.0, %v1367_v62  ;;  %v1395_v29 = vmul.f32 %v1394_v14, %v2422_v21  ;;  %v1928_v21 = vld [vmem:[%s2507_s11] ss:$0 sm:$0xff] }
 0x812   : > { %v1418_v27 = vor.u32 1.1754944e-38, %v1417_v20  ;;  %vm1416_vm5 = vcmp.eq.f32.partialorder %v1415_v24, 8.507059e+37 }
 0x813   : > { %v1369_v3 = vmul.f32 %v1954_v61, %v1368_v1 }
 0x815   : > { %v1370_v7 = vadd.f32 %v1954_v61, %v1369_v3 }
 0x816   : > { %v1956_v9 = vpop.eup %1955 }
 0x817   : > { %v1374_v12 = vsel %vm1373_vm15, %v1954_v61, %v1370_v7  ;;  %v1407_v16 = vmul.f32 %v1956_v9, %v1405_v0  ;;  %vm1412_vm2 = vweird.f32 %v1956_v9  ;;  %v1929_v7 = vld [vmem:[%s2510_s14] ss:$0 sm:$0xff] }
 0x818   : > { %v1379_v17 = vsel %vm1376_vm0, %v1378_v13, %v1374_v12  ;;  %vm1413_vm4 = vmor %vm1411_vm3, %vm1412_vm2 }
 0x819   : > { %v1408_v19 = vsub.f32 1.0, %v1407_v16  ;;  %v1380_v22 = vmul.f32 %v1379_v17, %v1355_v18 }
 0x81b   : > { %v1409_v23 = vmul.f32 %v1956_v9, %v1408_v19  ;;  %v1801_v28 = vclamps-f32 %v1380_v22, 1.0 }
 0x81d   : > { %v1410_v25 = vadd.f32 %v1956_v9, %v1409_v23  ;;  %v1423_v34 = vadd.f32 1.0, %v1801_v28 }
 0x81f   : > { %v1414_v26 = vsel %vm1413_vm4, %v1956_v9, %v1410_v25  ;;  %v1425_v38 = vmul.f32 %v1423_v34, %v1339_v35  ;;  %v1930_v9 = vld [vmem:[%s2511_s15] ss:$0 sm:$0xff] }
 0x820   : > { %v1419_v30 = vsel %vm1416_vm5, %v1418_v27, %v1414_v26 }
 0x821   : > { %v1420_v31 = vmul.f32 %v1419_v30, %v1395_v29 }
 0x823   : > { %v1802_v11 = vclamps-f32 %v1420_v31, 1.0 }
 0x825   : > { %v1424_v37 = vadd.f32 1.0, %v1802_v11 }
 0x827   : > { %v1426_v39 = vmul.f32 %v1424_v37, %v1340_v36 }
 0x829   : > { %v1427_v40 = vpack.c.bf16 %v1426_v39, %v1425_v38 }
 0x82b   : > { %1819 = vmatmul.msk.bf16.vlgmr.msra.gmra.mxu2 %vm682_vm1, %v1427_v40 }
 0x8ae   : > { %v1476_v41 = vpop.f32.mrf.mxu2 }
 0x8af   : > { %v1477_v42 = vadd.f32 %v1928_v21, %v1476_v41 }
 0x8b1   : > { %v1481_v43 = vadd.f32 %v1477_v42, %v2359_v32 }
 0x8b3   : > { %v1485_v44 = vsel %vm682_vm1, %v1481_v43, 0.0 }
 0x8b4   : > { %1486 = vadd.xlane.f32.xlu2 %v1485_v44 }
 0x8b6   : > { %v1478_v10 = vpop.f32.mrf.mxu2 }
 0x8b7   : > { %v1479_v45 = vadd.f32 %v1928_v21, %v1478_v10 }
 0x8b9   : > { %v1482_v54 = vadd.f32 %v1479_v45, %v2361_v33 }
 0x8bb   : > { %v1488_v46 = vsel %vm682_vm1, %v1482_v54, 0.0 }
 0x8bc   : > { %1489 = vadd.xlane.f32.xlu1 %v1488_v46 }
 0x927   : > { %v1487_v47 = vpop.xlane.xlu2 %1486 }
 0x928   : > { %v1491_v48 = vmul.f32 %v1487_v47, %v2333_v58 }
 0x92a   : > { %v1493_v49 = vsub.f32 %v1481_v43, %v1491_v48 }
 0x92c   : > { %v1495_v52 = vmul.f32 %v1493_v49, %v1493_v49 }
 0x92e   : > { %v1497_v53 = vsel %vm682_vm1, %v1495_v52, 0.0 }
 0x92f   : > { %v1490_v55 = vpop.xlane.xlu1 %1489  ;;  %1498 = vadd.xlane.f32.xlu2 %v1497_v53 }
 0x930   : > { %v1492_v32 = vmul.f32 %v1490_v55, %v2333_v58 }
 0x932   : > { %v1494_v56 = vsub.f32 %v1482_v54, %v1492_v32 }
 0x934   : > { %v1496_v57 = vmul.f32 %v1494_v56, %v1494_v56 }
 0x936   : > { %v1500_v50 = vsel %vm682_vm1, %v1496_v57, 0.0 }
 0x937   : > { %1501 = vadd.xlane.f32.xlu1 %v1500_v50 }
 0x9a2   : > { %v1499_v33 = vpop.xlane.xlu2 %1498 }
 0x9a3   : > { %v1503_v59 = vmul.f32 %v1499_v33, %v2333_v58 }
 0x9a5   : > { %v1505_v60 = vadd.f32 1e-05, %v1503_v59 }
 0x9a7   : > { %1957 = vrsqrt.f32 %v1505_v60  ;;  %vm1513_vm7 = vweird.f32 %v1505_v60 }
 0x9aa   : > { %v1502_v61 = vpop.xlane.xlu1 %1501 }
 0x9ab   : > { %v1504_v51 = vmul.f32 %v1502_v61, %v2333_v58 }
 0x9ad   : > { %v1958_v62 = vpop.eup %1957  ;;  %v1506_v63 = vadd.f32 1e-05, %v1504_v51 }
 0x9ae   : > { %v1508_v0 = vmul.f32 %v1958_v62, %v1505_v60  ;;  %vm1514_vm6 = vweird.f32 %v1958_v62 }
 0x9af   : > { %1959 = vrsqrt.f32 %v1506_v63  ;;  %vm1515_vm8 = vmor %vm1513_vm7, %vm1514_vm6  ;;  %vm1523_vm10 = vweird.f32 %v1506_v63 }
 0x9b0   : > { %v1509_v1 = vmul.f32 %v1958_v62, %v1508_v0 }
 0x9b2   : > { %v1510_v2 = vmul.f32 0.5, %v1509_v1 }
 0x9b4   : > { %v1511_v3 = vsub.f32 1.5, %v1510_v2 }
 0x9b5   : > { %v1960_v4 = vpop.eup %1959 }
 0x9b6   : > { %v1512_v5 = vmul.f32 %v1958_v62, %v1511_v3  ;;  %v1518_v6 = vmul.f32 %v1960_v4, %v1506_v63  ;;  %vm1524_vm9 = vweird.f32 %v1960_v4 }
 0x9b7   : > { %vm1525_vm11 = vmor %vm1523_vm10, %vm1524_vm9 }
 0x9b8   : > { %v1516_v58 = vsel %vm1515_vm8, %v1958_v62, %v1512_v5  ;;  %v1519_v8 = vmul.f32 %v1960_v4, %v1518_v6 }
 0x9b9   : > { %v1527_v12 = vmul.f32 %v1516_v58, %v1493_v49 }
 0x9ba   : > { %v1520_v13 = vmul.f32 0.5, %v1519_v8 }
 0x9bb   : > { %v1532_v15 = vmul.f32 %v1929_v7, %v1527_v12 }
 0x9bc   : > { %v1521_v16 = vsub.f32 1.5, %v1520_v13 }
 0x9bd   : > { %v1537_v17 = vadd.f32 %v1930_v9, %v1532_v15 }
 0x9be   : > { %v1522_v18 = vmul.f32 %v1960_v4, %v1521_v16 }
 0x9bf   : > { %1539 = vst.msk [vmem:[%s515_s28] sm:$0xff] %vm682_vm1, %v1537_v17 }
 0x9c0   : > { %v1526_v19 = vsel %vm1525_vm11, %v1960_v4, %v1522_v18 }
 0x9c1   : > { %v1528_v14 = vmul.f32 %v1526_v19, %v1494_v56 }
 0x9c3   : > { %v1533_v20 = vmul.f32 %v1929_v7, %v1528_v14 }
 0x9c5   : > { %v1538_v22 = vadd.f32 %v1930_v9, %v1533_v20 }
 0x9c7   : > { %1540 = vst.msk [vmem:[%s515_s28 + $0x8] sm:$0xff] %vm682_vm1, %v1538_v22 }
 0x9c8   : > { %1988 = shalt.err (!%p1985_p3)
}
 0x9c9   : > { %s2027_s23 = smov 128   ;;  %s2028_s28 = smov 8  }
 0x9ca   : > { %1870 = dma.vmem_to_hbm [thread:$0]  (%p2152_p5), %s1555_s27, 256, %s1557_s30, %s1542_s25, %s2027_s23, %s2027_s23, %s2028_s28  }
 0x9cb PF: > { %p1876_p4 = scmp.ge.s32.totalorder %s2023_s24, 2  ;;  %s1571_s29 = sand.u32 1, %s2011_s21  }
 0x9cc   : > { %s1572_s18 = scalar_lea.sflag [#allocation3], %s1571_s29 }
 0x9cd   : > { %p1873_p7 = pnand %p1876_p4, %p2156_p6 }
 0x9cf   : > { %p1874_p8 = pneg %p1873_p7 }
 0x9d1   : > { %2006 = dma.done.wait (%p1874_p8), %s1572_s18, 256  }
 0x9d2   : > { %2008 = vsyncadd (%p1874_p8), %s1572_s18, 4294967040  ;;  %s2530_s24 = sld [smem:[#allocation6_spill]]  ;;  %s2533_s21 = smov %s2015_s22 }
 0x9d3   : > { %s2531_s17 = sld [smem:[#allocation5_spill]] }
 0x9d4   : > { %s2532_s23 = sld [smem:[#allocation7_spill]] }
 0x9d8   : > { %p26_p9 = scmp.ge.s32.totalorder %s2530_s24, 4  }
 0x9d9   : > { %s2534_s22 = smov %s2531_s17 }
 0x9da   :  { %28 = sbr.rel (!%p26_p9) target bundleno = 7 (0x7), region = 119 }
 0x9df   :  { %1578 = vsyncpa [#allocation3], 1 }
 0x9e0   :  { %1580 = vsyncpa [#allocation3 + $0x1], 1 }

// kernel: encoder_forward.2
= control target key start
LH: loop header
LB: loop body
LE: loop exit
PB: predicated region body
PF: predicated region fallthrough
CT: control target
= control target key end

     0   :  { %s2322_s21 = smov 0   ;;  %s2721_s0 = inlined_call_operand.vmem [shape: f32[4,18,128], index: 0, kind: input, shape index: {}]   ;;  %s2722_s1 = inlined_call_operand.vmem [shape: bf16[384,128], index: 1, kind: input, shape index: {}]   ;;  %s2723_s2 = inlined_call_operand.vmem [shape: bf16[128,32], index: 2, kind: input, shape index: {}]   ;;  %s2724_s3 = inlined_call_operand.vmem [shape: bf16[32,96], index: 3, kind: input, shape index: {}]   ;;  %s2725_s4 = inlined_call_operand.vmem [shape: bf16[32,32], index: 4, kind: input, shape index: {}]   ;;  %s2726_s5 = inlined_call_operand.vmem [shape: f32[1,32], index: 5, kind: input, shape index: {}]   ;;  %s2727_s6 = inlined_call_operand.vmem [shape: bf16[32,32], index: 6, kind: input, shape index: {}]   ;;  %s2728_s7 = inlined_call_operand.vmem [shape: f32[1,32], index: 7, kind: input, shape index: {}]   ;;  %s2729_s8 = inlined_call_operand.vmem [shape: bf16[96,32], index: 8, kind: input, shape index: {}]   ;;  %s2730_s9 = inlined_call_operand.vmem [shape: f32[1,32], index: 9, kind: input, shape index: {}]   ;;  %s2731_s10 = inlined_call_operand.vmem [shape: bf16[32,32], index: 10, kind: input, shape index: {}]   ;;  %s2732_s11 = inlined_call_operand.vmem [shape: f32[1,32], index: 11, kind: input, shape index: {}]   ;;  %s2733_s12 = inlined_call_operand.vmem [shape: f32[1,32], index: 12, kind: input, shape index: {}]   ;;  %s2734_s13 = inlined_call_operand.vmem [shape: f32[1,32], index: 13, kind: input, shape index: {}]   ;;  %s2735_s14 = inlined_call_operand.vmem [shape: f32[1,32], index: 14, kind: input, shape index: {}]   ;;  %s2736_s15 = inlined_call_operand.vmem [shape: f32[1,32], index: 15, kind: input, shape index: {}]   ;;  %s2737_s16 = inlined_call_operand.vmem [shape: f32[4,16,32], index: 16, kind: output, shape index: {}]  }
   0x1   :  { %2738 = sst [smem:[#allocation2_spill]] %s2721_s0 }
   0x2 LB: > { %s1881_s22 = sadd.s32 4294967295, %s2231_s21   ;;  %p1885_p0 = scmp.ge.s32.totalorder %s2231_s21, 1  ;;  %s2231_s21 = sphi %s2322_s21, %s26_s21  }
   0x3   : > { %p464_p1 = scmp.lt.s32.totalorder %s2231_s21, 3 }
   0x5   : > { %p465_p2 = pnand %p1885_p0, %p464_p1 }
   0x6   : > { %s1886_s29 = sshll.u32 (!%p465_p2), %s1881_s22, 1  ;;  %s2739_s17 = sld [smem:[#allocation2_spill]] (!%p465_p2) }
   0x7   : > { %468 = sbr.rel (%p465_p2) target bundleno = 2438 (0x986), region = 84  ;;  %p517_p3 = scmp.lt.s32.totalorder (!%p465_p2), %s1886_s29, 3 }
   0x8   : > { %s2233_s19 = smov (!%p465_p2), 96   ;;  %s2234_s20 = smov (!%p465_p2), 64  }
   0xc   : > { %v2103_v0 = vld [vmem:[%s2722_s1 + $0x38] sm:$0xff]  ;;  %v2102_v3 = vld [vmem:[%s2722_s1 + $0x30] sm:$0xff]  ;;  %s2741_s29 = smov (!%p517_p3, %s1886_s29), 3  ;;  %v2101_v6 = vld [vmem:[%s2722_s1 + $0x28] sm:$0xff]  ;;  %vm561_vm0 = vsmask.f32 7424 }
   0xd   : > { %v2111_v1 = vld [vmem:[%s2722_s1 + $0x78] sm:$0xff]  ;;  %789 = vmatpush.bf16.msra.mxu0 %v2103_v0  ;;  %v2110_v4 = vld [vmem:[%s2722_s1 + $0x70] sm:$0xff]  ;;  %s2142_s22 = smul.u32 24, %s2741_s29  ;;  %v2109_v7 = vld [vmem:[%s2722_s1 + $0x68] sm:$0xff]  ;;  %vm588_vm1 = vcmask 1046528   ;;  %vm949_vm2 = vcmask 261120  }
   0xe   : > { %v2119_v2 = vld [vmem:[%s2722_s1 + $0xb8] sm:$0xff]  ;;  %808 = vmatpush.bf16.msra.mxu1 %v2111_v1  ;;  %v2118_v5 = vld [vmem:[%s2722_s1 + $0xb0] sm:$0xff]  ;;  %v2117_v8 = vld [vmem:[%s2722_s1 + $0xa8] sm:$0xff]  ;;  %vm1037_vm3 = vcmask 130048   ;;  %s2095_s24 = sshll.u32 %s2741_s29, 4 }
   0xf   : > { %827 = vmatpush.bf16.msra.mxu2 %v2119_v2  ;;  %s2363_s18 = scalar_lea.vmem %s2739_s17, %s2142_s22  ;;  %v2100_v12 = vld [vmem:[%s2722_s1 + $0x20] sm:$0xff]  ;;  %v2099_v20 = vld [vmem:[%s2722_s1 + $0x18] sm:$0xff]  ;;  %v2098_v25 = vld [vmem:[%s2722_s1 + $0x10] sm:$0xff]  ;;  %s2236_s22 = smov 32  }
  0x10   : > { %v531_v9 = vld [vmem:[%s2363_s18] sm:$0xff]  ;;  %v532_v10 = vld [vmem:[%s2363_s18 + $0x8] sm:$0xff]  ;;  %v533_v11 = vld [vmem:[%s2363_s18 + $0x10] sm:$0x3]  ;;  %s2704_s28 = scalar_lea.vmem %s2737_s16, %s2095_s24 }
  0x11   : > { %790 = vmatpush.bf16.msra.mxu0 %v2102_v3  ;;  %v2108_v13 = vld [vmem:[%s2722_s1 + $0x60] sm:$0xff]  ;;  %v537_v15 = vpack.c.bf16 %v531_v9, %v531_v9  ;;  %v538_v16 = vpack.c.bf16 %v532_v10, %v532_v10  ;;  %v539_v17 = vpack.c.bf16 %v533_v11, %v533_v11  ;;  %v2107_v21 = vld [vmem:[%s2722_s1 + $0x58] sm:$0xff]  ;;  %v2106_v26 = vld [vmem:[%s2722_s1 + $0x50] sm:$0xff] }
  0x12   : > { %809 = vmatpush.bf16.msra.mxu1 %v2110_v4  ;;  %v2116_v14 = vld [vmem:[%s2722_s1 + $0xa0] sm:$0xff]  ;;  %v2115_v24 = vld [vmem:[%s2722_s1 + $0x98] sm:$0xff]  ;;  %v2114_v31 = vld [vmem:[%s2722_s1 + $0x90] sm:$0xff] }
  0x13   : > { %828 = vmatpush.bf16.msra.mxu2 %v2118_v5  ;;  %v547_v18 = vunpack.c.l.b16 %v537_v15  ;;  %v548_v19 = vunpack.c.l.b16 %v538_v16  ;;  %v557_v23 = vunpack.c.l.b16 %v539_v17  ;;  %v534_v29 = vld [vmem:[%s2363_s18 + $0x18] sm:$0xff]  ;;  %v535_v32 = vld [vmem:[%s2363_s18 + $0x20] sm:$0xff]  ;;  %v2126_v33 = vld [vmem:[%s2723_s2 + $0x30] sm:$0xff] }
  0x14   : > { %v2127_v30 = vld [vmem:[%s2723_s2 + $0x38] sm:$0xff]  ;;  %v2097_v34 = vld [vmem:[%s2722_s1 + $0x8] sm:$0xff]  ;;  %v540_v35 = vpack.c.bf16 %v534_v29, %v534_v29  ;;  %v541_v40 = vpack.c.bf16 %v535_v32, %v535_v32  ;;  %v2096_v45 = vld [vmem:[%s2722_s1] sm:$0xff] }
  0x15   : > { %791 = vmatpush.bf16.msra.mxu0 %v2101_v6  ;;  %v551_v22 = vpack.c.b16 %v548_v19, %v547_v18  ;;  %v559_v27 = vpack.c.b16 %v557_v23, %v557_v23  ;;  %912 = vmatpush.bf16.msra.mxu3 %v2127_v30  ;;  %v2105_v36 = vld [vmem:[%s2722_s1 + $0x48] sm:$0xff]  ;;  %v2104_v46 = vld [vmem:[%s2722_s1 + $0x40] sm:$0xff]  ;;  %v2123_v6 = vld [vmem:[%s2723_s2 + $0x18] sm:$0xff] }
  0x16   : > { %810 = vmatpush.bf16.msra.mxu1 %v2109_v7  ;;  %v536_v41 = vld [vmem:[%s2363_s18 + $0x28] sm:$0x3]  ;;  %v549_v49 = vunpack.c.l.b16 %v540_v35  ;;  %v550_v50 = vunpack.c.l.b16 %v541_v40  ;;  %v2112_v51 = vld [vmem:[%s2722_s1 + $0x80] sm:$0xff]  ;;  %v2122_v7 = vld [vmem:[%s2723_s2 + $0x10] sm:$0xff] }
  0x17   : > { %829 = vmatpush.bf16.msra.mxu2 %v2117_v8  ;;  %v565_v28 = vshll.u32 %v551_v22, 16  ;;  %v563_v37 = vshrl.u32 %v551_v22, 16  ;;  %v570_v39 = vshll.u32 %v559_v27, 16  ;;  %v2113_v42 = vld [vmem:[%s2722_s1 + $0x88] sm:$0xff]  ;;  %v542_v44 = vpack.c.bf16 %v536_v41, %v536_v41  ;;  %v2124_v5 = vld [vmem:[%s2723_s2 + $0x20] sm:$0xff] }
  0x18   : > { %v2125_v43 = vld [vmem:[%s2723_s2 + $0x28] sm:$0xff]  ;;  %v589_v52 = vrot.slane %v551_v22, 1  ;;  %v590_v53 = vrot.slane %v559_v27, 1  ;;  %v552_v55 = vpack.c.b16 %v550_v50, %v549_v49  ;;  %v2120_v9 = vld [vmem:[%s2723_s2] sm:$0xff] }
  0x19   : > { %792 = vmatpush.bf16.msra.mxu0 %v2100_v12  ;;  %v567_v38 = vrot.slane %v565_v28, 1  ;;  %913 = vmatpush.bf16.msra.mxu3 %v2126_v33  ;;  %v572_v48 = vrot.slane %v570_v39, 1  ;;  %v558_v56 = vunpack.c.l.b16 %v542_v44  ;;  %v2121_v8 = vld [vmem:[%s2723_s2 + $0x8] sm:$0xff]  ;;  %v2128_v33 = vld [vmem:[%s2724_s3] sm:$0xff] }
  0x1a   : > { %811 = vmatpush.bf16.msra.mxu1 %v2108_v13  ;;  %v591_v57 = vsel %vm588_vm1, %v589_v52, %v590_v53  ;;  %v577_v59 = vshll.u32 %v552_v55, 16  ;;  %v575_v60 = vshrl.u32 %v552_v55, 16  ;;  %v592_v1 = vrot.slane %v552_v55, 1  ;;  %v2129_v32 = vld [vmem:[%s2724_s3 + $0x8] sm:$0xff] }
  0x1b   : > { %830 = vmatpush.bf16.msra.mxu2 %v2116_v14  ;;  %v568_v47 = vor.u32 %v567_v38, %v563_v37  ;;  %v560_v58 = vpack.c.b16 %v558_v56, %v558_v56 }
  0x1c   : > { %v579_v61 = vrot.slane %v577_v59, 1 }
  0x1d   : > { %793 = vmatpush.bf16.msra.mxu0 %v2099_v20  ;;  %914 = vmatpush.bf16.msra.mxu3 %v2125_v43  ;;  %v573_v54 = vsel %vm561_vm0, %v568_v47, %v572_v48  ;;  %v582_v62 = vshll.u32 %v560_v58, 16  ;;  %v593_v2 = vrot.slane %v560_v58, 1 }
  0x1e   : > { %812 = vmatpush.bf16.msra.mxu1 %v2107_v21  ;;  %v580_v63 = vor.u32 %v579_v61, %v575_v60 }
  0x1f   : > { %831 = vmatpush.bf16.msra.mxu2 %v2115_v24  ;;  %v584_v0 = vrot.slane %v582_v62, 1  ;;  %v594_v4 = vsel %vm588_vm1, %v592_v1, %v593_v2 }
  0x21   : > { %794 = vmatpush.bf16.msra.mxu0 %v2098_v25  ;;  %v585_v3 = vsel %vm561_vm0, %v580_v63, %v584_v0  ;;  %915 = vmatpush.bf16.msra.mxu3 %v2124_v5 }
  0x22   : > { %813 = vmatpush.bf16.msra.mxu1 %v2106_v26 }
  0x23   : > { %832 = vmatpush.bf16.msra.mxu2 %v2114_v31 }
  0x25   : > { %795 = vmatpush.bf16.msra.mxu0 %v2097_v34  ;;  %916 = vmatpush.bf16.msra.mxu3 %v2123_v6 }
  0x26   : > { %814 = vmatpush.bf16.msra.mxu1 %v2105_v36 }
  0x27   : > { %833 = vmatpush.bf16.msra.mxu2 %v2113_v42 }
  0x29   : > { %796 = vmatpush.bf16.msra.mxu0 %v2096_v45  ;;  %917 = vmatpush.bf16.msra.mxu3 %v2122_v7 }
  0x2a   : > { %815 = vmatpush.bf16.msra.mxu1 %v2104_v46 }
  0x2b   : > { %834 = vmatpush.bf16.msra.mxu2 %v2112_v51 }
  0x2c   : > { %797 = vmatmul.bf16.vlgmr.msra.gmra.mxu0 %v551_v22 }
  0x2d   : > { %816 = vmatmul.bf16.vlgmr.msra.gmra.mxu1 %v573_v54  ;;  %918 = vmatpush.bf16.msra.mxu3 %v2121_v8 }
  0x2e   : > { %835 = vmatmul.bf16.vlgmr.msra.gmra.mxu2 %v591_v57  ;;  %962 = vmatpush.bf16.msrb.mxu0 %v2129_v32 }
  0x31   : > { %919 = vmatpush.bf16.msra.mxu3 %v2120_v9 }
  0x32   : > { %963 = vmatpush.bf16.msrb.mxu0 %v2128_v33 }
  0x3c   : > { %802 = vmatmul.bf16.gmra.mxu0 %v552_v55 }
  0x3d   : > { %821 = vmatmul.bf16.gmra.mxu1 %v585_v3 }
  0x3e   : > { %840 = vmatmul.bf16.gmra.mxu2 %v594_v4 }
  0xa9   : > { %v798_v10 = vpop.f32.mrf.mxu0 }
  0xaa   : > { %v817_v11 = vpop.f32.mrf.mxu1 }
  0xab   : > { %v818_v15 = vadd.f32 %v817_v11, %v798_v10 }
  0xb1   : > { %v836_v12 = vpop.f32.mrf.mxu2  ;;  %v800_v13 = vpop.f32.mrf.mxu0 }
  0xb2   : > { %v819_v14 = vpop.f32.mrf.mxu1  ;;  %v837_v18 = vadd.f32 %v836_v12, %v818_v15 }
  0xb3   : > { %v820_v16 = vadd.f32 %v819_v14, %v800_v13 }
  0xb9   : > { %v838_v17 = vpop.f32.mrf.mxu2  ;;  %v803_v20 = vpop.f32.mrf.mxu0 }
  0xba   : > { %v839_v19 = vadd.f32 %v838_v17, %v820_v16  ;;  %v822_v21 = vpop.f32.mrf.mxu1 }
  0xbb   : > { %v823_v26 = vadd.f32 %v822_v21, %v803_v20 }
  0xbc   : > { %v846_v22 = vpack.c.bf16 %v839_v19, %v837_v18 }
  0xbe   : > { %920 = vmatmul.bf16.vlgmr.msra.gmra.mxu3 %v846_v22 }
  0xc1   : > { %v841_v23 = vpop.f32.mrf.mxu2  ;;  %v805_v24 = vpop.f32.mrf.mxu0 }
  0xc2   : > { %v824_v25 = vpop.f32.mrf.mxu1  ;;  %v842_v29 = vadd.f32 %v841_v23, %v823_v26 }
  0xc3   : > { %v825_v27 = vadd.f32 %v824_v25, %v805_v24 }
  0xc9   : > { %v843_v28 = vpop.f32.mrf.mxu2 }
  0xca   : > { %v844_v30 = vadd.f32 %v843_v28, %v825_v27 }
  0xcc   : > { %v847_v31 = vpack.c.bf16 %v844_v30, %v842_v29 }
  0xce   : > { %925 = vmatmul.bf16.gmra.mxu3 %v847_v31 }
 0x141   : > { %v2450_v34 = vpop.f32.mrf.mxu3 }
 0x149   : > { %v2452_v35 = vpop.f32.mrf.mxu3 }
 0x14a   : > { %v931_v36 = vpack.c.bf16 %v2452_v35, %v2450_v34 }
 0x14c   : > { %2027 = vmatmul.msk.bf16.vlgmr.msrb.gmra.mxu0 %vm949_vm2, %v931_v36 }
 0x151   : > { %v2457_v37 = vpop.f32.mrf.mxu3 }
 0x159   : > { %v2459_v38 = vpop.f32.mrf.mxu3 }
 0x15a   : > { %v932_v39 = vpack.c.bf16 %v2459_v38, %v2457_v37 }
 0x15c   : > { %2028 = vmatmul.msk.bf16.gmra.mxu0 %vm949_vm2, %v932_v39 }
 0x1c9   : > { %v965_v40 = vpop.f32.mrf.mxu0 }
 0x1ca   : > { %v975_v41 = vpack.c.bf16 %v965_v40, %v965_v40 }
 0x1cc   : > { %v981_v44 = vunpack.c.l.b16 %v975_v41 }
 0x1d1   : > { %v967_v42 = vpop.f32.mrf.mxu0 }
 0x1d2   : > { %v976_v43 = vpack.c.bf16 %v967_v42, %v967_v42 }
 0x1d4   : > { %v982_v45 = vunpack.c.l.b16 %v976_v43 }
 0x1d6   : > { %v983_v46 = vpack.c.b16 %v982_v45, %v981_v44 }
 0x1d8   : > { %984 = vrot.lane.b32.xlu0 %v983_v46, %s2233_s19 }
 0x1d9   : > { %v970_v47 = vpop.f32.mrf.mxu0 }
 0x1da   : > { %v977_v48 = vpack.c.bf16 %v970_v47, %v970_v47 }
 0x1dc   : > { %v1008_v51 = vunpack.c.l.b16 %v977_v48 }
 0x1e1   : > { %v972_v49 = vpop.f32.mrf.mxu0 }
 0x1e2   : > { %v978_v50 = vpack.c.bf16 %v972_v49, %v972_v49 }
 0x1e4   : > { %v1009_v52 = vunpack.c.l.b16 %v978_v50 }
 0x1e6   : > { %v1010_v53 = vpack.c.b16 %v1009_v52, %v1008_v51 }
 0x1e8   : > { %1011 = vrot.lane.b32.xlu0 %v1010_v53, %s2233_s19 }
 0x24a   : > { %v985_v54 = vpop.permute.xlu0 %984 }
 0x24b   : > { %v990_v55 = vsel %vm949_vm2, %v985_v54, 0  ;;  %v2131_v54 = vld [vmem:[%s2725_s4 + $0x8] sm:$0xff] }
 0x24c   : > { %999 = vmatpush.bf16.xpose.msrb.mxu1 %v990_v55  ;;  %v2130_v55 = vld [vmem:[%s2725_s4] sm:$0xff] }
 0x253   : > { %2029 = vmatmul.msk.bf16.vlgmr.msrb.gmra.mxu1 %vm949_vm2, %v983_v46 }
 0x25a   : > { %v1012_v56 = vpop.permute.xlu0 %1011 }
 0x25b   : > { %v1017_v57 = vsel %vm949_vm2, %v1012_v56, 0 }
 0x25c   : > { %1026 = vmatpush.bf16.xpose.msrb.mxu2 %v1017_v57 }
 0x263   : > { %2030 = vmatmul.msk.bf16.vlgmr.msrb.gmra.mxu2 %vm949_vm2, %v1010_v53 }
 0x264   : > { %1170 = vmatpush.bf16.msra.mxu2 %v2131_v54 }
 0x268   : > { %1171 = vmatpush.bf16.msra.mxu2 %v2130_v55 }
 0x2d0   : > { %v1001_v58 = vpop.f32.mrf.mxu1 }
 0x2d1   : > { %v1033_v59 = vmul.f32 0.17677669, %v1001_v58 }
 0x2d3   : > { %v1038_v60 = vsel %vm1037_vm3, %v1033_v59, -inf }
 0x2d4   : > { %1039 = vmax.xlane.f32.xlu1 %v1038_v60 }
 0x2d8   : > { %v1003_v61 = vpop.f32.mrf.mxu1 }
 0x2d9   : > { %v1034_v62 = vmul.f32 0.17677669, %v1003_v61 }
 0x2db   : > { %v1041_v63 = vsel %vm1037_vm3, %v1034_v62, -inf }
 0x2dc   : > { %1042 = vmax.xlane.f32.xlu1 %v1041_v63 }
 0x2e6   : > { %v1028_v0 = vpop.f32.mrf.mxu2 }
 0x2e7   : > { %v1035_v1 = vmul.f32 0.17677669, %v1028_v0 }
 0x2e9   : > { %v1044_v2 = vsel %vm1037_vm3, %v1035_v1, -inf }
 0x2ea   : > { %1045 = vmax.xlane.f32.xlu2 %v1044_v2 }
 0x2ee   : > { %v1030_v3 = vpop.f32.mrf.mxu2 }
 0x2ef   : > { %v1036_v4 = vmul.f32 0.17677669, %v1030_v3 }
 0x2f1   : > { %v1047_v5 = vsel %vm1037_vm3, %v1036_v4, -inf }
 0x2f2   : > { %1048 = vmax.xlane.f32.xlu2 %v1047_v5 }
 0x30a   : > { %1091 = vrot.lane.b32.xlu2 %v983_v46, %s2234_s20 }
 0x347   : > { %v1040_v6 = vpop.xlane.xlu1 %1039 }
 0x348   : > { %v1050_v7 = vsub.f32 %v1033_v59, %v1040_v6 }
 0x34a   : > { %v1054_v8 = vmul.f32 1.442695, %v1050_v7 }
 0x34c   : > { %2183 = vpow2.f32 %v1054_v8 }
 0x34f   : > { %v1043_v9 = vpop.xlane.xlu1 %1042 }
 0x350   : > { %v1051_v10 = vsub.f32 %v1034_v62, %v1043_v9  ;;  %v2175_v62 = vld [vmem:[%s2726_s5] ss:$0 sm:$0xff] }
 0x352   : > { %v2184_v11 = vpop.eup %2183  ;;  %v1056_v12 = vmul.f32 1.442695, %v1051_v10 }
 0x353   : > { %v1062_v13 = vsel %vm1037_vm3, %v2184_v11, 0.0 }
 0x354   : > { %2185 = vpow2.f32 %v1056_v12  ;;  %1063 = vadd.xlane.f32.xlu0 %v1062_v13 }
 0x35a   : > { %v2186_v14 = vpop.eup %2185 }
 0x35b   : > { %v1065_v15 = vsel %vm1037_vm3, %v2186_v14, 0.0 }
 0x35c   : > { %1066 = vadd.xlane.f32.xlu1 %v1065_v15 }
 0x35d   : > { %v1046_v16 = vpop.xlane.xlu2 %1045 }
 0x35e   : > { %v1052_v17 = vsub.f32 %v1035_v1, %v1046_v16 }
 0x360   : > { %v1058_v18 = vmul.f32 1.442695, %v1052_v17 }
 0x362   : > { %2187 = vpow2.f32 %v1058_v18 }
 0x365   : > { %v1049_v19 = vpop.xlane.xlu2 %1048 }
 0x366   : > { %v1053_v20 = vsub.f32 %v1036_v4, %v1049_v19 }
 0x368   : > { %v2188_v21 = vpop.eup %2187  ;;  %v1060_v22 = vmul.f32 1.442695, %v1053_v20 }
 0x369   : > { %v1068_v23 = vsel %vm1037_vm3, %v2188_v21, 0.0 }
 0x36a   : > { %2189 = vpow2.f32 %v1060_v22  ;;  %1069 = vadd.xlane.f32.xlu1 %v1068_v23 }
 0x36d   : > { %v1092_v24 = vpop.permute.xlu2 %1091 }
 0x36e   : > { %1104 = vmatpush.bf16.msrb.mxu3 %v1092_v24 }
 0x370   : > { %v2190_v25 = vpop.eup %2189 }
 0x371   : > { %v1071_v26 = vsel %vm1037_vm3, %v2190_v25, 0.0 }
 0x372   : > { %1072 = vadd.xlane.f32.xlu1 %v1071_v26 }
 0x38b   : > { %1116 = vrot.lane.b32.xlu1 %v1010_v53, %s2234_s20 }
 0x3c7   : > { %v1064_v27 = vpop.xlane.xlu0 %1063 }
 0x3c8   : > { %2191 = vrcp.f32 %v1064_v27 }
 0x3ce   : > { %v2192_v29 = vpop.eup %2191 }
 0x3cf   : > { %v1067_v28 = vpop.xlane.xlu1 %1066  ;;  %v1078_v30 = vmul.f32 %v2192_v29, %v2184_v11 }
 0x3d0   : > { %2193 = vrcp.f32 %v1067_v28 }
 0x3d1   : > { %v1082_v32 = vpack.c.bf16 %v1078_v30, %v1078_v30 }
 0x3d3   : > { %v1088_v39 = vunpack.c.l.b16 %v1082_v32 }
 0x3d6   : > { %v2194_v31 = vpop.eup %2193 }
 0x3d7   : > { %v1079_v33 = vmul.f32 %v2194_v31, %v2186_v14  ;;  %v2235_v14 = vmov 32.0  }
 0x3d9   : > { %v1083_v36 = vpack.c.bf16 %v1079_v33, %v1079_v33 }
 0x3db   : > { %v1089_v40 = vunpack.c.l.b16 %v1083_v36 }
 0x3dd   : > { %v1070_v41 = vpop.xlane.xlu1 %1069  ;;  %v1090_v42 = vpack.c.b16 %v1089_v40, %v1088_v39 }
 0x3df   : > { %2031 = vmatmul.msk.bf16.vlgmr.msrb.gmra.mxu3 %vm1037_vm3, %v1090_v42  ;;  %v2133_v42 = vld [vmem:[%s2727_s6 + $0x8] sm:$0xff] }
 0x3e0   : > { %1332 = vmatpush.bf16.msra.mxu3 %v2133_v42 }
 0x3e5   : > { %v1073_v43 = vpop.xlane.xlu1 %1072 }
 0x3e6   : > { %2195 = vrcp.f32 %v1073_v43 }
 0x3e7   : > { %2197 = vrcp.f32 %v1070_v41 }
 0x3e8   : > { %2199 = vrcp.f32 %v2235_v14 }
 0x3ec   : > { %v2196_v44 = vpop.eup %2195 }
 0x3ed   : > { %v2198_v45 = vpop.eup %2197  ;;  %v1081_v46 = vmul.f32 %v2196_v44, %v2190_v25 }
 0x3ee   : > { %v1080_v47 = vmul.f32 %v2198_v45, %v2188_v21  ;;  %v2132_v45 = vld [vmem:[%s2727_s6] sm:$0xff] }
 0x3ef   : > { %v1085_v48 = vpack.c.bf16 %v1081_v46, %v1081_v46  ;;  %1333 = vmatpush.bf16.msra.mxu3 %v2132_v45 }
 0x3f0   : > { %v1084_v49 = vpack.c.bf16 %v1080_v47, %v1080_v47 }
 0x3f1   : > { %v1114_v50 = vunpack.c.l.b16 %v1085_v48 }
 0x3f2   : > { %v1113_v51 = vunpack.c.l.b16 %v1084_v49 }
 0x3f4   : > { %v1115_v53 = vpack.c.b16 %v1114_v50, %v1113_v51 }
 0x3fd   : > { %v1117_v52 = vpop.permute.xlu1 %1116 }
 0x3fe   : > { %1129 = vmatpush.bf16.msra.mxu1 %v1117_v52 }
 0x401   : > { %2032 = vmatmul.msk.bf16.vlgmr.msra.gmra.mxu1 %vm1037_vm3, %v1115_v53  ;;  %vm1349_vm3 = vcmask 1040384  }
 0x462   : > { %v1106_v56 = vpop.f32.mrf.mxu3 }
 0x46a   : > { %v1108_v57 = vpop.f32.mrf.mxu3 }
 0x46b   : > { %v1136_v58 = vpack.c.bf16 %v1108_v57, %v1106_v56 }
 0x46d   : > { %2041 = vmatmul.msk.bf16.vlgmr.msra.gmra.mxu2 %vm949_vm2, %v1136_v58 }
 0x47e   : > { %v1131_v59 = vpop.f32.mrf.mxu1 }
 0x486   : > { %v1133_v60 = vpop.f32.mrf.mxu1 }
 0x487   : > { %v1137_v61 = vpack.c.bf16 %v1133_v60, %v1131_v59 }
 0x489   : > { %2042 = vmatmul.msk.bf16.gmra.mxu2 %vm949_vm2, %v1137_v61 }
 0x4f0   : > { %v1173_v63 = vpop.f32.mrf.mxu2 }
 0x4f1   : > { %v1174_v0 = vadd.f32 %v2175_v62, %v1173_v63 }
 0x4f3   : > { %v1183_v1 = vadd.f32 %v1174_v0, %v2450_v34 }
 0x4f5   : > { %v1189_v2 = vsel %vm949_vm2, %v1183_v1, 0.0 }
 0x4f6   : > { %1190 = vadd.xlane.f32.xlu2 %v1189_v2 }
 0x4f8   : > { %v1175_v3 = vpop.f32.mrf.mxu2 }
 0x4f9   : > { %v1176_v4 = vadd.f32 %v2175_v62, %v1175_v3 }
 0x4fb   : > { %v1184_v5 = vadd.f32 %v1176_v4, %v2452_v35  ;;  %v2200_v35 = vpop.eup %2199  ;;  %v2177_v4 = vld [vmem:[%s2734_s13] ss:$0 sm:$0xff] }
 0x4fc   : > { %v1202_v15 = vmul.f32 32.0, %v2200_v35  ;;  %vm1206_vm4 = vweird.f32 %v2200_v35 }
 0x4fd   : > { %v1192_v6 = vsel %vm949_vm2, %v1184_v5, 0.0 }
 0x4fe   : > { %1193 = vadd.xlane.f32.xlu0 %v1192_v6  ;;  %v1203_v16 = vsub.f32 1.0, %v1202_v15 }
 0x500   : > { %v1204_v17 = vmul.f32 %v2200_v35, %v1203_v16 }
 0x502   : > { %v1205_v18 = vadd.f32 %v2200_v35, %v1204_v17 }
 0x504   : > { %v2499_v19 = vsel %vm1206_vm4, %v2200_v35, %v1205_v18  ;;  %vm1462_vm4 = vcmask 785408  }
 0x50c   : > { %v1178_v7 = vpop.f32.mrf.mxu2 }
 0x50d   : > { %v1179_v8 = vadd.f32 %v2175_v62, %v1178_v7 }
 0x50f   : > { %v1185_v9 = vadd.f32 %v1179_v8, %v2457_v37 }
 0x511   : > { %v1195_v10 = vsel %vm949_vm2, %v1185_v9, 0.0 }
 0x512   : > { %1196 = vadd.xlane.f32.xlu1 %v1195_v10 }
 0x514   : > { %v1180_v11 = vpop.f32.mrf.mxu2 }
 0x515   : > { %v1181_v12 = vadd.f32 %v2175_v62, %v1180_v11  ;;  %v2176_v62 = vld [vmem:[%s2733_s12] ss:$0 sm:$0xff] }
 0x517   : > { %v1186_v34 = vadd.f32 %v1181_v12, %v2459_v38 }
 0x519   : > { %v1198_v13 = vsel %vm949_vm2, %v1186_v34, 0.0 }
 0x51a   : > { %1199 = vadd.xlane.f32.xlu0 %v1198_v13 }
 0x569   : > { %v1191_v37 = vpop.xlane.xlu2 %1190 }
 0x56a   : > { %v1208_v20 = vmul.f32 %v2499_v19, %v1191_v37 }
 0x56c   : > { %v1212_v21 = vsub.f32 %v1183_v1, %v1208_v20 }
 0x56e   : > { %v1216_v22 = vmul.f32 %v1212_v21, %v1212_v21 }
 0x570   : > { %v1220_v38 = vsel %vm949_vm2, %v1216_v22, 0.0 }
 0x571   : > { %v1194_v23 = vpop.xlane.xlu0 %1193  ;;  %1221 = vadd.xlane.f32.xlu0 %v1220_v38 }
 0x572   : > { %v1209_v24 = vmul.f32 %v2499_v19, %v1194_v23 }
 0x574   : > { %v1213_v25 = vsub.f32 %v1184_v5, %v1209_v24 }
 0x576   : > { %v1217_v26 = vmul.f32 %v1213_v25, %v1213_v25 }
 0x578   : > { %v1223_v27 = vsel %vm949_vm2, %v1217_v26, 0.0 }
 0x579   : > { %1224 = vadd.xlane.f32.xlu2 %v1223_v27 }
 0x585   : > { %v1197_v28 = vpop.xlane.xlu1 %1196 }
 0x586   : > { %v1210_v29 = vmul.f32 %v2499_v19, %v1197_v28 }
 0x588   : > { %v2506_v30 = vsub.f32 %v1185_v9, %v1210_v29 }
 0x58a   : > { %v1218_v31 = vmul.f32 %v2506_v30, %v2506_v30 }
 0x58c   : > { %v1226_v32 = vsel %vm949_vm2, %v1218_v31, 0.0 }
 0x58d   : > { %v1200_v33 = vpop.xlane.xlu0 %1199  ;;  %1227 = vadd.xlane.f32.xlu0 %v1226_v32 }
 0x58e   : > { %v1211_v36 = vmul.f32 %v2499_v19, %v1200_v33 }
 0x590   : > { %v2512_v39 = vsub.f32 %v1186_v34, %v1211_v36 }
 0x592   : > { %v1219_v40 = vmul.f32 %v2512_v39, %v2512_v39 }
 0x594   : > { %v1229_v41 = vsel %vm949_vm2, %v1219_v40, 0.0 }
 0x595   : > { %1230 = vadd.xlane.f32.xlu2 %v1229_v41 }
 0x5e4   : > { %v1222_v43 = vpop.xlane.xlu0 %1221 }
 0x5e5   : > { %v1232_v44 = vmul.f32 %v1222_v43, %v2499_v19 }
 0x5e7   : > { %v1236_v46 = vadd.f32 1e-05, %v1232_v44 }
 0x5e9   : > { %2201 = vrsqrt.f32 %v1236_v46  ;;  %vm1246_vm6 = vweird.f32 %v1236_v46 }
 0x5ec   : > { %v1225_v47 = vpop.xlane.xlu2 %1224 }
 0x5ed   : > { %v1233_v48 = vmul.f32 %v1225_v47, %v2499_v19 }
 0x5ef   : > { %v2202_v49 = vpop.eup %2201  ;;  %v1237_v50 = vadd.f32 1e-05, %v1233_v48 }
 0x5f0   : > { %v1241_v51 = vmul.f32 %v2202_v49, %v1236_v46  ;;  %vm1247_vm5 = vweird.f32 %v2202_v49 }
 0x5f1   : > { %2203 = vrsqrt.f32 %v1237_v50  ;;  %vm1248_vm7 = vmor %vm1246_vm6, %vm1247_vm5  ;;  %vm1256_vm9 = vweird.f32 %v1237_v50 }
 0x5f2   : > { %v1242_v52 = vmul.f32 %v2202_v49, %v1241_v51 }
 0x5f4   : > { %v1243_v53 = vmul.f32 0.5, %v1242_v52 }
 0x5f6   : > { %v1244_v54 = vsub.f32 1.5, %v1243_v53 }
 0x5f7   : > { %v2204_v55 = vpop.eup %2203 }
 0x5f8   : > { %v1245_v56 = vmul.f32 %v2202_v49, %v1244_v54  ;;  %v1251_v57 = vmul.f32 %v2204_v55, %v1237_v50  ;;  %vm1257_vm8 = vweird.f32 %v2204_v55 }
 0x5f9   : > { %vm1258_vm10 = vmor %vm1256_vm9, %vm1257_vm8 }
 0x5fa   : > { %v1252_v58 = vmul.f32 %v2204_v55, %v1251_v57  ;;  %v1249_v59 = vsel %vm1248_vm7, %v2202_v49, %v1245_v56 }
 0x5fb   : > { %v1280_v63 = vmul.f32 %v1249_v59, %v1212_v21 }
 0x5fc   : > { %v1253_v60 = vmul.f32 0.5, %v1252_v58 }
 0x5fd   : > { %v1287_v5 = vmul.f32 %v2176_v62, %v1280_v63 }
 0x5fe   : > { %v1254_v61 = vsub.f32 1.5, %v1253_v60 }
 0x5ff   : > { %v2532_v9 = vadd.f32 %v2177_v4, %v1287_v5  ;;  %v2134_v5 = vld [vmem:[%s2729_s8] sm:$0xff] }
 0x600   : > { %v1255_v0 = vmul.f32 %v2204_v55, %v1254_v61  ;;  %v1228_v1 = vpop.xlane.xlu0 %1227 }
 0x601   : > { %v1234_v2 = vmul.f32 %v1228_v1, %v2499_v19  ;;  %v2138_v1 = vld [vmem:[%s2729_s8 + $0x20] sm:$0xff] }
 0x602   : > { %v1259_v3 = vsel %vm1258_vm10, %v2204_v55, %v1255_v0  ;;  %v2139_v0 = vld [vmem:[%s2729_s8 + $0x28] sm:$0xff] }
 0x603   : > { %v1281_v6 = vmul.f32 %v1259_v3, %v1213_v25  ;;  %v1238_v7 = vadd.f32 1e-05, %v1234_v2  ;;  %1471 = vmatpush.bf16.msra.mxu0 %v2139_v0  ;;  %v2137_v2 = vld [vmem:[%s2729_s8 + $0x18] sm:$0xff]  ;;  %v2136_v3 = vld [vmem:[%s2729_s8 + $0x10] sm:$0xff] }
 0x605   : > { %v1288_v8 = vmul.f32 %v2176_v62, %v1281_v6  ;;  %2205 = vrsqrt.f32 %v1238_v7  ;;  %vm1266_vm12 = vweird.f32 %v1238_v7 }
 0x607   : > { %v2534_v10 = vadd.f32 %v2177_v4, %v1288_v8  ;;  %1472 = vmatpush.bf16.msra.mxu0 %v2138_v1 }
 0x608   : > { %v1231_v11 = vpop.xlane.xlu2 %1230 }
 0x609   : > { %v1235_v12 = vmul.f32 %v1231_v11, %v2499_v19  ;;  %v1298_v34 = vpack.c.bf16 %v2534_v10, %v2532_v9 }
 0x60b   : > { %v2206_v13 = vpop.eup %2205  ;;  %v1239_v14 = vadd.f32 1e-05, %v1235_v12  ;;  %2051 = vmatmul.msk.bf16.vlgmr.msra.gmra.mxu3 %vm949_vm2, %v1298_v34  ;;  %1473 = vmatpush.bf16.msra.mxu0 %v2137_v2 }
 0x60c   : > { %v1261_v35 = vmul.f32 %v2206_v13, %v1238_v7  ;;  %vm1267_vm11 = vweird.f32 %v2206_v13 }
 0x60d   : > { %2207 = vrsqrt.f32 %v1239_v14  ;;  %vm1268_vm13 = vmor %vm1266_vm12, %vm1267_vm11  ;;  %vm1276_vm15 = vweird.f32 %v1239_v14 }
 0x60e   : > { %v1262_v15 = vmul.f32 %v2206_v13, %v1261_v35 }
 0x60f   : > { %1474 = vmatpush.bf16.msra.mxu0 %v2136_v3 }
 0x610   : > { %v1263_v16 = vmul.f32 0.5, %v1262_v15 }
 0x612   : > { %v1264_v17 = vsub.f32 1.5, %v1263_v16 }
 0x613   : > { %v2208_v18 = vpop.eup %2207 }
 0x614   : > { %v1265_v37 = vmul.f32 %v2206_v13, %v1264_v17  ;;  %v1271_v20 = vmul.f32 %v2208_v18, %v1239_v14  ;;  %vm1277_vm14 = vweird.f32 %v2208_v18 }
 0x615   : > { %vm1278_vm0 = vmor %vm1276_vm15, %vm1277_vm14 }
 0x616   : > { %v1272_v21 = vmul.f32 %v2208_v18, %v1271_v20  ;;  %v1269_v22 = vsel %vm1268_vm13, %v2206_v13, %v1265_v37 }
 0x617   : > { %v1282_v24 = vmul.f32 %v1269_v22, %v2506_v30  ;;  %v2178_v30 = vld [vmem:[%s2728_s7] ss:$0 sm:$0xff] }
 0x618   : > { %v1273_v38 = vmul.f32 0.5, %v1272_v21 }
 0x619   : > { %v1289_v28 = vmul.f32 %v2176_v62, %v1282_v24 }
 0x61a   : > { %v1274_v23 = vsub.f32 1.5, %v1273_v38 }
 0x61b   : > { %v2542_v31 = vadd.f32 %v2177_v4, %v1289_v28 }
 0x61c   : > { %v1275_v25 = vmul.f32 %v2208_v18, %v1274_v23 }
 0x61e   : > { %v1279_v26 = vsel %vm1278_vm0, %v2208_v18, %v1275_v25 }
 0x61f   : > { %v1283_v27 = vmul.f32 %v1279_v26, %v2512_v39 }
 0x621   : > { %v1290_v29 = vmul.f32 %v2176_v62, %v1283_v27 }
 0x623   : > { %v2544_v32 = vadd.f32 %v2177_v4, %v1290_v29  ;;  %v2135_v4 = vld [vmem:[%s2729_s8 + $0x8] sm:$0xff]  ;;  %v2591_v29 = vld [vmem:[%s2730_s9] ss:$0 sm:$0xff] }
 0x624   : > { %1475 = vmatpush.bf16.msra.mxu0 %v2135_v4 }
 0x625   : > { %v1299_v33 = vpack.c.bf16 %v2544_v32, %v2542_v31 }
 0x627   : > { %2052 = vmatmul.msk.bf16.gmra.mxu3 %vm949_vm2, %v1299_v33 }
 0x628   : > { %1476 = vmatpush.bf16.msra.mxu0 %v2134_v5  ;;  %v2141_v5 = vld [vmem:[%s2731_s10 + $0x8] sm:$0xff] }
 0x629   : > { %1698 = vmatpush.bf16.msrb.mxu1 %v2141_v5 }
 0x68e   : > { %v1335_v36 = vpop.f32.mrf.mxu3 }
 0x68f   : > { %v1336_v40 = vadd.f32 %v2178_v30, %v1335_v36 }
 0x691   : > { %v1350_v39 = vrot.slane %v1336_v40, 7  ;;  %v1363_v43 = vrot.slane %v1336_v40, 1 }
 0x693   : > { %v1360_v12 = vsel %vm1349_vm3, 0.0, %v1350_v39 }
 0x696   : > { %v1337_v41 = vpop.f32.mrf.mxu3 }
 0x697   : > { %v1338_v42 = vadd.f32 %v2178_v30, %v1337_v41 }
 0x699   : > { %v1351_v44 = vrot.slane %v1338_v42, 7  ;;  %v1364_v45 = vrot.slane %v1338_v42, 1  ;;  %v2155_v46 = vpack.i.bf16 %v1338_v42, %v1336_v40 }
 0x69b   : > { %2156 = vrot.lane.b32.xlu0 %v2155_v46, %s2236_s22  ;;  %v1365_v47 = vsel %vm588_vm1, %v1363_v43, %v1364_v45  ;;  %v1371_v48 = vsel %vm588_vm1, %v1364_v45, 0.0  ;;  %v1352_v49 = vsel %vm1349_vm3, %v1350_v39, %v1351_v44 }
 0x69c   : > { %v2160_v50 = vpack.i.bf16 %v1371_v48, %v1365_v47 }
 0x69e   : > { %2161 = vrot.lane.b32.xlu2 %v2160_v50, %s2234_s20 }
 0x6aa   : > { %v1340_v51 = vpop.f32.mrf.mxu3 }
 0x6ab   : > { %v1341_v52 = vadd.f32 %v2178_v30, %v1340_v51 }
 0x6ad   : > { %v1353_v55 = vrot.slane %v1341_v52, 7  ;;  %v1366_v56 = vrot.slane %v1341_v52, 1 }
 0x6af   : > { %v1361_v22 = vsel %vm1349_vm3, 0.0, %v1353_v55 }
 0x6b2   : > { %v1342_v53 = vpop.f32.mrf.mxu3 }
 0x6b3   : > { %v1343_v54 = vadd.f32 %v2178_v30, %v1342_v53 }
 0x6b5   : > { %v1354_v57 = vrot.slane %v1343_v54, 7  ;;  %v1367_v58 = vrot.slane %v1343_v54, 1  ;;  %v2165_v59 = vpack.i.bf16 %v1343_v54, %v1341_v52 }
 0x6b7   : > { %2166 = vrot.lane.b32.xlu1 %v2165_v59, %s2236_s22  ;;  %v1368_v60 = vsel %vm588_vm1, %v1366_v56, %v1367_v58  ;;  %v1372_v61 = vsel %vm588_vm1, %v1367_v58, 0.0  ;;  %v1355_v62 = vsel %vm1349_vm3, %v1353_v55, %v1354_v57  ;;  %vm1403_vm1 = vcmask 523264  }
 0x6b8   : > { %v2170_v63 = vpack.i.bf16 %v1372_v61, %v1368_v60 }
 0x6ba   : > { %2171 = vrot.lane.b32.xlu0 %v2170_v63, %s2234_s20 }
 0x6f8   : > { %v2162_v6 = vpop.permute.xlu2 %2161 }
 0x6f9   : > { %v2164_v34 = vunpack.i.h.bf16 %v2162_v6  ;;  %v2163_v13 = vunpack.i.l.bf16 %v2162_v6 }
 0x70d   : > { %v2157_v7 = vpop.permute.xlu0 %2156 }
 0x70e   : > { %v2159_v8 = vunpack.i.h.bf16 %v2157_v7  ;;  %v2158_v11 = vunpack.i.l.bf16 %v2157_v7 }
 0x710   : > { %v1399_v14 = vsel %vm949_vm2, %v1360_v12, %v2158_v11  ;;  %v1400_v35 = vsel %vm949_vm2, %v1352_v49, %v2159_v8 }
 0x711   : > { %v1404_v15 = vsel %vm1403_vm1, %v1399_v14, %v2163_v13  ;;  %v1405_v16 = vsel %vm1403_vm1, %v1400_v35, %v2164_v34  ;;  %v2140_v13 = vld [vmem:[%s2731_s10] sm:$0xff] }
 0x712   : > { %v1408_v17 = vpack.c.bf16 %v1405_v16, %v1404_v15  ;;  %1699 = vmatpush.bf16.msrb.mxu1 %v2140_v13 }
 0x714   : > { %2077 = vmatmul.msk.bf16.vlgmr.msra.gmra.mxu0 %vm1462_vm4, %v1408_v17 }
 0x729   : > { %v2167_v18 = vpop.permute.xlu1 %2166 }
 0x72a   : > { %v2169_v37 = vunpack.i.h.bf16 %v2167_v18  ;;  %v2168_v20 = vunpack.i.l.bf16 %v2167_v18 }
 0x72c   : > { %v2172_v21 = vpop.permute.xlu0 %2171  ;;  %v1401_v24 = vsel %vm949_vm2, %v1361_v22, %v2168_v20  ;;  %v1402_v25 = vsel %vm949_vm2, %v1355_v62, %v2169_v37 }
 0x72d   : > { %v2174_v38 = vunpack.i.h.bf16 %v2172_v21  ;;  %v2173_v23 = vunpack.i.l.bf16 %v2172_v21 }
 0x72f   : > { %v1406_v26 = vsel %vm1403_vm1, %v1401_v24, %v2173_v23  ;;  %v1407_v27 = vsel %vm1403_vm1, %v1402_v25, %v2174_v38 }
 0x730   : > { %v1409_v28 = vpack.c.bf16 %v1407_v27, %v1406_v26 }
 0x732   : > { %2078 = vmatmul.msk.bf16.gmra.mxu0 %vm1462_vm4, %v1409_v28 }
 0x791   : > { %v1478_v33 = vpop.f32.mrf.mxu0 }
 0x792   : > { %v2594_v36 = vadd.f32 %v2591_v29, %v1478_v33 }
 0x794   : > { %v2597_v30 = vmul.f32 0.70710677, %v2594_v36 }
 0x796   : > { %v1496_v40 = vmul.f32 %v2597_v30, %v2597_v30 }
 0x798   : > { %v1497_v41 = vmin.f32 %v1496_v40, 16.0 }
 0x799   : > { %v1480_v42 = vpop.f32.mrf.mxu0 }
 0x79a   : > { %v1498_v39 = vmul.f32 2.1237322e-06, %v1497_v41  ;;  %v1509_v43 = vmul.f32 3.8918573e-05, %v1497_v41  ;;  %v2602_v44 = vadd.f32 %v2591_v29, %v1480_v42 }
 0x79c   : > { %v1499_v45 = vadd.f32 0.00028619796, %v1498_v39  ;;  %v1510_v46 = vadd.f32 0.001143296, %v1509_v43  ;;  %v2605_v47 = vmul.f32 0.70710677, %v2602_v44 }
 0x79e   : > { %v1511_v48 = vmul.f32 %v1510_v46, %v1497_v41  ;;  %v1536_v49 = vmul.f32 %v2605_v47, %v2605_v47  ;;  %v1500_v50 = vmul.f32 %v1499_v45, %v1497_v41 }
 0x7a0   : > { %v1512_v51 = vadd.f32 0.014752088, %v1511_v48  ;;  %v1537_v52 = vmin.f32 %v1536_v49, 16.0  ;;  %v1501_v56 = vadd.f32 0.0036580483, %v1500_v50 }
 0x7a2   : > { %v1513_v53 = vmul.f32 %v1512_v51, %v1497_v41  ;;  %v1538_v54 = vmul.f32 2.1237322e-06, %v1537_v52  ;;  %v1549_v55 = vmul.f32 3.8918573e-05, %v1537_v52  ;;  %v1502_v63 = vmul.f32 %v1501_v56, %v1497_v41 }
 0x7a4   : > { %v1514_v57 = vadd.f32 0.112945676, %v1513_v53  ;;  %v1539_v58 = vadd.f32 0.00028619796, %v1538_v54  ;;  %v1550_v59 = vadd.f32 0.001143296, %v1549_v55 }
 0x7a5   : > { %v1503_v6 = vadd.f32 0.05243302, %v1502_v63 }
 0x7a6   : > { %v1515_v60 = vmul.f32 %v1514_v57, %v1497_v41  ;;  %v1540_v61 = vmul.f32 %v1539_v58, %v1537_v52  ;;  %v1551_v62 = vmul.f32 %v1550_v59, %v1537_v52 }
 0x7a7   : > { %v1504_v14 = vmul.f32 %v1503_v6, %v1497_v41 }
 0x7a8   : > { %v1516_v0 = vadd.f32 0.4994258, %v1515_v60  ;;  %v1541_v1 = vadd.f32 0.0036580483, %v1540_v61  ;;  %v1552_v2 = vadd.f32 0.014752088, %v1551_v62 }
 0x7a9   : > { %v1505_v20 = vadd.f32 0.18741608, %v1504_v14 }
 0x7aa   : > { %v1517_v3 = vmul.f32 %v1516_v0, %v1497_v41  ;;  %v1553_v4 = vmul.f32 %v1552_v2, %v1537_v52  ;;  %v1542_v8 = vmul.f32 %v1541_v1, %v1537_v52 }
 0x7ab   : > { %v1506_v27 = vmul.f32 %v1505_v20, %v1497_v41 }
 0x7ac   : > { %v1518_v7 = vadd.f32 1.0, %v1517_v3  ;;  %v1554_v11 = vadd.f32 0.112945676, %v1553_v4  ;;  %v1543_v35 = vadd.f32 0.05243302, %v1542_v8 }
 0x7ad   : > { %v1507_v41 = vadd.f32 1.1283791, %v1506_v27 }
 0x7ae   : > { %2209 = vrcp.f32 %v1518_v7  ;;  %v1555_v12 = vmul.f32 %v1554_v11, %v1537_v52  ;;  %v1544_v21 = vmul.f32 %v1543_v35, %v1537_v52  ;;  %v1530_v39 = vand.u32 2147483648, %v1518_v7 }
 0x7af   : > { %v1483_v34 = vpop.f32.mrf.mxu0  ;;  %vm1524_vm6 = vweird.f32 %v1518_v7  ;;  %v1528_v45 = vand.u32 2147483647, %v1518_v7  ;;  %v1508_v62 = vmul.f32 %v1507_v41, %v2597_v30 }
 0x7b0   : > { %v2616_v15 = vadd.f32 %v2591_v29, %v1483_v34  ;;  %v1556_v16 = vadd.f32 0.4994258, %v1555_v12  ;;  %v1545_v28 = vadd.f32 0.18741608, %v1544_v21 }
 0x7b1   : > { %vm1529_vm8 = vcmp.eq.f32.partialorder %v1528_v45, 8.507059e+37 }
 0x7b2   : > { %v2619_v17 = vmul.f32 0.70710677, %v2616_v15  ;;  %v1557_v18 = vmul.f32 %v1556_v16, %v1537_v52  ;;  %v1546_v51 = vmul.f32 %v1545_v28, %v1537_v52 }
 0x7b4   : > { %v2210_v37 = vpop.eup %2209  ;;  %v1576_v22 = vmul.f32 %v2619_v17, %v2619_v17  ;;  %v1558_v23 = vadd.f32 1.0, %v1557_v18  ;;  %v1547_v63 = vadd.f32 1.1283791, %v1546_v51 }
 0x7b5   : > { %v1520_v38 = vmul.f32 %v2210_v37, %v1518_v7  ;;  %vm1525_vm5 = vweird.f32 %v2210_v37 }
 0x7b6   : > { %v2623_v24 = vmin.f32 %v1576_v22, 16.0  ;;  %2211 = vrcp.f32 %v1558_v23  ;;  %vm1526_vm7 = vmor %vm1524_vm6, %vm1525_vm5  ;;  %v1570_v0 = vand.u32 2147483648, %v1558_v23  ;;  %v1568_v6 = vand.u32 2147483647, %v1558_v23 }
 0x7b7   : > { %v1521_v25 = vsub.f32 1.0, %v1520_v38  ;;  %v1485_v26 = vpop.f32.mrf.mxu0  ;;  %vm1564_vm10 = vweird.f32 %v1558_v23  ;;  %v1548_v30 = vmul.f32 %v1547_v63, %v2605_v47 }
 0x7b8   : > { %v1578_v33 = vmul.f32 2.1237322e-06, %v2623_v24  ;;  %v2627_v40 = vadd.f32 %v2591_v29, %v1485_v26  ;;  %v1589_v43 = vmul.f32 3.8918573e-05, %v2623_v24  ;;  %v1531_v29 = vor.u32 1.1754944e-38, %v1530_v39 }
 0x7b9   : > { %v1522_v42 = vmul.f32 %v2210_v37, %v1521_v25  ;;  %v1571_v13 = vor.u32 1.1754944e-38, %v1570_v0  ;;  %vm1569_vm12 = vcmp.eq.f32.partialorder %v1568_v6, 8.507059e+37 }
 0x7ba   : > { %v1579_v48 = vadd.f32 0.00028619796, %v1578_v33  ;;  %v1590_v49 = vadd.f32 0.001143296, %v1589_v43  ;;  %v2631_v50 = vmul.f32 0.70710677, %v2627_v40 }
 0x7bb   : > { %v1523_v46 = vadd.f32 %v2210_v37, %v1522_v42  ;;  %v1488_v33 = vmul.f32 0.5, %v2594_v36  ;;  %v1489_v43 = vmul.f32 0.5, %v2602_v44 }
 0x7bc   : > { %v2212_v53 = vpop.eup %2211  ;;  %v1591_v55 = vmul.f32 %v1590_v49, %v2623_v24  ;;  %v1616_v56 = vmul.f32 %v2631_v50, %v2631_v50  ;;  %v1580_v59 = vmul.f32 %v1579_v48, %v2623_v24 }
 0x7bd   : > { %v1527_v54 = vsel %vm1526_vm7, %v2210_v37, %v1523_v46  ;;  %v1560_v57 = vmul.f32 %v2212_v53, %v1558_v23  ;;  %vm1565_vm9 = vweird.f32 %v2212_v53 }
 0x7be   : > { %v1532_v58 = vsel %vm1529_vm8, %v1531_v29, %v1527_v54  ;;  %v1592_v60 = vadd.f32 0.014752088, %v1591_v55  ;;  %v2637_v61 = vmin.f32 %v1616_v56, 16.0  ;;  %v1581_v7 = vadd.f32 0.0036580483, %v1580_v59  ;;  %vm1566_vm11 = vmor %vm1564_vm10, %vm1565_vm9 }
 0x7bf   : > { %v1561_v52 = vsub.f32 1.0, %v1560_v57  ;;  %v1533_v4 = vmul.f32 %v1532_v58, %v1508_v62 }
 0x7c0   : > { %v1593_v1 = vmul.f32 %v1592_v60, %v2623_v24  ;;  %v1618_v2 = vmul.f32 2.1237322e-06, %v2637_v61  ;;  %v1629_v3 = vmul.f32 3.8918573e-05, %v2637_v61  ;;  %v1582_v21 = vmul.f32 %v1581_v7, %v2623_v24 }
 0x7c1   : > { %v1562_v5 = vmul.f32 %v2212_v53, %v1561_v52  ;;  %v2079_v16 = vclamps-f32 %v1533_v4, 1.0 }
 0x7c2   : > { %v1594_v8 = vadd.f32 0.112945676, %v1593_v1  ;;  %v1619_v11 = vadd.f32 0.00028619796, %v1618_v2  ;;  %v1630_v34 = vadd.f32 0.001143296, %v1629_v3 }
 0x7c3   : > { %v1563_v12 = vadd.f32 %v2212_v53, %v1562_v5  ;;  %v1656_v26 = vadd.f32 1.0, %v2079_v16  ;;  %v1583_v42 = vadd.f32 0.05243302, %v1582_v21 }
 0x7c4   : > { %v1595_v14 = vmul.f32 %v1594_v8, %v2623_v24  ;;  %v1620_v35 = vmul.f32 %v1619_v11, %v2637_v61  ;;  %v1631_v37 = vmul.f32 %v1630_v34, %v2637_v61 }
 0x7c5   : > { %v1567_v18 = vsel %vm1566_vm11, %v2212_v53, %v1563_v12  ;;  %v1660_v49 = vmul.f32 %v1656_v26, %v1488_v33  ;;  %v1584_v53 = vmul.f32 %v1583_v42, %v2623_v24 }
 0x7c6   : > { %v1572_v20 = vsel %vm1569_vm12, %v1571_v13, %v1567_v18  ;;  %v1596_v22 = vadd.f32 0.4994258, %v1595_v14  ;;  %v1621_v23 = vadd.f32 0.0036580483, %v1620_v35  ;;  %v1632_v25 = vadd.f32 0.014752088, %v1631_v37 }
 0x7c7   : > { %v1573_v38 = vmul.f32 %v1572_v20, %v1548_v30  ;;  %v1585_v44 = vadd.f32 0.18741608, %v1584_v53 }
 0x7c8   : > { %v1597_v47 = vmul.f32 %v1596_v22, %v2623_v24  ;;  %v1633_v28 = vmul.f32 %v1632_v25, %v2637_v61  ;;  %v1622_v46 = vmul.f32 %v1621_v23, %v2637_v61  ;;  %v1490_v23 = vmul.f32 0.5, %v2616_v15 }
 0x7c9   : > { %v2080_v27 = vclamps-f32 %v1573_v38, 1.0  ;;  %v1586_v62 = vmul.f32 %v1585_v44, %v2623_v24  ;;  %v1491_v25 = vmul.f32 0.5, %v2627_v40 }
 0x7ca   : > { %v1598_v39 = vadd.f32 1.0, %v1597_v47  ;;  %v1634_v48 = vadd.f32 0.112945676, %v1633_v28  ;;  %v1623_v29 = vadd.f32 0.05243302, %v1622_v46 }
 0x7cb   : > { %v1657_v45 = vadd.f32 1.0, %v2080_v27  ;;  %v1587_v3 = vadd.f32 1.1283791, %v1586_v62 }
 0x7cc   : > { %2213 = vrcp.f32 %v1598_v39  ;;  %v1635_v51 = vmul.f32 %v1634_v48, %v2637_v61  ;;  %v1624_v58 = vmul.f32 %v1623_v29, %v2637_v61  ;;  %v1610_v52 = vand.u32 2147483648, %v1598_v39 }
 0x7cd   : > { %v1661_v41 = vmul.f32 %v1657_v45, %v1489_v43  ;;  %v1608_v1 = vand.u32 2147483647, %v1598_v39  ;;  %vm1604_vm14 = vweird.f32 %v1598_v39  ;;  %v1588_v12 = vmul.f32 %v1587_v3, %v2619_v17 }
 0x7ce   : > { %v1636_v55 = vadd.f32 0.4994258, %v1635_v51  ;;  %v1625_v0 = vadd.f32 0.18741608, %v1624_v58  ;;  %v1611_v6 = vor.u32 1.1754944e-38, %v1610_v52 }
 0x7cf   : > { %v1664_v54 = vpack.c.bf16 %v1661_v41, %v1660_v49  ;;  %vm1609_vm0 = vcmp.eq.f32.partialorder %v1608_v1, 8.507059e+37 }
 0x7d0   : > { %v1637_v36 = vmul.f32 %v1636_v55, %v2637_v61  ;;  %v1626_v7 = vmul.f32 %v1625_v0, %v2637_v61 }
 0x7d1   : > { %2091 = vmatmul.msk.bf16.vlgmr.msrb.gmra.mxu1 %vm949_vm2, %v1664_v54 }
 0x7d2   : > { %v2214_v56 = vpop.eup %2213  ;;  %v1638_v59 = vadd.f32 1.0, %v1637_v36  ;;  %v1627_v34 = vadd.f32 1.1283791, %v1626_v7 }
 0x7d3   : > { %v1600_v57 = vmul.f32 %v2214_v56, %v1598_v39  ;;  %vm1605_vm13 = vweird.f32 %v2214_v56 }
 0x7d4   : > { %2215 = vrcp.f32 %v1638_v59  ;;  %vm1606_vm15 = vmor %vm1604_vm14, %vm1605_vm13  ;;  %v1650_v30 = vand.u32 2147483648, %v1638_v59  ;;  %v1648_v35 = vand.u32 2147483647, %v1638_v59  ;;  %vm1644_vm1 = vweird.f32 %v1638_v59 }
 0x7d5   : > { %v1601_v60 = vsub.f32 1.0, %v1600_v57  ;;  %v1628_v20 = vmul.f32 %v1627_v34, %v2631_v50  ;;  %v2180_v50 = vld [vmem:[%s2732_s11] ss:$0 sm:$0xff] }
 0x7d6   : > { %v1651_v18 = vor.u32 1.1754944e-38, %v1650_v30  ;;  %vm1649_vm5 = vcmp.eq.f32.partialorder %v1648_v35, 8.507059e+37 }
 0x7d7   : > { %v1602_v63 = vmul.f32 %v2214_v56, %v1601_v60 }
 0x7d9   : > { %v1603_v2 = vadd.f32 %v2214_v56, %v1602_v63 }
 0x7da   : > { %v2216_v4 = vpop.eup %2215 }
 0x7db   : > { %v1607_v5 = vsel %vm1606_vm15, %v2214_v56, %v1603_v2  ;;  %v1640_v8 = vmul.f32 %v2216_v4, %v1638_v59  ;;  %vm1645_vm3 = vweird.f32 %v2216_v4 }
 0x7dc   : > { %v1612_v11 = vsel %vm1609_vm0, %v1611_v6, %v1607_v5  ;;  %vm1646_vm4 = vmor %vm1644_vm1, %vm1645_vm3 }
 0x7dd   : > { %v1641_v24 = vsub.f32 1.0, %v1640_v8  ;;  %v1613_v13 = vmul.f32 %v1612_v11, %v1588_v12 }
 0x7df   : > { %v1642_v14 = vmul.f32 %v2216_v4, %v1641_v24  ;;  %v2081_v37 = vclamps-f32 %v1613_v13, 1.0 }
 0x7e1   : > { %v1643_v16 = vadd.f32 %v2216_v4, %v1642_v14  ;;  %v1658_v38 = vadd.f32 1.0, %v2081_v37 }
 0x7e3   : > { %v1647_v61 = vsel %vm1646_vm4, %v2216_v4, %v1643_v16  ;;  %v1662_v26 = vmul.f32 %v1658_v38, %v1490_v23 }
 0x7e4   : > { %v1652_v21 = vsel %vm1649_vm5, %v1651_v18, %v1647_v61 }
 0x7e5   : > { %v1653_v22 = vmul.f32 %v1652_v21, %v1628_v20  ;;  %v2181_v20 = vld [vmem:[%s2735_s14] ss:$0 sm:$0xff] }
 0x7e7   : > { %v2082_v17 = vclamps-f32 %v1653_v22, 1.0  ;;  %v2182_v22 = vld [vmem:[%s2736_s15] ss:$0 sm:$0xff] }
 0x7e9   : > { %v1659_v47 = vadd.f32 1.0, %v2082_v17 }
 0x7eb   : > { %v1663_v27 = vmul.f32 %v1659_v47, %v1491_v25 }
 0x7ed   : > { %v1665_v28 = vpack.c.bf16 %v1663_v27, %v1662_v26 }
 0x7ef   : > { %2092 = vmatmul.msk.bf16.gmra.mxu1 %vm949_vm2, %v1665_v28 }
 0x84e   : > { %v1701_v33 = vpop.f32.mrf.mxu1 }
 0x84f   : > { %v1702_v42 = vadd.f32 %v2180_v50, %v1701_v33 }
 0x851   : > { %v1711_v39 = vadd.f32 %v1702_v42, %v2532_v9 }
 0x853   : > { %v1717_v43 = vsel %vm949_vm2, %v1711_v39, 0.0 }
 0x854   : > { %1718 = vadd.xlane.f32.xlu0 %v1717_v43 }
 0x856   : > { %v1703_v15 = vpop.f32.mrf.mxu1 }
 0x857   : > { %v1704_v45 = vadd.f32 %v2180_v50, %v1703_v15 }
 0x859   : > { %v1712_v40 = vadd.f32 %v1704_v45, %v2534_v10 }
 0x85b   : > { %v1720_v46 = vsel %vm949_vm2, %v1712_v40, 0.0 }
 0x85c   : > { %1721 = vadd.xlane.f32.xlu2 %v1720_v46 }
 0x86c   : > { %v1706_v48 = vpop.f32.mrf.mxu1 }
 0x86d   : > { %v1707_v49 = vadd.f32 %v2180_v50, %v1706_v48 }
 0x86f   : > { %v1713_v41 = vadd.f32 %v1707_v49, %v2542_v31 }
 0x871   : > { %v1723_v51 = vsel %vm949_vm2, %v1713_v41, 0.0 }
 0x872   : > { %1724 = vadd.xlane.f32.xlu1 %v1723_v51 }
 0x874   : > { %v1708_v53 = vpop.f32.mrf.mxu1 }
 0x875   : > { %v1709_v54 = vadd.f32 %v2180_v50, %v1708_v53 }
 0x877   : > { %v1714_v9 = vadd.f32 %v1709_v54, %v2544_v32 }
 0x879   : > { %v1726_v29 = vsel %vm949_vm2, %v1714_v9, 0.0 }
 0x87a   : > { %1727 = vadd.xlane.f32.xlu0 %v1726_v29 }
 0x8c7   : > { %v1719_v55 = vpop.xlane.xlu0 %1718 }
 0x8c8   : > { %v1729_v10 = vmul.f32 %v1719_v55, %v2499_v19 }
 0x8ca   : > { %v1733_v36 = vsub.f32 %v1711_v39, %v1729_v10 }
 0x8cc   : > { %v1737_v56 = vmul.f32 %v1733_v36, %v1733_v36 }
 0x8ce   : > { %v1741_v44 = vsel %vm949_vm2, %v1737_v56, 0.0 }
 0x8cf   : > { %v1722_v57 = vpop.xlane.xlu2 %1721  ;;  %1742 = vadd.xlane.f32.xlu2 %v1741_v44 }
 0x8d0   : > { %v1730_v31 = vmul.f32 %v1722_v57, %v2499_v19 }
 0x8d2   : > { %v1734_v58 = vsub.f32 %v1712_v40, %v1730_v31 }
 0x8d4   : > { %v1738_v59 = vmul.f32 %v1734_v58, %v1734_v58 }
 0x8d6   : > { %v1744_v60 = vsel %vm949_vm2, %v1738_v59, 0.0 }
 0x8d7   : > { %1745 = vadd.xlane.f32.xlu0 %v1744_v60 }
 0x8e5   : > { %v1725_v32 = vpop.xlane.xlu1 %1724 }
 0x8e6   : > { %v1731_v62 = vmul.f32 %v1725_v32, %v2499_v19 }
 0x8e8   : > { %v2681_v63 = vsub.f32 %v1713_v41, %v1731_v62 }
 0x8ea   : > { %v1739_v52 = vmul.f32 %v2681_v63, %v2681_v63 }
 0x8ec   : > { %v1747_v0 = vsel %vm949_vm2, %v1739_v52, 0.0 }
 0x8ed   : > { %1748 = vadd.xlane.f32.xlu2 %v1747_v0  ;;  %v1728_v1 = vpop.xlane.xlu0 %1727 }
 0x8ee   : > { %v1732_v2 = vmul.f32 %v1728_v1, %v2499_v19 }
 0x8f0   : > { %v2687_v3 = vsub.f32 %v1714_v9, %v1732_v2 }
 0x8f2   : > { %v1740_v4 = vmul.f32 %v2687_v3, %v2687_v3 }
 0x8f4   : > { %v1750_v5 = vsel %vm949_vm2, %v1740_v4, 0.0 }
 0x8f5   : > { %1751 = vadd.xlane.f32.xlu1 %v1750_v5 }
 0x942   : > { %v1743_v6 = vpop.xlane.xlu2 %1742 }
 0x943   : > { %v1753_v7 = vmul.f32 %v1743_v6, %v2499_v19 }
 0x945   : > { %v1757_v8 = vadd.f32 1e-05, %v1753_v7 }
 0x947   : > { %2217 = vrsqrt.f32 %v1757_v8  ;;  %vm1767_vm7 = vweird.f32 %v1757_v8 }
 0x94a   : > { %v1746_v11 = vpop.xlane.xlu0 %1745 }
 0x94b   : > { %v1754_v12 = vmul.f32 %v1746_v11, %v2499_v19 }
 0x94d   : > { %v2218_v24 = vpop.eup %2217  ;;  %v1758_v34 = vadd.f32 1e-05, %v1754_v12 }
 0x94e   : > { %v1762_v30 = vmul.f32 %v2218_v24, %v1757_v8  ;;  %vm1768_vm6 = vweird.f32 %v2218_v24 }
 0x94f   : > { %2219 = vrsqrt.f32 %v1758_v34  ;;  %vm1769_vm8 = vmor %vm1767_vm7, %vm1768_vm6  ;;  %vm1777_vm10 = vweird.f32 %v1758_v34 }
 0x950   : > { %v1763_v13 = vmul.f32 %v2218_v24, %v1762_v30 }
 0x952   : > { %v1764_v14 = vmul.f32 0.5, %v1763_v13 }
 0x954   : > { %v1765_v35 = vsub.f32 1.5, %v1764_v14 }
 0x955   : > { %v2220_v16 = vpop.eup %2219 }
 0x956   : > { %v1766_v18 = vmul.f32 %v2218_v24, %v1765_v35  ;;  %v1772_v37 = vmul.f32 %v2220_v16, %v1758_v34  ;;  %vm1778_vm9 = vweird.f32 %v2220_v16 }
 0x957   : > { %vm1779_vm11 = vmor %vm1777_vm10, %vm1778_vm9 }
 0x958   : > { %v1770_v61 = vsel %vm1769_vm8, %v2218_v24, %v1766_v18  ;;  %v1773_v21 = vmul.f32 %v2220_v16, %v1772_v37 }
 0x959   : > { %v1801_v38 = vmul.f32 %v1770_v61, %v1733_v36 }
 0x95a   : > { %v1774_v17 = vmul.f32 0.5, %v1773_v21 }
 0x95b   : > { %v1808_v23 = vmul.f32 %v2181_v20, %v1801_v38 }
 0x95c   : > { %v1775_v25 = vsub.f32 1.5, %v1774_v17 }
 0x95d   : > { %v1815_v47 = vadd.f32 %v2182_v22, %v1808_v23 }
 0x95e   : > { %v1776_v26 = vmul.f32 %v2220_v16, %v1775_v25 }
 0x95f   : > { %1819 = vst.msk [vmem:[%s2704_s28] sm:$0xff] %vm949_vm2, %v1815_v47 }
 0x960   : > { %v1780_v27 = vsel %vm1779_vm11, %v2220_v16, %v1776_v26  ;;  %v1749_v50 = vpop.xlane.xlu2 %1748 }
 0x961   : > { %v1802_v28 = vmul.f32 %v1780_v27, %v1734_v58  ;;  %v1755_v33 = vmul.f32 %v1749_v50, %v2499_v19 }
 0x963   : > { %v1809_v42 = vmul.f32 %v2181_v20, %v1802_v28  ;;  %v1759_v39 = vadd.f32 1e-05, %v1755_v33 }
 0x965   : > { %v1816_v43 = vadd.f32 %v2182_v22, %v1809_v42  ;;  %2221 = vrsqrt.f32 %v1759_v39  ;;  %vm1787_vm13 = vweird.f32 %v1759_v39 }
 0x967   : > { %1820 = vst.msk [vmem:[%s2704_s28 + $0x8] sm:$0xff] %vm949_vm2, %v1816_v43 }
 0x968   : > { %v1752_v15 = vpop.xlane.xlu1 %1751 }
 0x969   : > { %v1756_v45 = vmul.f32 %v1752_v15, %v2499_v19 }
 0x96b   : > { %v2222_v40 = vpop.eup %2221  ;;  %v1760_v46 = vadd.f32 1e-05, %v1756_v45 }
 0x96c   : > { %v1782_v48 = vmul.f32 %v2222_v40, %v1759_v39  ;;  %vm1788_vm12 = vweird.f32 %v2222_v40 }
 0x96d   : > { %2223 = vrsqrt.f32 %v1760_v46  ;;  %vm1789_vm14 = vmor %vm1787_vm13, %vm1788_vm12  ;;  %vm1797_vm0 = vweird.f32 %v1760_v46 }
 0x96e   : > { %v1783_v49 = vmul.f32 %v2222_v40, %v1782_v48 }
 0x970   : > { %v1784_v41 = vmul.f32 0.5, %v1783_v49 }
 0x972   : > { %v1785_v51 = vsub.f32 1.5, %v1784_v41 }
 0x973   : > { %v2224_v53 = vpop.eup %2223 }
 0x974   : > { %v1786_v54 = vmul.f32 %v2222_v40, %v1785_v51  ;;  %v1792_v9 = vmul.f32 %v2224_v53, %v1760_v46  ;;  %vm1798_vm15 = vweird.f32 %v2224_v53 }
 0x975   : > { %vm1799_vm3 = vmor %vm1797_vm0, %vm1798_vm15 }
 0x976   : > { %v1790_v29 = vsel %vm1789_vm14, %v2222_v40, %v1786_v54  ;;  %v1793_v55 = vmul.f32 %v2224_v53, %v1792_v9 }
 0x977   : > { %v1803_v10 = vmul.f32 %v1790_v29, %v2681_v63 }
 0x978   : > { %v1794_v19 = vmul.f32 0.5, %v1793_v55 }
 0x979   : > { %v1810_v36 = vmul.f32 %v2181_v20, %v1803_v10 }
 0x97a   : > { %v1795_v56 = vsub.f32 1.5, %v1794_v19 }
 0x97b   : > { %v1817_v44 = vadd.f32 %v2182_v22, %v1810_v36 }
 0x97c   : > { %v1796_v57 = vmul.f32 %v2224_v53, %v1795_v56 }
 0x97d   : > { %1821 = vst.msk [vmem:[%s2704_s28 + $0x10] sm:$0xff] %vm949_vm2, %v1817_v44 }
 0x97e   : > { %v1800_v31 = vsel %vm1799_vm3, %v2224_v53, %v1796_v57 }
 0x97f   : > { %v1804_v58 = vmul.f32 %v1800_v31, %v2687_v3 }
 0x981   : > { %v1811_v59 = vmul.f32 %v2181_v20, %v1804_v58 }
 0x983   : > { %v1818_v60 = vadd.f32 %v2182_v22, %v1811_v59 }
 0x985   : > { %1822 = vst.msk [vmem:[%s2704_s28 + $0x18] sm:$0xff] %vm949_vm2, %v1818_v60 }
 0x986 PF: > { %s26_s21 = sadd.s32 1, %s2231_s21  }
 0x987   : > { %p23_p4 = scmp.ge.s32.totalorder %s26_s21, 4  }
 0x989   :  { %25 = sbr.rel (!%p23_p4) target bundleno = 2 (0x2), region = 114 }

</bundles_post_ra>
